<compile_context>
chip_gen: v7x
topology: tpu7x:2x2x1
jax: 0.10.0
libtpu: 0.0.40
codegen_flags: <defaults>
</compile_context>

<pallas_src>
import functools
import math

import jax
import jax.numpy as jnp
from jax import lax
from jax.experimental import pallas as pl
from jax.experimental.pallas import tpu as pltpu


def _pick_tile(dim, target):
    """Largest divisor of `dim` that is <= target (whole dim if it fits)."""
    if dim <= target:
        return dim
    for t in range(target, 0, -1):
        if dim % t == 0:
            return t
    return dim


# ----------------------- tiled matmul (+ bias, + relu) ----------------------

def _matmul_kernel(x_ref, w_ref, b_ref, o_ref, acc_ref, *, activation):
    k = pl.program_id(2)

    @pl.when(k == 0)
    def _():
        acc_ref[...] = jnp.zeros_like(acc_ref)

    acc_ref[...] += jnp.dot(x_ref[...], w_ref[...],
                            preferred_element_type=jnp.float32)

    @pl.when(k == pl.num_programs(2) - 1)
    def _():
        y = acc_ref[...] + b_ref[...]
        if activation == "relu":
            y = jnp.maximum(y, 0.0)
        o_ref[...] = y.astype(o_ref.dtype)


def matmul_bias(x, w, b, activation=None, tm=256, tn=512, tk=512):
    """y = x @ w + b (optionally relu), tiled + pipelined."""
    M, K = x.shape
    _, N = w.shape
    tm, tn, tk = _pick_tile(M, tm), _pick_tile(N, tn), _pick_tile(K, tk)
    grid = (M // tm, N // tn, K // tk)
    cost = pl.CostEstimate(flops=2 * M * N * K, transcendentals=0,
                           bytes_accessed=4 * (M * K + K * N + M * N + N))
    return pl.pallas_call(
        functools.partial(_matmul_kernel, activation=activation),
        out_shape=jax.ShapeDtypeStruct((M, N), x.dtype),
        grid=grid,
        in_specs=[pl.BlockSpec((tm, tk), lambda i, j, k: (i, k)),
                  pl.BlockSpec((tk, tn), lambda i, j, k: (k, j)),
                  pl.BlockSpec((1, tn), lambda i, j, k: (0, j))],
        out_specs=pl.BlockSpec((tm, tn), lambda i, j, k: (i, j)),
        scratch_shapes=[pltpu.VMEM((tm, tn), jnp.float32)],
        compiler_params=pltpu.CompilerParams(
            dimension_semantics=("parallel", "parallel", "arbitrary")),
        cost_estimate=cost,
    )(x, w, b.reshape(1, N))


# -------------- tiled matmul with residual + LayerNorm epilogue --------------

def _matmul_res_ln_kernel(x_ref, w_ref, b_ref, res_ref, g_ref, beta_ref,
                          o_ref, acc_ref, *, eps):
    k = pl.program_id(1)

    @pl.when(k == 0)
    def _():
        acc_ref[...] = jnp.zeros_like(acc_ref)

    acc_ref[...] += jnp.dot(x_ref[...], w_ref[...],
                            preferred_element_type=jnp.float32)

    @pl.when(k == pl.num_programs(1) - 1)
    def _():
        y = acc_ref[...] + b_ref[...] + res_ref[...].astype(jnp.float32)
        mean = jnp.mean(y, axis=-1, keepdims=True)
        c = y - mean
        var = jnp.mean(c * c, axis=-1, keepdims=True)   # biased var (PyTorch LN)
        inv = lax.rsqrt(var + eps)
        o_ref[...] = (c * inv * g_ref[...] + beta_ref[...]).astype(o_ref.dtype)


def matmul_residual_layernorm(x, w, b, residual, gamma, beta,
                              eps=1e-5, tm=256, tk=512):
    """LayerNorm(residual + x @ w + b); output dim N is the full model dim."""
    M, K = x.shape
    _, N = w.shape
    tm, tk = _pick_tile(M, tm), _pick_tile(K, tk)
    grid = (M // tm, K // tk)
    return pl.pallas_call(
        functools.partial(_matmul_res_ln_kernel, eps=eps),
        out_shape=jax.ShapeDtypeStruct((M, N), x.dtype),
        grid=grid,
        in_specs=[pl.BlockSpec((tm, tk), lambda i, k: (i, k)),
                  pl.BlockSpec((tk, N), lambda i, k: (k, 0)),
                  pl.BlockSpec((1, N), lambda i, k: (0, 0)),
                  pl.BlockSpec((tm, N), lambda i, k: (i, 0)),
                  pl.BlockSpec((1, N), lambda i, k: (0, 0)),
                  pl.BlockSpec((1, N), lambda i, k: (0, 0))],
        out_specs=pl.BlockSpec((tm, N), lambda i, k: (i, 0)),
        scratch_shapes=[pltpu.VMEM((tm, N), jnp.float32)],
        compiler_params=pltpu.CompilerParams(
            dimension_semantics=("parallel", "arbitrary")),
    )(x, w, b.reshape(1, N), residual, gamma.reshape(1, N), beta.reshape(1, N))


# ----------------- fused FFN: relu(x@W1+b1)@W2+b2 + res + LN -----------------

def _ffn_ln_kernel(x_ref, w1_ref, b1_ref, w2_ref, b2_ref, g_ref, beta_ref,
                   o_ref, acc_ref, *, eps):
    f = pl.program_id(1)

    @pl.when(f == 0)
    def _():
        acc_ref[...] = jnp.zeros_like(acc_ref)

    h = jnp.dot(x_ref[...], w1_ref[...], preferred_element_type=jnp.float32)
    h = jnp.maximum(h + b1_ref[...], 0.0)          # (tm, tf) stays in VMEM/vregs
    acc_ref[...] += jnp.dot(h, w2_ref[...], preferred_element_type=jnp.float32)

    @pl.when(f == pl.num_programs(1) - 1)
    def _():
        # post-norm layer: LN(x + FFN(x)) — the residual is the FFN input tile.
        y = acc_ref[...] + b2_ref[...] + x_ref[...].astype(jnp.float32)
        mean = jnp.mean(y, axis=-1, keepdims=True)
        c = y - mean
        var = jnp.mean(c * c, axis=-1, keepdims=True)
        inv = lax.rsqrt(var + eps)
        o_ref[...] = (c * inv * g_ref[...] + beta_ref[...]).astype(o_ref.dtype)


def ffn_residual_layernorm(x, w1, b1, w2, b2, gamma, beta,
                           eps=1e-5, tm=256, tf=512):
    M, E = x.shape
    _, F = w1.shape
    tm, tf = _pick_tile(M, tm), _pick_tile(F, tf)
    grid = (M // tm, F // tf)
    cost = pl.CostEstimate(flops=4 * M * E * F, transcendentals=0,
                           bytes_accessed=4 * (2 * M * E + 2 * E * F + F + 3 * E))
    return pl.pallas_call(
        functools.partial(_ffn_ln_kernel, eps=eps),
        out_shape=jax.ShapeDtypeStruct((M, E), x.dtype),
        grid=grid,
        in_specs=[pl.BlockSpec((tm, E), lambda i, f: (i, 0)),
                  pl.BlockSpec((E, tf), lambda i, f: (0, f)),
                  pl.BlockSpec((1, tf), lambda i, f: (0, f)),
                  pl.BlockSpec((tf, E), lambda i, f: (f, 0)),
                  pl.BlockSpec((1, E), lambda i, f: (0, 0)),
                  pl.BlockSpec((1, E), lambda i, f: (0, 0)),
                  pl.BlockSpec((1, E), lambda i, f: (0, 0))],
        out_specs=pl.BlockSpec((tm, E), lambda i, f: (i, 0)),
        scratch_shapes=[pltpu.VMEM((tm, E), jnp.float32)],
        compiler_params=pltpu.CompilerParams(
            dimension_semantics=("parallel", "arbitrary")),
        cost_estimate=cost,
    )(x, w1, b1.reshape(1, F), w2, b2.reshape(1, E),
      gamma.reshape(1, E), beta.reshape(1, E))


# ------------------------------ plain LayerNorm ------------------------------

def _layernorm_kernel(x_ref, g_ref, b_ref, o_ref, *, eps):
    x = x_ref[...].astype(jnp.float32)
    mean = jnp.mean(x, axis=-1, keepdims=True)
    c = x - mean
    var = jnp.mean(c * c, axis=-1, keepdims=True)
    inv = lax.rsqrt(var + eps)
    o_ref[...] = (c * inv * g_ref[...] + b_ref[...]).astype(o_ref.dtype)


def layernorm(x, gamma, beta, eps=1e-5, tm=512):
    M, E = x.shape
    tm = _pick_tile(M, tm)
    return pl.pallas_call(
        functools.partial(_layernorm_kernel, eps=eps),
        out_shape=jax.ShapeDtypeStruct((M, E), x.dtype),
        grid=(M // tm,),
        in_specs=[pl.BlockSpec((tm, E), lambda i: (i, 0)),
                  pl.BlockSpec((1, E), lambda i: (0, 0)),
                  pl.BlockSpec((1, E), lambda i: (0, 0))],
        out_specs=pl.BlockSpec((tm, E), lambda i: (i, 0)),
        compiler_params=pltpu.CompilerParams(dimension_semantics=("parallel",)),
    )(x, gamma.reshape(1, E), beta.reshape(1, E))


# --------------------------------- attention ---------------------------------

def _attention_kernel(q_ref, k_ref, v_ref, o_ref, *, n_heads, scale):
    q = q_ref[0].astype(jnp.float32)    # (Lq, E), heads packed along lanes
    k = k_ref[0].astype(jnp.float32)    # (Lk, E)
    v = v_ref[0]                        # (Lk, E)
    E = q.shape[-1]
    dh = E // n_heads
    outs = []
    for h in range(n_heads):            # static unroll over heads
        qh = q[:, h * dh:(h + 1) * dh]
        kh = k[:, h * dh:(h + 1) * dh]
        vh = v[:, h * dh:(h + 1) * dh]
        s = jnp.dot(qh, kh.T, preferred_element_type=jnp.float32) * scale
        m = jnp.max(s, axis=-1, keepdims=True)
        p = jnp.exp(s - m)
        # EUP approx reciprocal instead of a VALU divide
        p = p * pl.reciprocal(jnp.sum(p, axis=-1, keepdims=True), approx=True)
        outs.append(jnp.dot(p.astype(vh.dtype), vh,
                            preferred_element_type=jnp.float32))
    # single lane-dense (Lq, E) store
    o_ref[0] = jnp.concatenate(outs, axis=-1).astype(o_ref.dtype)


def attention(q_slab, kv_slab, *, n_heads, d_model, q_col, k_col, v_col):
    """Multi-head attention on head-packed slabs.

    q_slab : (B, Lq, Wq)  with the query projection at lane-block `q_col`
    kv_slab: (B, Lk, Wkv) with key / value projections at lane-blocks
             `k_col` / `v_col` (each lane-block is d_model wide).
    Returns (B, Lq, d_model).  The head gather is pure BlockSpec addressing —
    no XLA-level reshape/transpose of q/k/v between kernels.
    """
    B, Lq, _ = q_slab.shape
    Lk = kv_slab.shape[1]
    E = d_model
    scale = 1.0 / math.sqrt(E // n_heads)
    return pl.pallas_call(
        functools.partial(_attention_kernel, n_heads=n_heads, scale=scale),
        out_shape=jax.ShapeDtypeStruct((B, Lq, E), q_slab.dtype),
        grid=(B,),
        in_specs=[pl.BlockSpec((1, Lq, E), lambda b: (b, 0, q_col)),
                  pl.BlockSpec((1, Lk, E), lambda b: (b, 0, k_col)),
                  pl.BlockSpec((1, Lk, E), lambda b: (b, 0, v_col))],
        out_specs=pl.BlockSpec((1, Lq, E), lambda b: (b, 0, 0)),
        compiler_params=pltpu.CompilerParams(dimension_semantics=("parallel",)),
    )(q_slab, kv_slab, kv_slab)


# ----------------------------- model forward (glue) --------------------------

def self_attention_block(p, x, n_heads, norm_p):
    """LayerNorm(x + SelfAttn(x)) on a batch-first (B, L, E) tensor -> (B*L, E)."""
    B, L, E = x.shape
    x_flat = x.reshape(B * L, E)
    qkv = matmul_bias(x_flat, p["qkv_w"], p["qkv_b"])           # fused QKV (B*L, 3E)
    qkv = qkv.reshape(B, L, 3 * E)
    attn = attention(qkv, qkv, n_heads=n_heads, d_model=E,
                     q_col=0, k_col=1, v_col=2)                 # (B, L, E)
    return matmul_residual_layernorm(attn.reshape(B * L, E), p["o_w"], p["o_b"],
                                     x_flat, norm_p["g"], norm_p["b"])


def cross_attention_block(p, x, memory, n_heads, norm_p):
    """LayerNorm(x + CrossAttn(x, mem)). x:(B,T,E), memory:(B,S,E) -> (B*T, E)."""
    B, T, E = x.shape
    S = memory.shape[1]
    x_flat = x.reshape(B * T, E)
    q = matmul_bias(x_flat, p["q_w"], p["q_b"]).reshape(B, T, E)
    kv = matmul_bias(memory.reshape(B * S, E),
                     p["kv_w"], p["kv_b"]).reshape(B, S, 2 * E)  # fused KV
    attn = attention(q, kv, n_heads=n_heads, d_model=E,
                     q_col=0, k_col=0, v_col=1)
    return matmul_residual_layernorm(attn.reshape(B * T, E), p["o_w"], p["o_b"],
                                     x_flat, norm_p["g"], norm_p["b"])


def encoder_layer_forward(p, x, n_heads):
    B, L, E = x.shape
    h = self_attention_block(p["self_attn"], x, n_heads, p["norm1"])
    h = ffn_residual_layernorm(h, p["lin1_w"], p["lin1_b"],
                               p["lin2_w"], p["lin2_b"],
                               p["norm2"]["g"], p["norm2"]["b"])
    return h.reshape(B, L, E)


def decoder_layer_forward(p, x, memory, n_heads):
    # NOTE: no causal mask, matching the bare nn.Transformer call with no tgt_mask.
    B, T, E = x.shape
    h = self_attention_block(p["self_attn"], x, n_heads, p["norm1"])
    h = cross_attention_block(p["cross_attn"], h.reshape(B, T, E), memory,
                              n_heads, p["norm2"])
    h = ffn_residual_layernorm(h, p["lin1_w"], p["lin1_b"],
                               p["lin2_w"], p["lin2_b"],
                               p["norm3"]["g"], p["norm3"]["b"])
    return h.reshape(B, T, E)


def transformer_forward(params, src, tgt, n_heads):
    # nn.Transformer(batch_first=False): src (S,B,E), tgt (T,B,E) -> (T,B,E).
    # Run batch-first internally (lane-dense attention, no per-layer transposes).
    src_b = jnp.transpose(src, (1, 0, 2))
    tgt_b = jnp.transpose(tgt, (1, 0, 2))
    B, S, E = src_b.shape
    T = tgt_b.shape[1]

    mem = src_b
    for lp in params["encoder_layers"]:
        mem = encoder_layer_forward(lp, mem, n_heads)
    mem = layernorm(mem.reshape(B * S, E),
                    params["encoder_norm"]["g"],
                    params["encoder_norm"]["b"]).reshape(B, S, E)

    x = tgt_b
    for lp in params["decoder_layers"]:
        x = decoder_layer_forward(lp, x, mem, n_heads)
    x = layernorm(x.reshape(B * T, E),
                  params["decoder_norm"]["g"],
                  params["decoder_norm"]["b"]).reshape(B, T, E)
    return jnp.transpose(x, (1, 0, 2))


# ------------------------------ parameter init -------------------------------

def _init_linear(key, in_dim, out_dim):
    kw, kb = jax.random.split(key)
    return (jax.random.normal(kw, (in_dim, out_dim), jnp.float32) * 0.02,
            jax.random.normal(kb, (out_dim,), jnp.float32) * 0.02)


def init_self_attn_params(key, d_model):
    k1, k2 = jax.random.split(key)
    qkv_w, qkv_b = _init_linear(k1, d_model, 3 * d_model)
    o_w, o_b = _init_linear(k2, d_model, d_model)
    return {"qkv_w": qkv_w, "qkv_b": qkv_b, "o_w": o_w, "o_b": o_b}


def init_cross_attn_params(key, d_model):
    k1, k2, k3 = jax.random.split(key, 3)
    q_w, q_b = _init_linear(k1, d_model, d_model)
    kv_w, kv_b = _init_linear(k2, d_model, 2 * d_model)
    o_w, o_b = _init_linear(k3, d_model, d_model)
    return {"q_w": q_w, "q_b": q_b, "kv_w": kv_w, "kv_b": kv_b,
            "o_w": o_w, "o_b": o_b}


def init_ln_params(d_model):
    return {"g": jnp.ones((d_model,), jnp.float32),
            "b": jnp.zeros((d_model,), jnp.float32)}


def init_transformer_params(key, d_model, n_enc, n_dec, dim_ff):
    keys = jax.random.split(key, n_enc + n_dec)
    enc_layers = []
    for i in range(n_enc):
        ks = jax.random.split(keys[i], 3)
        l1w, l1b = _init_linear(ks[1], d_model, dim_ff)
        l2w, l2b = _init_linear(ks[2], dim_ff, d_model)
        enc_layers.append({
            "self_attn": init_self_attn_params(ks[0], d_model),
            "norm1": init_ln_params(d_model),
            "lin1_w": l1w, "lin1_b": l1b,
            "lin2_w": l2w, "lin2_b": l2b,
            "norm2": init_ln_params(d_model),
        })
    dec_layers = []
    for i in range(n_dec):
        ks = jax.random.split(keys[n_enc + i], 4)
        l1w, l1b = _init_linear(ks[2], d_model, dim_ff)
        l2w, l2b = _init_linear(ks[3], dim_ff, d_model)
        dec_layers.append({
            "self_attn": init_self_attn_params(ks[0], d_model),
            "norm1": init_ln_params(d_model),
            "cross_attn": init_cross_attn_params(ks[1], d_model),
            "norm2": init_ln_params(d_model),
            "lin1_w": l1w, "lin1_b": l1b,
            "lin2_w": l2w, "lin2_b": l2b,
            "norm3": init_ln_params(d_model),
        })
    return {"encoder_layers": enc_layers,
            "decoder_layers": dec_layers,
            "encoder_norm": init_ln_params(d_model),
            "decoder_norm": init_ln_params(d_model)}


# ----------------------------------- main ------------------------------------

if __name__ == "__main__":
    # Small, demo-sized instantiation of Transformer(d_model, n_heads, n_enc, n_dec).
    D_MODEL = 128
    N_HEADS = 2
    N_ENC = 2
    N_DEC = 2
    DIM_FF = 2048          # nn.Transformer default (not exposed by the wrapper)
    S, T, B = 8, 8, 2      # src seq len, tgt seq len, batch

    key = jax.random.PRNGKey(0)
    kp, ks, kt = jax.random.split(key, 3)
    params = init_transformer_params(kp, D_MODEL, N_ENC, N_DEC, DIM_FF)
    src = jax.random.normal(ks, (S, B, D_MODEL), jnp.float32)
    tgt = jax.random.normal(kt, (T, B, D_MODEL), jnp.float32)

    fwd = jax.jit(functools.partial(transformer_forward, n_heads=N_HEADS))
    out = fwd(params, src, tgt)
    out = jax.block_until_ready(out)

    assert out.shape == (T, B, D_MODEL), out.shape
    assert out.dtype == jnp.float32
    assert bool(jnp.all(jnp.isfinite(out)))
    print("KERNEL_OK")
</pallas_src>

<mosaic_0001>
module attributes {stable_mosaic.version = 11 : i64} {
  func.func @_matmul_kernel(%arg0: i32, %arg1: i32, %arg2: i32, %arg3: memref<16x128xf32, #tpu.memory_space<vmem>>, %arg4: memref<128x384xf32, #tpu.memory_space<vmem>>, %arg5: memref<1x384xf32, #tpu.memory_space<vmem>>, %arg6: memref<16x384xf32, #tpu.memory_space<vmem>>, %arg7: memref<16x384xf32, #tpu.memory_space<vmem>>) attributes {dimension_semantics = [#tpu.dimension_semantics<parallel>, #tpu.dimension_semantics<parallel>, #tpu.dimension_semantics<arbitrary>], iteration_bounds = array<i64: 1, 1, 1>, scalar_prefetch = 0 : i64, scratch_operands = 1 : i64, tpu.core_type = #tpu.core_type<tc>, window_params = [{transform_indices = @transform_0, window_bounds = array<i64: 16, 128>}, {transform_indices = @transform_1, window_bounds = array<i64: 128, 384>}, {transform_indices = @transform_2, window_bounds = array<i64: 1, 384>}, {transform_indices = @transform_3, window_bounds = array<i64: 16, 384>}]} {
    %c0_i32 = arith.constant 0 : i32
    %0 = arith.cmpi eq, %arg2, %c0_i32 : i32
    %1 = arith.extui %0 : i1 to i32
    %c0_i32_0 = arith.constant 0 : i32
    %2 = arith.cmpi ne, %1, %c0_i32_0 : i32
    scf.if %2 {
      %cst_10 = arith.constant 0.000000e+00 : f32
      %12 = vector.broadcast %cst_10 : f32 to vector<16x384xf32>
      %c0_11 = arith.constant 0 : index
      %c0_12 = arith.constant 0 : index
      %13 = vector.load %arg7[%c0_11, %c0_12] : memref<16x384xf32, #tpu.memory_space<vmem>>, vector<16x384xf32>
      tpu.vector_store %arg7[%c0_11, %c0_12], %12 {strides = array<i32>} : memref<16x384xf32, #tpu.memory_space<vmem>>, vector<16x384xf32>,
    } else {
    }
    %c0 = arith.constant 0 : index
    %c0_1 = arith.constant 0 : index
    %3 = vector.load %arg7[%c0, %c0_1] : memref<16x384xf32, #tpu.memory_space<vmem>>, vector<16x384xf32>
    %c0_2 = arith.constant 0 : index
    %c0_3 = arith.constant 0 : index
    %4 = vector.load %arg3[%c0_2, %c0_3] : memref<16x128xf32, #tpu.memory_space<vmem>>, vector<16x128xf32>
    %c0_4 = arith.constant 0 : index
    %c0_5 = arith.constant 0 : index
    %5 = vector.load %arg4[%c0_4, %c0_5] : memref<128x384xf32, #tpu.memory_space<vmem>>, vector<128x384xf32>
    %cst = arith.constant dense<0.000000e+00> : vector<16x384xf32>
    %6 = tpu.matmul %4, %5, %cst {dimension_numbers = #tpu.dot_dimension_numbers<[1], [0], [0], [1], [0, 0, 1, 1], [], []>} : vector<16x128xf32>, vector<128x384xf32>, vector<16x384xf32> -> vector<16x384xf32>
    %7 = arith.addf %3, %6 : vector<16x384xf32>
    %c0_6 = arith.constant 0 : index
    %c0_7 = arith.constant 0 : index
    %8 = vector.load %arg7[%c0_6, %c0_7] : memref<16x384xf32, #tpu.memory_space<vmem>>, vector<16x384xf32>
    tpu.vector_store %arg7[%c0_6, %c0_7], %7 {strides = array<i32>} : memref<16x384xf32, #tpu.memory_space<vmem>>, vector<16x384xf32>,
    %c0_i32_8 = arith.constant 0 : i32
    %9 = arith.cmpi eq, %arg2, %c0_i32_8 : i32
    %10 = arith.extui %9 : i1 to i32
    %c0_i32_9 = arith.constant 0 : i32
    %11 = arith.cmpi ne, %10, %c0_i32_9 : i32
    scf.if %11 {
      %c0_10 = arith.constant 0 : index
      %c0_11 = arith.constant 0 : index
      %12 = vector.load %arg7[%c0_10, %c0_11] : memref<16x384xf32, #tpu.memory_space<vmem>>, vector<16x384xf32>
      %c0_12 = arith.constant 0 : index
      %c0_13 = arith.constant 0 : index
      %13 = vector.load %arg5[%c0_12, %c0_13] : memref<1x384xf32, #tpu.memory_space<vmem>>, vector<1x384xf32>
      %14 = vector.broadcast %13 : vector<1x384xf32> to vector<16x384xf32>
      %15 = arith.addf %12, %14 : vector<16x384xf32>
      %c0_14 = arith.constant 0 : index
      %c0_15 = arith.constant 0 : index
      %16 = vector.load %arg6[%c0_14, %c0_15] : memref<16x384xf32, #tpu.memory_space<vmem>>, vector<16x384xf32>
      tpu.vector_store %arg6[%c0_14, %c0_15], %15 {strides = array<i32>} : memref<16x384xf32, #tpu.memory_space<vmem>>, vector<16x384xf32>,
    } else {
    }
    return
  }
  func.func @transform_0(%arg0: i32, %arg1: i32, %arg2: i32) -> (i32, i32) {
    %c0_i32 = arith.constant 0 : i32
    return %arg0, %arg2 : i32, i32
  }
  func.func @transform_1(%arg0: i32, %arg1: i32, %arg2: i32) -> (i32, i32) {
    %c0_i32 = arith.constant 0 : i32
    return %arg2, %arg1 : i32, i32
  }
  func.func @transform_2(%arg0: i32, %arg1: i32, %arg2: i32) -> (i32, i32) {
    %c0_i32 = arith.constant 0 : i32
    %c0_i32_0 = arith.constant 0 : i32
    return %c0_i32, %arg1 : i32, i32
  }
  func.func @transform_3(%arg0: i32, %arg1: i32, %arg2: i32) -> (i32, i32) {
    %c0_i32 = arith.constant 0 : i32
    return %arg0, %arg1 : i32, i32
  }
}

module attributes {stable_mosaic.version = 11 : i64} {
  func.func @_attention_kernel(%arg0: i32, %arg1: memref<1x8x128xf32, #tpu.memory_space<vmem>>, %arg2: memref<1x8x128xf32, #tpu.memory_space<vmem>>, %arg3: memref<1x8x128xf32, #tpu.memory_space<vmem>>, %arg4: memref<1x8x128xf32, #tpu.memory_space<vmem>>) attributes {dimension_semantics = [#tpu.dimension_semantics<parallel>], iteration_bounds = array<i64: 2>, scalar_prefetch = 0 : i64, scratch_operands = 0 : i64, tpu.core_type = #tpu.core_type<tc>, window_params = [{transform_indices = @transform_0, window_bounds = array<i64: 1, 8, 128>}, {transform_indices = @transform_1, window_bounds = array<i64: 1, 8, 128>}, {transform_indices = @transform_2, window_bounds = array<i64: 1, 8, 128>}, {transform_indices = @transform_3, window_bounds = array<i64: 1, 8, 128>}]} {
    %c0 = arith.constant 0 : index
    %c0_0 = arith.constant 0 : index
    %c0_1 = arith.constant 0 : index
    %0 = vector.load %arg1[%c0, %c0_0, %c0_1] : memref<1x8x128xf32, #tpu.memory_space<vmem>>, vector<1x8x128xf32>
    %1 = vector.shape_cast %0 : vector<1x8x128xf32> to vector<8x128xf32>
    %c0_2 = arith.constant 0 : index
    %c0_3 = arith.constant 0 : index
    %c0_4 = arith.constant 0 : index
    %2 = vector.load %arg2[%c0_2, %c0_3, %c0_4] : memref<1x8x128xf32, #tpu.memory_space<vmem>>, vector<1x8x128xf32>
    %3 = vector.shape_cast %2 : vector<1x8x128xf32> to vector<8x128xf32>
    %c0_5 = arith.constant 0 : index
    %c0_6 = arith.constant 0 : index
    %c0_7 = arith.constant 0 : index
    %4 = vector.load %arg3[%c0_5, %c0_6, %c0_7] : memref<1x8x128xf32, #tpu.memory_space<vmem>>, vector<1x8x128xf32>
    %5 = vector.shape_cast %4 : vector<1x8x128xf32> to vector<8x128xf32>
    %6 = vector.extract_strided_slice %1 {offsets = [0, 0], sizes = [8, 64], strides = [1, 1]} : vector<8x128xf32> to vector<8x64xf32>
    %7 = vector.extract_strided_slice %3 {offsets = [0, 0], sizes = [8, 64], strides = [1, 1]} : vector<8x128xf32> to vector<8x64xf32>
    %8 = vector.extract_strided_slice %5 {offsets = [0, 0], sizes = [8, 64], strides = [1, 1]} : vector<8x128xf32> to vector<8x64xf32>
    %9 = tpu.transpose %7, [1, 0] : vector<8x64xf32> -> vector<64x8xf32>
    %cst = arith.constant dense<0.000000e+00> : vector<8x8xf32>
    %10 = tpu.matmul %6, %9, %cst {dimension_numbers = #tpu.dot_dimension_numbers<[1], [0], [0], [1], [0, 0, 1, 1], [], []>} : vector<8x64xf32>, vector<64x8xf32>, vector<8x8xf32> -> vector<8x8xf32>
    %cst_8 = arith.constant 1.250000e-01 : f32
    %11 = vector.broadcast %cst_8 : f32 to vector<8x8xf32>
    %12 = arith.mulf %10, %11 : vector<8x8xf32>
    %cst_9 = arith.constant dense<0xFF800000> : vector<8xf32>
    %13 = vector.multi_reduction <maximumf>, %12, %cst_9 [1] : vector<8x8xf32> to vector<8xf32>
    %14 = vector.shape_cast %13 : vector<8xf32> to vector<8x1xf32>
    %15 = vector.broadcast %14 : vector<8x1xf32> to vector<8x8xf32>
    %16 = arith.subf %12, %15 : vector<8x8xf32>
    %17 = math.exp %16 : vector<8x8xf32>
    %cst_10 = arith.constant dense<0.000000e+00> : vector<8xf32>
    %18 = vector.multi_reduction <add>, %17, %cst_10 [1] : vector<8x8xf32> to vector<8xf32>
    %19 = vector.shape_cast %18 : vector<8xf32> to vector<8x1xf32>
    %20 = tpu.reciprocal %19 {approx = true} : vector<8x1xf32> -> vector<8x1xf32>
    %21 = vector.broadcast %20 : vector<8x1xf32> to vector<8x8xf32>
    %22 = arith.mulf %17, %21 : vector<8x8xf32>
    %cst_11 = arith.constant dense<0.000000e+00> : vector<8x64xf32>
    %23 = tpu.matmul %22, %8, %cst_11 {dimension_numbers = #tpu.dot_dimension_numbers<[1], [0], [0], [1], [0, 0, 1, 1], [], []>} : vector<8x8xf32>, vector<8x64xf32>, vector<8x64xf32> -> vector<8x64xf32>
    %24 = vector.extract_strided_slice %1 {offsets = [0, 64], sizes = [8, 64], strides = [1, 1]} : vector<8x128xf32> to vector<8x64xf32>
    %25 = vector.extract_strided_slice %3 {offsets = [0, 64], sizes = [8, 64], strides = [1, 1]} : vector<8x128xf32> to vector<8x64xf32>
    %26 = vector.extract_strided_slice %5 {offsets = [0, 64], sizes = [8, 64], strides = [1, 1]} : vector<8x128xf32> to vector<8x64xf32>
    %27 = tpu.transpose %25, [1, 0] : vector<8x64xf32> -> vector<64x8xf32>
    %cst_12 = arith.constant dense<0.000000e+00> : vector<8x8xf32>
    %28 = tpu.matmul %24, %27, %cst_12 {dimension_numbers = #tpu.dot_dimension_numbers<[1], [0], [0], [1], [0, 0, 1, 1], [], []>} : vector<8x64xf32>, vector<64x8xf32>, vector<8x8xf32> -> vector<8x8xf32>
    %cst_13 = arith.constant 1.250000e-01 : f32
    %29 = vector.broadcast %cst_13 : f32 to vector<8x8xf32>
    %30 = arith.mulf %28, %29 : vector<8x8xf32>
    %cst_14 = arith.constant dense<0xFF800000> : vector<8xf32>
    %31 = vector.multi_reduction <maximumf>, %30, %cst_14 [1] : vector<8x8xf32> to vector<8xf32>
    %32 = vector.shape_cast %31 : vector<8xf32> to vector<8x1xf32>
    %33 = vector.broadcast %32 : vector<8x1xf32> to vector<8x8xf32>
    %34 = arith.subf %30, %33 : vector<8x8xf32>
    %35 = math.exp %34 : vector<8x8xf32>
    %cst_15 = arith.constant dense<0.000000e+00> : vector<8xf32>
    %36 = vector.multi_reduction <add>, %35, %cst_15 [1] : vector<8x8xf32> to vector<8xf32>
    %37 = vector.shape_cast %36 : vector<8xf32> to vector<8x1xf32>
    %38 = tpu.reciprocal %37 {approx = true} : vector<8x1xf32> -> vector<8x1xf32>
    %39 = vector.broadcast %38 : vector<8x1xf32> to vector<8x8xf32>
    %40 = arith.mulf %35, %39 : vector<8x8xf32>
    %cst_16 = arith.constant dense<0.000000e+00> : vector<8x64xf32>
    %41 = tpu.matmul %40, %26, %cst_16 {dimension_numbers = #tpu.dot_dimension_numbers<[1], [0], [0], [1], [0, 0, 1, 1], [], []>} : vector<8x8xf32>, vector<8x64xf32>, vector<8x64xf32> -> vector<8x64xf32>
    %42 = tpu.concatenate %23, %41 in 1 : vector<8x64xf32>, vector<8x64xf32> -> vector<8x128xf32>
    %c0_17 = arith.constant 0 : index
    %c0_18 = arith.constant 0 : index
    %c0_19 = arith.constant 0 : index
    %43 = vector.load %arg4[%c0_17, %c0_18, %c0_19] : memref<1x8x128xf32, #tpu.memory_space<vmem>>, vector<1x8x128xf32>
    %44 = vector.shape_cast %43 : vector<1x8x128xf32> to vector<8x128xf32>
    %45 = vector.shape_cast %42 : vector<8x128xf32> to vector<1x8x128xf32>
    tpu.vector_store %arg4[%c0_17, %c0_18, %c0_19], %45 {strides = array<i32>} : memref<1x8x128xf32, #tpu.memory_space<vmem>>, vector<1x8x128xf32>,
    return
  }
  func.func @transform_0(%arg0: i32) -> (i32, i32, i32) {
    %c0_i32 = arith.constant 0 : i32
    %c0_i32_0 = arith.constant 0 : i32
    %c0_i32_1 = arith.constant 0 : i32
    return %arg0, %c0_i32, %c0_i32_0 : i32, i32, i32
  }
  func.func @transform_1(%arg0: i32) -> (i32, i32, i32) {
    %c0_i32 = arith.constant 0 : i32
    %c1_i32 = arith.constant 1 : i32
    %c0_i32_0 = arith.constant 0 : i32
    return %arg0, %c0_i32, %c1_i32 : i32, i32, i32
  }
  func.func @transform_2(%arg0: i32) -> (i32, i32, i32) {
    %c0_i32 = arith.constant 0 : i32
    %c2_i32 = arith.constant 2 : i32
    %c0_i32_0 = arith.constant 0 : i32
    return %arg0, %c0_i32, %c2_i32 : i32, i32, i32
  }
  func.func @transform_3(%arg0: i32) -> (i32, i32, i32) {
    %c0_i32 = arith.constant 0 : i32
    %c0_i32_0 = arith.constant 0 : i32
    %c0_i32_1 = arith.constant 0 : i32
    return %arg0, %c0_i32, %c0_i32_0 : i32, i32, i32
  }
}

module attributes {stable_mosaic.version = 11 : i64} {
  func.func @_matmul_kernel(%arg0: i32, %arg1: i32, %arg2: i32, %arg3: memref<16x128xf32, #tpu.memory_space<vmem>>, %arg4: memref<128x128xf32, #tpu.memory_space<vmem>>, %arg5: memref<1x128xf32, #tpu.memory_space<vmem>>, %arg6: memref<16x128xf32, #tpu.memory_space<vmem>>, %arg7: memref<16x128xf32, #tpu.memory_space<vmem>>) attributes {dimension_semantics = [#tpu.dimension_semantics<parallel>, #tpu.dimension_semantics<parallel>, #tpu.dimension_semantics<arbitrary>], iteration_bounds = array<i64: 1, 1, 1>, scalar_prefetch = 0 : i64, scratch_operands = 1 : i64, tpu.core_type = #tpu.core_type<tc>, window_params = [{transform_indices = @transform_0, window_bounds = array<i64: 16, 128>}, {transform_indices = @transform_1, window_bounds = array<i64: 128, 128>}, {transform_indices = @transform_2, window_bounds = array<i64: 1, 128>}, {transform_indices = @transform_3, window_bounds = array<i64: 16, 128>}]} {
    %c0_i32 = arith.constant 0 : i32
    %0 = arith.cmpi eq, %arg2, %c0_i32 : i32
    %1 = arith.extui %0 : i1 to i32
    %c0_i32_0 = arith.constant 0 : i32
    %2 = arith.cmpi ne, %1, %c0_i32_0 : i32
    scf.if %2 {
      %cst_10 = arith.constant 0.000000e+00 : f32
      %12 = vector.broadcast %cst_10 : f32 to vector<16x128xf32>
      %c0_11 = arith.constant 0 : index
      %c0_12 = arith.constant 0 : index
      %13 = vector.load %arg7[%c0_11, %c0_12] : memref<16x128xf32, #tpu.memory_space<vmem>>, vector<16x128xf32>
      tpu.vector_store %arg7[%c0_11, %c0_12], %12 {strides = array<i32>} : memref<16x128xf32, #tpu.memory_space<vmem>>, vector<16x128xf32>,
    } else {
    }
    %c0 = arith.constant 0 : index
    %c0_1 = arith.constant 0 : index
    %3 = vector.load %arg7[%c0, %c0_1] : memref<16x128xf32, #tpu.memory_space<vmem>>, vector<16x128xf32>
    %c0_2 = arith.constant 0 : index
    %c0_3 = arith.constant 0 : index
    %4 = vector.load %arg3[%c0_2, %c0_3] : memref<16x128xf32, #tpu.memory_space<vmem>>, vector<16x128xf32>
    %c0_4 = arith.constant 0 : index
    %c0_5 = arith.constant 0 : index
    %5 = vector.load %arg4[%c0_4, %c0_5] : memref<128x128xf32, #tpu.memory_space<vmem>>, vector<128x128xf32>
    %cst = arith.constant dense<0.000000e+00> : vector<16x128xf32>
    %6 = tpu.matmul %4, %5, %cst {dimension_numbers = #tpu.dot_dimension_numbers<[1], [0], [0], [1], [0, 0, 1, 1], [], []>} : vector<16x128xf32>, vector<128x128xf32>, vector<16x128xf32> -> vector<16x128xf32>
    %7 = arith.addf %3, %6 : vector<16x128xf32>
    %c0_6 = arith.constant 0 : index
    %c0_7 = arith.constant 0 : index
    %8 = vector.load %arg7[%c0_6, %c0_7] : memref<16x128xf32, #tpu.memory_space<vmem>>, vector<16x128xf32>
    tpu.vector_store %arg7[%c0_6, %c0_7], %7 {strides = array<i32>} : memref<16x128xf32, #tpu.memory_space<vmem>>, vector<16x128xf32>,
    %c0_i32_8 = arith.constant 0 : i32
    %9 = arith.cmpi eq, %arg2, %c0_i32_8 : i32
    %10 = arith.extui %9 : i1 to i32
    %c0_i32_9 = arith.constant 0 : i32
    %11 = arith.cmpi ne, %10, %c0_i32_9 : i32
    scf.if %11 {
      %c0_10 = arith.constant 0 : index
      %c0_11 = arith.constant 0 : index
      %12 = vector.load %arg7[%c0_10, %c0_11] : memref<16x128xf32, #tpu.memory_space<vmem>>, vector<16x128xf32>
      %c0_12 = arith.constant 0 : index
      %c0_13 = arith.constant 0 : index
      %13 = vector.load %arg5[%c0_12, %c0_13] : memref<1x128xf32, #tpu.memory_space<vmem>>, vector<1x128xf32>
      %14 = vector.broadcast %13 : vector<1x128xf32> to vector<16x128xf32>
      %15 = arith.addf %12, %14 : vector<16x128xf32>
      %c0_14 = arith.constant 0 : index
      %c0_15 = arith.constant 0 : index
      %16 = vector.load %arg6[%c0_14, %c0_15] : memref<16x128xf32, #tpu.memory_space<vmem>>, vector<16x128xf32>
      tpu.vector_store %arg6[%c0_14, %c0_15], %15 {strides = array<i32>} : memref<16x128xf32, #tpu.memory_space<vmem>>, vector<16x128xf32>,
    } else {
    }
    return
  }
  func.func @transform_0(%arg0: i32, %arg1: i32, %arg2: i32) -> (i32, i32) {
    %c0_i32 = arith.constant 0 : i32
    return %arg0, %arg2 : i32, i32
  }
  func.func @transform_1(%arg0: i32, %arg1: i32, %arg2: i32) -> (i32, i32) {
    %c0_i32 = arith.constant 0 : i32
    return %arg2, %arg1 : i32, i32
  }
  func.func @transform_2(%arg0: i32, %arg1: i32, %arg2: i32) -> (i32, i32) {
    %c0_i32 = arith.constant 0 : i32
    %c0_i32_0 = arith.constant 0 : i32
    return %c0_i32, %arg1 : i32, i32
  }
  func.func @transform_3(%arg0: i32, %arg1: i32, %arg2: i32) -> (i32, i32) {
    %c0_i32 = arith.constant 0 : i32
    return %arg0, %arg1 : i32, i32
  }
}

module attributes {stable_mosaic.version = 11 : i64} {
  func.func @_matmul_res_ln_kernel(%arg0: i32, %arg1: i32, %arg2: memref<16x128xf32, #tpu.memory_space<vmem>>, %arg3: memref<128x128xf32, #tpu.memory_space<vmem>>, %arg4: memref<1x128xf32, #tpu.memory_space<vmem>>, %arg5: memref<16x128xf32, #tpu.memory_space<vmem>>, %arg6: memref<1x128xf32, #tpu.memory_space<vmem>>, %arg7: memref<1x128xf32, #tpu.memory_space<vmem>>, %arg8: memref<16x128xf32, #tpu.memory_space<vmem>>, %arg9: memref<16x128xf32, #tpu.memory_space<vmem>>) attributes {dimension_semantics = [#tpu.dimension_semantics<parallel>, #tpu.dimension_semantics<arbitrary>], iteration_bounds = array<i64: 1, 1>, scalar_prefetch = 0 : i64, scratch_operands = 1 : i64, tpu.core_type = #tpu.core_type<tc>, window_params = [{transform_indices = @transform_0, window_bounds = array<i64: 16, 128>}, {transform_indices = @transform_1, window_bounds = array<i64: 128, 128>}, {pipeline_mode = #tpu.pipeline_mode<synchronous>, transform_indices = @transform_2, window_bounds = array<i64: 1, 128>}, {transform_indices = @transform_3, window_bounds = array<i64: 16, 128>}, {pipeline_mode = #tpu.pipeline_mode<synchronous>, transform_indices = @transform_4, window_bounds = array<i64: 1, 128>}, {pipeline_mode = #tpu.pipeline_mode<synchronous>, transform_indices = @transform_5, window_bounds = array<i64: 1, 128>}, {transform_indices = @transform_6, window_bounds = array<i64: 16, 128>}]} {
    %c0_i32 = arith.constant 0 : i32
    %0 = arith.cmpi eq, %arg1, %c0_i32 : i32
    %1 = arith.extui %0 : i1 to i32
    %c0_i32_0 = arith.constant 0 : i32
    %2 = arith.cmpi ne, %1, %c0_i32_0 : i32
    scf.if %2 {
      %cst_10 = arith.constant 0.000000e+00 : f32
      %12 = vector.broadcast %cst_10 : f32 to vector<16x128xf32>
      %c0_11 = arith.constant 0 : index
      %c0_12 = arith.constant 0 : index
      %13 = vector.load %arg9[%c0_11, %c0_12] : memref<16x128xf32, #tpu.memory_space<vmem>>, vector<16x128xf32>
      tpu.vector_store %arg9[%c0_11, %c0_12], %12 {strides = array<i32>} : memref<16x128xf32, #tpu.memory_space<vmem>>, vector<16x128xf32>,
    } else {
    }
    %c0 = arith.constant 0 : index
    %c0_1 = arith.constant 0 : index
    %3 = vector.load %arg9[%c0, %c0_1] : memref<16x128xf32, #tpu.memory_space<vmem>>, vector<16x128xf32>
    %c0_2 = arith.constant 0 : index
    %c0_3 = arith.constant 0 : index
    %4 = vector.load %arg2[%c0_2, %c0_3] : memref<16x128xf32, #tpu.memory_space<vmem>>, vector<16x128xf32>
    %c0_4 = arith.constant 0 : index
    %c0_5 = arith.constant 0 : index
    %5 = vector.load %arg3[%c0_4, %c0_5] : memref<128x128xf32, #tpu.memory_space<vmem>>, vector<128x128xf32>
    %cst = arith.constant dense<0.000000e+00> : vector<16x128xf32>
    %6 = tpu.matmul %4, %5, %cst {dimension_numbers = #tpu.dot_dimension_numbers<[1], [0], [0], [1], [0, 0, 1, 1], [], []>} : vector<16x128xf32>, vector<128x128xf32>, vector<16x128xf32> -> vector<16x128xf32>
    %7 = arith.addf %3, %6 : vector<16x128xf32>
    %c0_6 = arith.constant 0 : index
    %c0_7 = arith.constant 0 : index
    %8 = vector.load %arg9[%c0_6, %c0_7] : memref<16x128xf32, #tpu.memory_space<vmem>>, vector<16x128xf32>
    tpu.vector_store %arg9[%c0_6, %c0_7], %7 {strides = array<i32>} : memref<16x128xf32, #tpu.memory_space<vmem>>, vector<16x128xf32>,
    %c0_i32_8 = arith.constant 0 : i32
    %9 = arith.cmpi eq, %arg1, %c0_i32_8 : i32
    %10 = arith.extui %9 : i1 to i32
    %c0_i32_9 = arith.constant 0 : i32
    %11 = arith.cmpi ne, %10, %c0_i32_9 : i32
    scf.if %11 {
      %c0_10 = arith.constant 0 : index
      %c0_11 = arith.constant 0 : index
      %12 = vector.load %arg9[%c0_10, %c0_11] : memref<16x128xf32, #tpu.memory_space<vmem>>, vector<16x128xf32>
      %c0_12 = arith.constant 0 : index
      %c0_13 = arith.constant 0 : index
      %13 = vector.load %arg4[%c0_12, %c0_13] : memref<1x128xf32, #tpu.memory_space<vmem>>, vector<1x128xf32>
      %14 = vector.broadcast %13 : vector<1x128xf32> to vector<16x128xf32>
      %15 = arith.addf %12, %14 : vector<16x128xf32>
      %c0_14 = arith.constant 0 : index
      %c0_15 = arith.constant 0 : index
      %16 = vector.load %arg5[%c0_14, %c0_15] : memref<16x128xf32, #tpu.memory_space<vmem>>, vector<16x128xf32>
      %17 = arith.addf %15, %16 : vector<16x128xf32>
      %cst_16 = arith.constant dense<0.000000e+00> : vector<16xf32>
      %18 = vector.multi_reduction <add>, %17, %cst_16 [1] : vector<16x128xf32> to vector<16xf32>
      %19 = vector.shape_cast %18 : vector<16xf32> to vector<16x1xf32>
      %cst_17 = arith.constant 1.280000e+02 : f32
      %20 = vector.broadcast %cst_17 : f32 to vector<16x1xf32>
      %21 = arith.divf %19, %20 : vector<16x1xf32>
      %22 = vector.broadcast %21 : vector<16x1xf32> to vector<16x128xf32>
      %23 = arith.subf %17, %22 : vector<16x128xf32>
      %24 = arith.mulf %23, %23 : vector<16x128xf32>
      %cst_18 = arith.constant dense<0.000000e+00> : vector<16xf32>
      %25 = vector.multi_reduction <add>, %24, %cst_18 [1] : vector<16x128xf32> to vector<16xf32>
      %26 = vector.shape_cast %25 : vector<16xf32> to vector<16x1xf32>
      %cst_19 = arith.constant 1.280000e+02 : f32
      %27 = vector.broadcast %cst_19 : f32 to vector<16x1xf32>
      %28 = arith.divf %26, %27 : vector<16x1xf32>
      %cst_20 = arith.constant 9.99999974E-6 : f32
      %29 = vector.broadcast %cst_20 : f32 to vector<16x1xf32>
      %30 = arith.addf %28, %29 : vector<16x1xf32>
      %31 = math.rsqrt %30 : vector<16x1xf32>
      %32 = vector.broadcast %31 : vector<16x1xf32> to vector<16x128xf32>
      %33 = arith.mulf %23, %32 : vector<16x128xf32>
      %c0_21 = arith.constant 0 : index
      %c0_22 = arith.constant 0 : index
      %34 = vector.load %arg6[%c0_21, %c0_22] : memref<1x128xf32, #tpu.memory_space<vmem>>, vector<1x128xf32>
      %35 = vector.broadcast %34 : vector<1x128xf32> to vector<16x128xf32>
      %36 = arith.mulf %33, %35 : vector<16x128xf32>
      %c0_23 = arith.constant 0 : index
      %c0_24 = arith.constant 0 : index
      %37 = vector.load %arg7[%c0_23, %c0_24] : memref<1x128xf32, #tpu.memory_space<vmem>>, vector<1x128xf32>
      %38 = vector.broadcast %37 : vector<1x128xf32> to vector<16x128xf32>
      %39 = arith.addf %36, %38 : vector<16x128xf32>
      %c0_25 = arith.constant 0 : index
      %c0_26 = arith.constant 0 : index
      %40 = vector.load %arg8[%c0_25, %c0_26] : memref<16x128xf32, #tpu.memory_space<vmem>>, vector<16x128xf32>
      tpu.vector_store %arg8[%c0_25, %c0_26], %39 {strides = array<i32>} : memref<16x128xf32, #tpu.memory_space<vmem>>, vector<16x128xf32>,
    } else {
    }
    return
  }
  func.func @transform_0(%arg0: i32, %arg1: i32) -> (i32, i32) {
    %c0_i32 = arith.constant 0 : i32
    return %arg0, %arg1 : i32, i32
  }
  func.func @transform_1(%arg0: i32, %arg1: i32) -> (i32, i32) {
    %c0_i32 = arith.constant 0 : i32
    %c0_i32_0 = arith.constant 0 : i32
    return %arg1, %c0_i32 : i32, i32
  }
  func.func @transform_2(%arg0: i32, %arg1: i32) -> (i32, i32) {
    %c0_i32 = arith.constant 0 : i32
    %c0_i32_0 = arith.constant 0 : i32
    %c0_i32_1 = arith.constant 0 : i32
    return %c0_i32, %c0_i32_0 : i32, i32
  }
  func.func @transform_3(%arg0: i32, %arg1: i32) -> (i32, i32) {
    %c0_i32 = arith.constant 0 : i32
    %c0_i32_0 = arith.constant 0 : i32
    return %arg0, %c0_i32 : i32, i32
  }
  func.func @transform_4(%arg0: i32, %arg1: i32) -> (i32, i32) {
    %c0_i32 = arith.constant 0 : i32
    %c0_i32_0 = arith.constant 0 : i32
    %c0_i32_1 = arith.constant 0 : i32
    return %c0_i32, %c0_i32_0 : i32, i32
  }
  func.func @transform_5(%arg0: i32, %arg1: i32) -> (i32, i32) {
    %c0_i32 = arith.constant 0 : i32
    %c0_i32_0 = arith.constant 0 : i32
    %c0_i32_1 = arith.constant 0 : i32
    return %c0_i32, %c0_i32_0 : i32, i32
  }
  func.func @transform_6(%arg0: i32, %arg1: i32) -> (i32, i32) {
    %c0_i32 = arith.constant 0 : i32
    %c0_i32_0 = arith.constant 0 : i32
    return %arg0, %c0_i32 : i32, i32
  }
}

module attributes {stable_mosaic.version = 11 : i64} {
  func.func @_matmul_res_ln_kernel(%arg0: i32, %arg1: i32, %arg2: memref<16x128xf32, #tpu.memory_space<vmem>>, %arg3: memref<128x128xf32, #tpu.memory_space<vmem>>, %arg4: memref<1x128xf32, #tpu.memory_space<vmem>>, %arg5: memref<16x128xf32, #tpu.memory_space<vmem>>, %arg6: memref<1x128xf32, #tpu.memory_space<vmem>>, %arg7: memref<1x128xf32, #tpu.memory_space<vmem>>, %arg8: memref<16x128xf32, #tpu.memory_space<vmem>>, %arg9: memref<16x128xf32, #tpu.memory_space<vmem>>) attributes {dimension_semantics = [#tpu.dimension_semantics<parallel>, #tpu.dimension_semantics<arbitrary>], iteration_bounds = array<i64: 1, 1>, scalar_prefetch = 0 : i64, scratch_operands = 1 : i64, tpu.core_type = #tpu.core_type<tc>, window_params = [{transform_indices = @transform_0, window_bounds = array<i64: 16, 128>}, {transform_indices = @transform_1, window_bounds = array<i64: 128, 128>}, {pipeline_mode = #tpu.pipeline_mode<synchronous>, transform_indices = @transform_2, window_bounds = array<i64: 1, 128>}, {transform_indices = @transform_3, window_bounds = array<i64: 16, 128>}, {pipeline_mode = #tpu.pipeline_mode<synchronous>, transform_indices = @transform_4, window_bounds = array<i64: 1, 128>}, {pipeline_mode = #tpu.pipeline_mode<synchronous>, transform_indices = @transform_5, window_bounds = array<i64: 1, 128>}, {transform_indices = @transform_6, window_bounds = array<i64: 16, 128>}]} {
    %c0_i32 = arith.constant 0 : i32
    %0 = arith.cmpi eq, %arg1, %c0_i32 : i32
    %1 = arith.extui %0 : i1 to i32
    %c0_i32_0 = arith.constant 0 : i32
    %2 = arith.cmpi ne, %1, %c0_i32_0 : i32
    scf.if %2 {
      %cst_10 = arith.constant 0.000000e+00 : f32
      %12 = vector.broadcast %cst_10 : f32 to vector<16x128xf32>
      %c0_11 = arith.constant 0 : index
      %c0_12 = arith.constant 0 : index
      %13 = vector.load %arg9[%c0_11, %c0_12] : memref<16x128xf32, #tpu.memory_space<vmem>>, vector<16x128xf32>
      tpu.vector_store %arg9[%c0_11, %c0_12], %12 {strides = array<i32>} : memref<16x128xf32, #tpu.memory_space<vmem>>, vector<16x128xf32>,
    } else {
    }
    %c0 = arith.constant 0 : index
    %c0_1 = arith.constant 0 : index
    %3 = vector.load %arg9[%c0, %c0_1] : memref<16x128xf32, #tpu.memory_space<vmem>>, vector<16x128xf32>
    %c0_2 = arith.constant 0 : index
    %c0_3 = arith.constant 0 : index
    %4 = vector.load %arg2[%c0_2, %c0_3] : memref<16x128xf32, #tpu.memory_space<vmem>>, vector<16x128xf32>
    %c0_4 = arith.constant 0 : index
    %c0_5 = arith.constant 0 : index
    %5 = vector.load %arg3[%c0_4, %c0_5] : memref<128x128xf32, #tpu.memory_space<vmem>>, vector<128x128xf32>
    %cst = arith.constant dense<0.000000e+00> : vector<16x128xf32>
    %6 = tpu.matmul %4, %5, %cst {dimension_numbers = #tpu.dot_dimension_numbers<[1], [0], [0], [1], [0, 0, 1, 1], [], []>} : vector<16x128xf32>, vector<128x128xf32>, vector<16x128xf32> -> vector<16x128xf32>
    %7 = arith.addf %3, %6 : vector<16x128xf32>
    %c0_6 = arith.constant 0 : index
    %c0_7 = arith.constant 0 : index
    %8 = vector.load %arg9[%c0_6, %c0_7] : memref<16x128xf32, #tpu.memory_space<vmem>>, vector<16x128xf32>
    tpu.vector_store %arg9[%c0_6, %c0_7], %7 {strides = array<i32>} : memref<16x128xf32, #tpu.memory_space<vmem>>, vector<16x128xf32>,
    %c0_i32_8 = arith.constant 0 : i32
    %9 = arith.cmpi eq, %arg1, %c0_i32_8 : i32
    %10 = arith.extui %9 : i1 to i32
    %c0_i32_9 = arith.constant 0 : i32
    %11 = arith.cmpi ne, %10, %c0_i32_9 : i32
    scf.if %11 {
      %c0_10 = arith.constant 0 : index
      %c0_11 = arith.constant 0 : index
      %12 = vector.load %arg9[%c0_10, %c0_11] : memref<16x128xf32, #tpu.memory_space<vmem>>, vector<16x128xf32>
      %c0_12 = arith.constant 0 : index
      %c0_13 = arith.constant 0 : index
      %13 = vector.load %arg4[%c0_12, %c0_13] : memref<1x128xf32, #tpu.memory_space<vmem>>, vector<1x128xf32>
      %14 = vector.broadcast %13 : vector<1x128xf32> to vector<16x128xf32>
      %15 = arith.addf %12, %14 : vector<16x128xf32>
      %c0_14 = arith.constant 0 : index
      %c0_15 = arith.constant 0 : index
      %16 = vector.load %arg5[%c0_14, %c0_15] : memref<16x128xf32, #tpu.memory_space<vmem>>, vector<16x128xf32>
      %17 = arith.addf %15, %16 : vector<16x128xf32>
      %cst_16 = arith.constant dense<0.000000e+00> : vector<16xf32>
      %18 = vector.multi_reduction <add>, %17, %cst_16 [1] : vector<16x128xf32> to vector<16xf32>
      %19 = vector.shape_cast %18 : vector<16xf32> to vector<16x1xf32>
      %cst_17 = arith.constant 1.280000e+02 : f32
      %20 = vector.broadcast %cst_17 : f32 to vector<16x1xf32>
      %21 = arith.divf %19, %20 : vector<16x1xf32>
      %22 = vector.broadcast %21 : vector<16x1xf32> to vector<16x128xf32>
      %23 = arith.subf %17, %22 : vector<16x128xf32>
      %24 = arith.mulf %23, %23 : vector<16x128xf32>
      %cst_18 = arith.constant dense<0.000000e+00> : vector<16xf32>
      %25 = vector.multi_reduction <add>, %24, %cst_18 [1] : vector<16x128xf32> to vector<16xf32>
      %26 = vector.shape_cast %25 : vector<16xf32> to vector<16x1xf32>
      %cst_19 = arith.constant 1.280000e+02 : f32
      %27 = vector.broadcast %cst_19 : f32 to vector<16x1xf32>
      %28 = arith.divf %26, %27 : vector<16x1xf32>
      %cst_20 = arith.constant 9.99999974E-6 : f32
      %29 = vector.broadcast %cst_20 : f32 to vector<16x1xf32>
      %30 = arith.addf %28, %29 : vector<16x1xf32>
      %31 = math.rsqrt %30 : vector<16x1xf32>
      %32 = vector.broadcast %31 : vector<16x1xf32> to vector<16x128xf32>
      %33 = arith.mulf %23, %32 : vector<16x128xf32>
      %c0_21 = arith.constant 0 : index
      %c0_22 = arith.constant 0 : index
      %34 = vector.load %arg6[%c0_21, %c0_22] : memref<1x128xf32, #tpu.memory_space<vmem>>, vector<1x128xf32>
      %35 = vector.broadcast %34 : vector<1x128xf32> to vector<16x128xf32>
      %36 = arith.mulf %33, %35 : vector<16x128xf32>
      %c0_23 = arith.constant 0 : index
      %c0_24 = arith.constant 0 : index
      %37 = vector.load %arg7[%c0_23, %c0_24] : memref<1x128xf32, #tpu.memory_space<vmem>>, vector<1x128xf32>
      %38 = vector.broadcast %37 : vector<1x128xf32> to vector<16x128xf32>
      %39 = arith.addf %36, %38 : vector<16x128xf32>
      %c0_25 = arith.constant 0 : index
      %c0_26 = arith.constant 0 : index
      %40 = vector.load %arg8[%c0_25, %c0_26] : memref<16x128xf32, #tpu.memory_space<vmem>>, vector<16x128xf32>
      tpu.vector_store %arg8[%c0_25, %c0_26], %39 {strides = array<i32>} : memref<16x128xf32, #tpu.memory_space<vmem>>, vector<16x128xf32>,
    } else {
    }
    return
  }
  func.func @transform_0(%arg0: i32, %arg1: i32) -> (i32, i32) {
    %c0_i32 = arith.constant 0 : i32
    return %arg0, %arg1 : i32, i32
  }
  func.func @transform_1(%arg0: i32, %arg1: i32) -> (i32, i32) {
    %c0_i32 = arith.constant 0 : i32
    %c0_i32_0 = arith.constant 0 : i32
    return %arg1, %c0_i32 : i32, i32
  }
  func.func @transform_2(%arg0: i32, %arg1: i32) -> (i32, i32) {
    %c0_i32 = arith.constant 0 : i32
    %c0_i32_0 = arith.constant 0 : i32
    %c0_i32_1 = arith.constant 0 : i32
    return %c0_i32, %c0_i32_0 : i32, i32
  }
  func.func @transform_3(%arg0: i32, %arg1: i32) -> (i32, i32) {
    %c0_i32 = arith.constant 0 : i32
    %c0_i32_0 = arith.constant 0 : i32
    return %arg0, %c0_i32 : i32, i32
  }
  func.func @transform_4(%arg0: i32, %arg1: i32) -> (i32, i32) {
    %c0_i32 = arith.constant 0 : i32
    %c0_i32_0 = arith.constant 0 : i32
    %c0_i32_1 = arith.constant 0 : i32
    return %c0_i32, %c0_i32_0 : i32, i32
  }
  func.func @transform_5(%arg0: i32, %arg1: i32) -> (i32, i32) {
    %c0_i32 = arith.constant 0 : i32
    %c0_i32_0 = arith.constant 0 : i32
    %c0_i32_1 = arith.constant 0 : i32
    return %c0_i32, %c0_i32_0 : i32, i32
  }
  func.func @transform_6(%arg0: i32, %arg1: i32) -> (i32, i32) {
    %c0_i32 = arith.constant 0 : i32
    %c0_i32_0 = arith.constant 0 : i32
    return %arg0, %c0_i32 : i32, i32
  }
}

module attributes {stable_mosaic.version = 11 : i64} {
  func.func @_ffn_ln_kernel(%arg0: i32, %arg1: i32, %arg2: memref<16x128xf32, #tpu.memory_space<vmem>>, %arg3: memref<128x512xf32, #tpu.memory_space<vmem>>, %arg4: memref<1x512xf32, #tpu.memory_space<vmem>>, %arg5: memref<512x128xf32, #tpu.memory_space<vmem>>, %arg6: memref<1x128xf32, #tpu.memory_space<vmem>>, %arg7: memref<1x128xf32, #tpu.memory_space<vmem>>, %arg8: memref<1x128xf32, #tpu.memory_space<vmem>>, %arg9: memref<16x128xf32, #tpu.memory_space<vmem>>, %arg10: memref<16x128xf32, #tpu.memory_space<vmem>>) attributes {dimension_semantics = [#tpu.dimension_semantics<parallel>, #tpu.dimension_semantics<arbitrary>], iteration_bounds = array<i64: 1, 4>, scalar_prefetch = 0 : i64, scratch_operands = 1 : i64, tpu.core_type = #tpu.core_type<tc>, window_params = [{transform_indices = @transform_0, window_bounds = array<i64: 16, 128>}, {transform_indices = @transform_1, window_bounds = array<i64: 128, 512>}, {transform_indices = @transform_2, window_bounds = array<i64: 1, 512>}, {transform_indices = @transform_3, window_bounds = array<i64: 512, 128>}, {pipeline_mode = #tpu.pipeline_mode<synchronous>, transform_indices = @transform_4, window_bounds = array<i64: 1, 128>}, {pipeline_mode = #tpu.pipeline_mode<synchronous>, transform_indices = @transform_5, window_bounds = array<i64: 1, 128>}, {pipeline_mode = #tpu.pipeline_mode<synchronous>, transform_indices = @transform_6, window_bounds = array<i64: 1, 128>}, {transform_indices = @transform_7, window_bounds = array<i64: 16, 128>}]} {
    %c0_i32 = arith.constant 0 : i32
    %0 = arith.cmpi eq, %arg1, %c0_i32 : i32
    %1 = arith.extui %0 : i1 to i32
    %c0_i32_0 = arith.constant 0 : i32
    %2 = arith.cmpi ne, %1, %c0_i32_0 : i32
    scf.if %2 {
      %cst_15 = arith.constant 0.000000e+00 : f32
      %19 = vector.broadcast %cst_15 : f32 to vector<16x128xf32>
      %c0_16 = arith.constant 0 : index
      %c0_17 = arith.constant 0 : index
      %20 = vector.load %arg10[%c0_16, %c0_17] : memref<16x128xf32, #tpu.memory_space<vmem>>, vector<16x128xf32>
      tpu.vector_store %arg10[%c0_16, %c0_17], %19 {strides = array<i32>} : memref<16x128xf32, #tpu.memory_space<vmem>>, vector<16x128xf32>,
    } else {
    }
    %c0 = arith.constant 0 : index
    %c0_1 = arith.constant 0 : index
    %3 = vector.load %arg2[%c0, %c0_1] : memref<16x128xf32, #tpu.memory_space<vmem>>, vector<16x128xf32>
    %c0_2 = arith.constant 0 : index
    %c0_3 = arith.constant 0 : index
    %4 = vector.load %arg3[%c0_2, %c0_3] : memref<128x512xf32, #tpu.memory_space<vmem>>, vector<128x512xf32>
    %cst = arith.constant dense<0.000000e+00> : vector<16x512xf32>
    %5 = tpu.matmul %3, %4, %cst {dimension_numbers = #tpu.dot_dimension_numbers<[1], [0], [0], [1], [0, 0, 1, 1], [], []>} : vector<16x128xf32>, vector<128x512xf32>, vector<16x512xf32> -> vector<16x512xf32>
    %c0_4 = arith.constant 0 : index
    %c0_5 = arith.constant 0 : index
    %6 = vector.load %arg4[%c0_4, %c0_5] : memref<1x512xf32, #tpu.memory_space<vmem>>, vector<1x512xf32>
    %7 = vector.broadcast %6 : vector<1x512xf32> to vector<16x512xf32>
    %8 = arith.addf %5, %7 : vector<16x512xf32>
    %cst_6 = arith.constant 0.000000e+00 : f32
    %9 = vector.broadcast %cst_6 : f32 to vector<16x512xf32>
    %10 = arith.maximumf %8, %9 : vector<16x512xf32>
    %c0_7 = arith.constant 0 : index
    %c0_8 = arith.constant 0 : index
    %11 = vector.load %arg10[%c0_7, %c0_8] : memref<16x128xf32, #tpu.memory_space<vmem>>, vector<16x128xf32>
    %c0_9 = arith.constant 0 : index
    %c0_10 = arith.constant 0 : index
    %12 = vector.load %arg5[%c0_9, %c0_10] : memref<512x128xf32, #tpu.memory_space<vmem>>, vector<512x128xf32>
    %cst_11 = arith.constant dense<0.000000e+00> : vector<16x128xf32>
    %13 = tpu.matmul %10, %12, %cst_11 {dimension_numbers = #tpu.dot_dimension_numbers<[1], [0], [0], [1], [0, 0, 1, 1], [], []>} : vector<16x512xf32>, vector<512x128xf32>, vector<16x128xf32> -> vector<16x128xf32>
    %14 = arith.addf %11, %13 : vector<16x128xf32>
    %c0_12 = arith.constant 0 : index
    %c0_13 = arith.constant 0 : index
    %15 = vector.load %arg10[%c0_12, %c0_13] : memref<16x128xf32, #tpu.memory_space<vmem>>, vector<16x128xf32>
    tpu.vector_store %arg10[%c0_12, %c0_13], %14 {strides = array<i32>} : memref<16x128xf32, #tpu.memory_space<vmem>>, vector<16x128xf32>,
    %c3_i32 = arith.constant 3 : i32
    %16 = arith.cmpi eq, %arg1, %c3_i32 : i32
    %17 = arith.extui %16 : i1 to i32
    %c0_i32_14 = arith.constant 0 : i32
    %18 = arith.cmpi ne, %17, %c0_i32_14 : i32
    scf.if %18 {
      %c0_15 = arith.constant 0 : index
      %c0_16 = arith.constant 0 : index
      %19 = vector.load %arg10[%c0_15, %c0_16] : memref<16x128xf32, #tpu.memory_space<vmem>>, vector<16x128xf32>
      %c0_17 = arith.constant 0 : index
      %c0_18 = arith.constant 0 : index
      %20 = vector.load %arg6[%c0_17, %c0_18] : memref<1x128xf32, #tpu.memory_space<vmem>>, vector<1x128xf32>
      %21 = vector.broadcast %20 : vector<1x128xf32> to vector<16x128xf32>
      %22 = arith.addf %19, %21 : vector<16x128xf32>
      %c0_19 = arith.constant 0 : index
      %c0_20 = arith.constant 0 : index
      %23 = vector.load %arg2[%c0_19, %c0_20] : memref<16x128xf32, #tpu.memory_space<vmem>>, vector<16x128xf32>
      %24 = arith.addf %22, %23 : vector<16x128xf32>
      %cst_21 = arith.constant dense<0.000000e+00> : vector<16xf32>
      %25 = vector.multi_reduction <add>, %24, %cst_21 [1] : vector<16x128xf32> to vector<16xf32>
      %26 = vector.shape_cast %25 : vector<16xf32> to vector<16x1xf32>
      %cst_22 = arith.constant 1.280000e+02 : f32
      %27 = vector.broadcast %cst_22 : f32 to vector<16x1xf32>
      %28 = arith.divf %26, %27 : vector<16x1xf32>
      %29 = vector.broadcast %28 : vector<16x1xf32> to vector<16x128xf32>
      %30 = arith.subf %24, %29 : vector<16x128xf32>
      %31 = arith.mulf %30, %30 : vector<16x128xf32>
      %cst_23 = arith.constant dense<0.000000e+00> : vector<16xf32>
      %32 = vector.multi_reduction <add>, %31, %cst_23 [1] : vector<16x128xf32> to vector<16xf32>
      %33 = vector.shape_cast %32 : vector<16xf32> to vector<16x1xf32>
      %cst_24 = arith.constant 1.280000e+02 : f32
      %34 = vector.broadcast %cst_24 : f32 to vector<16x1xf32>
      %35 = arith.divf %33, %34 : vector<16x1xf32>
      %cst_25 = arith.constant 9.99999974E-6 : f32
      %36 = vector.broadcast %cst_25 : f32 to vector<16x1xf32>
      %37 = arith.addf %35, %36 : vector<16x1xf32>
      %38 = math.rsqrt %37 : vector<16x1xf32>
      %39 = vector.broadcast %38 : vector<16x1xf32> to vector<16x128xf32>
      %40 = arith.mulf %30, %39 : vector<16x128xf32>
      %c0_26 = arith.constant 0 : index
      %c0_27 = arith.constant 0 : index
      %41 = vector.load %arg7[%c0_26, %c0_27] : memref<1x128xf32, #tpu.memory_space<vmem>>, vector<1x128xf32>
      %42 = vector.broadcast %41 : vector<1x128xf32> to vector<16x128xf32>
      %43 = arith.mulf %40, %42 : vector<16x128xf32>
      %c0_28 = arith.constant 0 : index
      %c0_29 = arith.constant 0 : index
      %44 = vector.load %arg8[%c0_28, %c0_29] : memref<1x128xf32, #tpu.memory_space<vmem>>, vector<1x128xf32>
      %45 = vector.broadcast %44 : vector<1x128xf32> to vector<16x128xf32>
      %46 = arith.addf %43, %45 : vector<16x128xf32>
      %c0_30 = arith.constant 0 : index
      %c0_31 = arith.constant 0 : index
      %47 = vector.load %arg9[%c0_30, %c0_31] : memref<16x128xf32, #tpu.memory_space<vmem>>, vector<16x128xf32>
      tpu.vector_store %arg9[%c0_30, %c0_31], %46 {strides = array<i32>} : memref<16x128xf32, #tpu.memory_space<vmem>>, vector<16x128xf32>,
    } else {
    }
    return
  }
  func.func @transform_0(%arg0: i32, %arg1: i32) -> (i32, i32) {
    %c0_i32 = arith.constant 0 : i32
    %c0_i32_0 = arith.constant 0 : i32
    return %arg0, %c0_i32 : i32, i32
  }
  func.func @transform_1(%arg0: i32, %arg1: i32) -> (i32, i32) {
    %c0_i32 = arith.constant 0 : i32
    %c0_i32_0 = arith.constant 0 : i32
    return %c0_i32, %arg1 : i32, i32
  }
  func.func @transform_2(%arg0: i32, %arg1: i32) -> (i32, i32) {
    %c0_i32 = arith.constant 0 : i32
    %c0_i32_0 = arith.constant 0 : i32
    return %c0_i32, %arg1 : i32, i32
  }
  func.func @transform_3(%arg0: i32, %arg1: i32) -> (i32, i32) {
    %c0_i32 = arith.constant 0 : i32
    %c0_i32_0 = arith.constant 0 : i32
    return %arg1, %c0_i32 : i32, i32
  }
  func.func @transform_4(%arg0: i32, %arg1: i32) -> (i32, i32) {
    %c0_i32 = arith.constant 0 : i32
    %c0_i32_0 = arith.constant 0 : i32
    %c0_i32_1 = arith.constant 0 : i32
    return %c0_i32, %c0_i32_0 : i32, i32
  }
  func.func @transform_5(%arg0: i32, %arg1: i32) -> (i32, i32) {
    %c0_i32 = arith.constant 0 : i32
    %c0_i32_0 = arith.constant 0 : i32
    %c0_i32_1 = arith.constant 0 : i32
    return %c0_i32, %c0_i32_0 : i32, i32
  }
  func.func @transform_6(%arg0: i32, %arg1: i32) -> (i32, i32) {
    %c0_i32 = arith.constant 0 : i32
    %c0_i32_0 = arith.constant 0 : i32
    %c0_i32_1 = arith.constant 0 : i32
    return %c0_i32, %c0_i32_0 : i32, i32
  }
  func.func @transform_7(%arg0: i32, %arg1: i32) -> (i32, i32) {
    %c0_i32 = arith.constant 0 : i32
    %c0_i32_0 = arith.constant 0 : i32
    return %arg0, %c0_i32 : i32, i32
  }
}

module attributes {stable_mosaic.version = 11 : i64} {
  func.func @_matmul_kernel(%arg0: i32, %arg1: i32, %arg2: i32, %arg3: memref<16x128xf32, #tpu.memory_space<vmem>>, %arg4: memref<128x384xf32, #tpu.memory_space<vmem>>, %arg5: memref<1x384xf32, #tpu.memory_space<vmem>>, %arg6: memref<16x384xf32, #tpu.memory_space<vmem>>, %arg7: memref<16x384xf32, #tpu.memory_space<vmem>>) attributes {dimension_semantics = [#tpu.dimension_semantics<parallel>, #tpu.dimension_semantics<parallel>, #tpu.dimension_semantics<arbitrary>], iteration_bounds = array<i64: 1, 1, 1>, scalar_prefetch = 0 : i64, scratch_operands = 1 : i64, tpu.core_type = #tpu.core_type<tc>, window_params = [{transform_indices = @transform_0, window_bounds = array<i64: 16, 128>}, {transform_indices = @transform_1, window_bounds = array<i64: 128, 384>}, {transform_indices = @transform_2, window_bounds = array<i64: 1, 384>}, {transform_indices = @transform_3, window_bounds = array<i64: 16, 384>}]} {
    %c0_i32 = arith.constant 0 : i32
    %0 = arith.cmpi eq, %arg2, %c0_i32 : i32
    %1 = arith.extui %0 : i1 to i32
    %c0_i32_0 = arith.constant 0 : i32
    %2 = arith.cmpi ne, %1, %c0_i32_0 : i32
    scf.if %2 {
      %cst_10 = arith.constant 0.000000e+00 : f32
      %12 = vector.broadcast %cst_10 : f32 to vector<16x384xf32>
      %c0_11 = arith.constant 0 : index
      %c0_12 = arith.constant 0 : index
      %13 = vector.load %arg7[%c0_11, %c0_12] : memref<16x384xf32, #tpu.memory_space<vmem>>, vector<16x384xf32>
      tpu.vector_store %arg7[%c0_11, %c0_12], %12 {strides = array<i32>} : memref<16x384xf32, #tpu.memory_space<vmem>>, vector<16x384xf32>,
    } else {
    }
    %c0 = arith.constant 0 : index
    %c0_1 = arith.constant 0 : index
    %3 = vector.load %arg7[%c0, %c0_1] : memref<16x384xf32, #tpu.memory_space<vmem>>, vector<16x384xf32>
    %c0_2 = arith.constant 0 : index
    %c0_3 = arith.constant 0 : index
    %4 = vector.load %arg3[%c0_2, %c0_3] : memref<16x128xf32, #tpu.memory_space<vmem>>, vector<16x128xf32>
    %c0_4 = arith.constant 0 : index
    %c0_5 = arith.constant 0 : index
    %5 = vector.load %arg4[%c0_4, %c0_5] : memref<128x384xf32, #tpu.memory_space<vmem>>, vector<128x384xf32>
    %cst = arith.constant dense<0.000000e+00> : vector<16x384xf32>
    %6 = tpu.matmul %4, %5, %cst {dimension_numbers = #tpu.dot_dimension_numbers<[1], [0], [0], [1], [0, 0, 1, 1], [], []>} : vector<16x128xf32>, vector<128x384xf32>, vector<16x384xf32> -> vector<16x384xf32>
    %7 = arith.addf %3, %6 : vector<16x384xf32>
    %c0_6 = arith.constant 0 : index
    %c0_7 = arith.constant 0 : index
    %8 = vector.load %arg7[%c0_6, %c0_7] : memref<16x384xf32, #tpu.memory_space<vmem>>, vector<16x384xf32>
    tpu.vector_store %arg7[%c0_6, %c0_7], %7 {strides = array<i32>} : memref<16x384xf32, #tpu.memory_space<vmem>>, vector<16x384xf32>,
    %c0_i32_8 = arith.constant 0 : i32
    %9 = arith.cmpi eq, %arg2, %c0_i32_8 : i32
    %10 = arith.extui %9 : i1 to i32
    %c0_i32_9 = arith.constant 0 : i32
    %11 = arith.cmpi ne, %10, %c0_i32_9 : i32
    scf.if %11 {
      %c0_10 = arith.constant 0 : index
      %c0_11 = arith.constant 0 : index
      %12 = vector.load %arg7[%c0_10, %c0_11] : memref<16x384xf32, #tpu.memory_space<vmem>>, vector<16x384xf32>
      %c0_12 = arith.constant 0 : index
      %c0_13 = arith.constant 0 : index
      %13 = vector.load %arg5[%c0_12, %c0_13] : memref<1x384xf32, #tpu.memory_space<vmem>>, vector<1x384xf32>
      %14 = vector.broadcast %13 : vector<1x384xf32> to vector<16x384xf32>
      %15 = arith.addf %12, %14 : vector<16x384xf32>
      %c0_14 = arith.constant 0 : index
      %c0_15 = arith.constant 0 : index
      %16 = vector.load %arg6[%c0_14, %c0_15] : memref<16x384xf32, #tpu.memory_space<vmem>>, vector<16x384xf32>
      tpu.vector_store %arg6[%c0_14, %c0_15], %15 {strides = array<i32>} : memref<16x384xf32, #tpu.memory_space<vmem>>, vector<16x384xf32>,
    } else {
    }
    return
  }
  func.func @transform_0(%arg0: i32, %arg1: i32, %arg2: i32) -> (i32, i32) {
    %c0_i32 = arith.constant 0 : i32
    return %arg0, %arg2 : i32, i32
  }
  func.func @transform_1(%arg0: i32, %arg1: i32, %arg2: i32) -> (i32, i32) {
    %c0_i32 = arith.constant 0 : i32
    return %arg2, %arg1 : i32, i32
  }
  func.func @transform_2(%arg0: i32, %arg1: i32, %arg2: i32) -> (i32, i32) {
    %c0_i32 = arith.constant 0 : i32
    %c0_i32_0 = arith.constant 0 : i32
    return %c0_i32, %arg1 : i32, i32
  }
  func.func @transform_3(%arg0: i32, %arg1: i32, %arg2: i32) -> (i32, i32) {
    %c0_i32 = arith.constant 0 : i32
    return %arg0, %arg1 : i32, i32
  }
}

module attributes {stable_mosaic.version = 11 : i64} {
  func.func @_matmul_res_ln_kernel(%arg0: i32, %arg1: i32, %arg2: memref<16x128xf32, #tpu.memory_space<vmem>>, %arg3: memref<128x128xf32, #tpu.memory_space<vmem>>, %arg4: memref<1x128xf32, #tpu.memory_space<vmem>>, %arg5: memref<16x128xf32, #tpu.memory_space<vmem>>, %arg6: memref<1x128xf32, #tpu.memory_space<vmem>>, %arg7: memref<1x128xf32, #tpu.memory_space<vmem>>, %arg8: memref<16x128xf32, #tpu.memory_space<vmem>>, %arg9: memref<16x128xf32, #tpu.memory_space<vmem>>) attributes {dimension_semantics = [#tpu.dimension_semantics<parallel>, #tpu.dimension_semantics<arbitrary>], iteration_bounds = array<i64: 1, 1>, scalar_prefetch = 0 : i64, scratch_operands = 1 : i64, tpu.core_type = #tpu.core_type<tc>, window_params = [{transform_indices = @transform_0, window_bounds = array<i64: 16, 128>}, {transform_indices = @transform_1, window_bounds = array<i64: 128, 128>}, {pipeline_mode = #tpu.pipeline_mode<synchronous>, transform_indices = @transform_2, window_bounds = array<i64: 1, 128>}, {transform_indices = @transform_3, window_bounds = array<i64: 16, 128>}, {pipeline_mode = #tpu.pipeline_mode<synchronous>, transform_indices = @transform_4, window_bounds = array<i64: 1, 128>}, {pipeline_mode = #tpu.pipeline_mode<synchronous>, transform_indices = @transform_5, window_bounds = array<i64: 1, 128>}, {transform_indices = @transform_6, window_bounds = array<i64: 16, 128>}]} {
    %c0_i32 = arith.constant 0 : i32
    %0 = arith.cmpi eq, %arg1, %c0_i32 : i32
    %1 = arith.extui %0 : i1 to i32
    %c0_i32_0 = arith.constant 0 : i32
    %2 = arith.cmpi ne, %1, %c0_i32_0 : i32
    scf.if %2 {
      %cst_10 = arith.constant 0.000000e+00 : f32
      %12 = vector.broadcast %cst_10 : f32 to vector<16x128xf32>
      %c0_11 = arith.constant 0 : index
      %c0_12 = arith.constant 0 : index
      %13 = vector.load %arg9[%c0_11, %c0_12] : memref<16x128xf32, #tpu.memory_space<vmem>>, vector<16x128xf32>
      tpu.vector_store %arg9[%c0_11, %c0_12], %12 {strides = array<i32>} : memref<16x128xf32, #tpu.memory_space<vmem>>, vector<16x128xf32>,
    } else {
    }
    %c0 = arith.constant 0 : index
    %c0_1 = arith.constant 0 : index
    %3 = vector.load %arg9[%c0, %c0_1] : memref<16x128xf32, #tpu.memory_space<vmem>>, vector<16x128xf32>
    %c0_2 = arith.constant 0 : index
    %c0_3 = arith.constant 0 : index
    %4 = vector.load %arg2[%c0_2, %c0_3] : memref<16x128xf32, #tpu.memory_space<vmem>>, vector<16x128xf32>
    %c0_4 = arith.constant 0 : index
    %c0_5 = arith.constant 0 : index
    %5 = vector.load %arg3[%c0_4, %c0_5] : memref<128x128xf32, #tpu.memory_space<vmem>>, vector<128x128xf32>
    %cst = arith.constant dense<0.000000e+00> : vector<16x128xf32>
    %6 = tpu.matmul %4, %5, %cst {dimension_numbers = #tpu.dot_dimension_numbers<[1], [0], [0], [1], [0, 0, 1, 1], [], []>} : vector<16x128xf32>, vector<128x128xf32>, vector<16x128xf32> -> vector<16x128xf32>
    %7 = arith.addf %3, %6 : vector<16x128xf32>
    %c0_6 = arith.constant 0 : index
    %c0_7 = arith.constant 0 : index
    %8 = vector.load %arg9[%c0_6, %c0_7] : memref<16x128xf32, #tpu.memory_space<vmem>>, vector<16x128xf32>
    tpu.vector_store %arg9[%c0_6, %c0_7], %7 {strides = array<i32>} : memref<16x128xf32, #tpu.memory_space<vmem>>, vector<16x128xf32>,
    %c0_i32_8 = arith.constant 0 : i32
    %9 = arith.cmpi eq, %arg1, %c0_i32_8 : i32
    %10 = arith.extui %9 : i1 to i32
    %c0_i32_9 = arith.constant 0 : i32
    %11 = arith.cmpi ne, %10, %c0_i32_9 : i32
    scf.if %11 {
      %c0_10 = arith.constant 0 : index
      %c0_11 = arith.constant 0 : index
      %12 = vector.load %arg9[%c0_10, %c0_11] : memref<16x128xf32, #tpu.memory_space<vmem>>, vector<16x128xf32>
      %c0_12 = arith.constant 0 : index
      %c0_13 = arith.constant 0 : index
      %13 = vector.load %arg4[%c0_12, %c0_13] : memref<1x128xf32, #tpu.memory_space<vmem>>, vector<1x128xf32>
      %14 = vector.broadcast %13 : vector<1x128xf32> to vector<16x128xf32>
      %15 = arith.addf %12, %14 : vector<16x128xf32>
      %c0_14 = arith.constant 0 : index
      %c0_15 = arith.constant 0 : index
      %16 = vector.load %arg5[%c0_14, %c0_15] : memref<16x128xf32, #tpu.memory_space<vmem>>, vector<16x128xf32>
      %17 = arith.addf %15, %16 : vector<16x128xf32>
      %cst_16 = arith.constant dense<0.000000e+00> : vector<16xf32>
      %18 = vector.multi_reduction <add>, %17, %cst_16 [1] : vector<16x128xf32> to vector<16xf32>
      %19 = vector.shape_cast %18 : vector<16xf32> to vector<16x1xf32>
      %cst_17 = arith.constant 1.280000e+02 : f32
      %20 = vector.broadcast %cst_17 : f32 to vector<16x1xf32>
      %21 = arith.divf %19, %20 : vector<16x1xf32>
      %22 = vector.broadcast %21 : vector<16x1xf32> to vector<16x128xf32>
      %23 = arith.subf %17, %22 : vector<16x128xf32>
      %24 = arith.mulf %23, %23 : vector<16x128xf32>
      %cst_18 = arith.constant dense<0.000000e+00> : vector<16xf32>
      %25 = vector.multi_reduction <add>, %24, %cst_18 [1] : vector<16x128xf32> to vector<16xf32>
      %26 = vector.shape_cast %25 : vector<16xf32> to vector<16x1xf32>
      %cst_19 = arith.constant 1.280000e+02 : f32
      %27 = vector.broadcast %cst_19 : f32 to vector<16x1xf32>
      %28 = arith.divf %26, %27 : vector<16x1xf32>
      %cst_20 = arith.constant 9.99999974E-6 : f32
      %29 = vector.broadcast %cst_20 : f32 to vector<16x1xf32>
      %30 = arith.addf %28, %29 : vector<16x1xf32>
      %31 = math.rsqrt %30 : vector<16x1xf32>
      %32 = vector.broadcast %31 : vector<16x1xf32> to vector<16x128xf32>
      %33 = arith.mulf %23, %32 : vector<16x128xf32>
      %c0_21 = arith.constant 0 : index
      %c0_22 = arith.constant 0 : index
      %34 = vector.load %arg6[%c0_21, %c0_22] : memref<1x128xf32, #tpu.memory_space<vmem>>, vector<1x128xf32>
      %35 = vector.broadcast %34 : vector<1x128xf32> to vector<16x128xf32>
      %36 = arith.mulf %33, %35 : vector<16x128xf32>
      %c0_23 = arith.constant 0 : index
      %c0_24 = arith.constant 0 : index
      %37 = vector.load %arg7[%c0_23, %c0_24] : memref<1x128xf32, #tpu.memory_space<vmem>>, vector<1x128xf32>
      %38 = vector.broadcast %37 : vector<1x128xf32> to vector<16x128xf32>
      %39 = arith.addf %36, %38 : vector<16x128xf32>
      %c0_25 = arith.constant 0 : index
      %c0_26 = arith.constant 0 : index
      %40 = vector.load %arg8[%c0_25, %c0_26] : memref<16x128xf32, #tpu.memory_space<vmem>>, vector<16x128xf32>
      tpu.vector_store %arg8[%c0_25, %c0_26], %39 {strides = array<i32>} : memref<16x128xf32, #tpu.memory_space<vmem>>, vector<16x128xf32>,
    } else {
    }
    return
  }
  func.func @transform_0(%arg0: i32, %arg1: i32) -> (i32, i32) {
    %c0_i32 = arith.constant 0 : i32
    return %arg0, %arg1 : i32, i32
  }
  func.func @transform_1(%arg0: i32, %arg1: i32) -> (i32, i32) {
    %c0_i32 = arith.constant 0 : i32
    %c0_i32_0 = arith.constant 0 : i32
    return %arg1, %c0_i32 : i32, i32
  }
  func.func @transform_2(%arg0: i32, %arg1: i32) -> (i32, i32) {
    %c0_i32 = arith.constant 0 : i32
    %c0_i32_0 = arith.constant 0 : i32
    %c0_i32_1 = arith.constant 0 : i32
    return %c0_i32, %c0_i32_0 : i32, i32
  }
  func.func @transform_3(%arg0: i32, %arg1: i32) -> (i32, i32) {
    %c0_i32 = arith.constant 0 : i32
    %c0_i32_0 = arith.constant 0 : i32
    return %arg0, %c0_i32 : i32, i32
  }
  func.func @transform_4(%arg0: i32, %arg1: i32) -> (i32, i32) {
    %c0_i32 = arith.constant 0 : i32
    %c0_i32_0 = arith.constant 0 : i32
    %c0_i32_1 = arith.constant 0 : i32
    return %c0_i32, %c0_i32_0 : i32, i32
  }
  func.func @transform_5(%arg0: i32, %arg1: i32) -> (i32, i32) {
    %c0_i32 = arith.constant 0 : i32
    %c0_i32_0 = arith.constant 0 : i32
    %c0_i32_1 = arith.constant 0 : i32
    return %c0_i32, %c0_i32_0 : i32, i32
  }
  func.func @transform_6(%arg0: i32, %arg1: i32) -> (i32, i32) {
    %c0_i32 = arith.constant 0 : i32
    %c0_i32_0 = arith.constant 0 : i32
    return %arg0, %c0_i32 : i32, i32
  }
}

module attributes {stable_mosaic.version = 11 : i64} {
  func.func @_ffn_ln_kernel(%arg0: i32, %arg1: i32, %arg2: memref<16x128xf32, #tpu.memory_space<vmem>>, %arg3: memref<128x512xf32, #tpu.memory_space<vmem>>, %arg4: memref<1x512xf32, #tpu.memory_space<vmem>>, %arg5: memref<512x128xf32, #tpu.memory_space<vmem>>, %arg6: memref<1x128xf32, #tpu.memory_space<vmem>>, %arg7: memref<1x128xf32, #tpu.memory_space<vmem>>, %arg8: memref<1x128xf32, #tpu.memory_space<vmem>>, %arg9: memref<16x128xf32, #tpu.memory_space<vmem>>, %arg10: memref<16x128xf32, #tpu.memory_space<vmem>>) attributes {dimension_semantics = [#tpu.dimension_semantics<parallel>, #tpu.dimension_semantics<arbitrary>], iteration_bounds = array<i64: 1, 4>, scalar_prefetch = 0 : i64, scratch_operands = 1 : i64, tpu.core_type = #tpu.core_type<tc>, window_params = [{transform_indices = @transform_0, window_bounds = array<i64: 16, 128>}, {transform_indices = @transform_1, window_bounds = array<i64: 128, 512>}, {transform_indices = @transform_2, window_bounds = array<i64: 1, 512>}, {transform_indices = @transform_3, window_bounds = array<i64: 512, 128>}, {pipeline_mode = #tpu.pipeline_mode<synchronous>, transform_indices = @transform_4, window_bounds = array<i64: 1, 128>}, {pipeline_mode = #tpu.pipeline_mode<synchronous>, transform_indices = @transform_5, window_bounds = array<i64: 1, 128>}, {pipeline_mode = #tpu.pipeline_mode<synchronous>, transform_indices = @transform_6, window_bounds = array<i64: 1, 128>}, {transform_indices = @transform_7, window_bounds = array<i64: 16, 128>}]} {
    %c0_i32 = arith.constant 0 : i32
    %0 = arith.cmpi eq, %arg1, %c0_i32 : i32
    %1 = arith.extui %0 : i1 to i32
    %c0_i32_0 = arith.constant 0 : i32
    %2 = arith.cmpi ne, %1, %c0_i32_0 : i32
    scf.if %2 {
      %cst_15 = arith.constant 0.000000e+00 : f32
      %19 = vector.broadcast %cst_15 : f32 to vector<16x128xf32>
      %c0_16 = arith.constant 0 : index
      %c0_17 = arith.constant 0 : index
      %20 = vector.load %arg10[%c0_16, %c0_17] : memref<16x128xf32, #tpu.memory_space<vmem>>, vector<16x128xf32>
      tpu.vector_store %arg10[%c0_16, %c0_17], %19 {strides = array<i32>} : memref<16x128xf32, #tpu.memory_space<vmem>>, vector<16x128xf32>,
    } else {
    }
    %c0 = arith.constant 0 : index
    %c0_1 = arith.constant 0 : index
    %3 = vector.load %arg2[%c0, %c0_1] : memref<16x128xf32, #tpu.memory_space<vmem>>, vector<16x128xf32>
    %c0_2 = arith.constant 0 : index
    %c0_3 = arith.constant 0 : index
    %4 = vector.load %arg3[%c0_2, %c0_3] : memref<128x512xf32, #tpu.memory_space<vmem>>, vector<128x512xf32>
    %cst = arith.constant dense<0.000000e+00> : vector<16x512xf32>
    %5 = tpu.matmul %3, %4, %cst {dimension_numbers = #tpu.dot_dimension_numbers<[1], [0], [0], [1], [0, 0, 1, 1], [], []>} : vector<16x128xf32>, vector<128x512xf32>, vector<16x512xf32> -> vector<16x512xf32>
    %c0_4 = arith.constant 0 : index
    %c0_5 = arith.constant 0 : index
    %6 = vector.load %arg4[%c0_4, %c0_5] : memref<1x512xf32, #tpu.memory_space<vmem>>, vector<1x512xf32>
    %7 = vector.broadcast %6 : vector<1x512xf32> to vector<16x512xf32>
    %8 = arith.addf %5, %7 : vector<16x512xf32>
    %cst_6 = arith.constant 0.000000e+00 : f32
    %9 = vector.broadcast %cst_6 : f32 to vector<16x512xf32>
    %10 = arith.maximumf %8, %9 : vector<16x512xf32>
    %c0_7 = arith.constant 0 : index
    %c0_8 = arith.constant 0 : index
    %11 = vector.load %arg10[%c0_7, %c0_8] : memref<16x128xf32, #tpu.memory_space<vmem>>, vector<16x128xf32>
    %c0_9 = arith.constant 0 : index
    %c0_10 = arith.constant 0 : index
    %12 = vector.load %arg5[%c0_9, %c0_10] : memref<512x128xf32, #tpu.memory_space<vmem>>, vector<512x128xf32>
    %cst_11 = arith.constant dense<0.000000e+00> : vector<16x128xf32>
    %13 = tpu.matmul %10, %12, %cst_11 {dimension_numbers = #tpu.dot_dimension_numbers<[1], [0], [0], [1], [0, 0, 1, 1], [], []>} : vector<16x512xf32>, vector<512x128xf32>, vector<16x128xf32> -> vector<16x128xf32>
    %14 = arith.addf %11, %13 : vector<16x128xf32>
    %c0_12 = arith.constant 0 : index
    %c0_13 = arith.constant 0 : index
    %15 = vector.load %arg10[%c0_12, %c0_13] : memref<16x128xf32, #tpu.memory_space<vmem>>, vector<16x128xf32>
    tpu.vector_store %arg10[%c0_12, %c0_13], %14 {strides = array<i32>} : memref<16x128xf32, #tpu.memory_space<vmem>>, vector<16x128xf32>,
    %c3_i32 = arith.constant 3 : i32
    %16 = arith.cmpi eq, %arg1, %c3_i32 : i32
    %17 = arith.extui %16 : i1 to i32
    %c0_i32_14 = arith.constant 0 : i32
    %18 = arith.cmpi ne, %17, %c0_i32_14 : i32
    scf.if %18 {
      %c0_15 = arith.constant 0 : index
      %c0_16 = arith.constant 0 : index
      %19 = vector.load %arg10[%c0_15, %c0_16] : memref<16x128xf32, #tpu.memory_space<vmem>>, vector<16x128xf32>
      %c0_17 = arith.constant 0 : index
      %c0_18 = arith.constant 0 : index
      %20 = vector.load %arg6[%c0_17, %c0_18] : memref<1x128xf32, #tpu.memory_space<vmem>>, vector<1x128xf32>
      %21 = vector.broadcast %20 : vector<1x128xf32> to vector<16x128xf32>
      %22 = arith.addf %19, %21 : vector<16x128xf32>
      %c0_19 = arith.constant 0 : index
      %c0_20 = arith.constant 0 : index
      %23 = vector.load %arg2[%c0_19, %c0_20] : memref<16x128xf32, #tpu.memory_space<vmem>>, vector<16x128xf32>
      %24 = arith.addf %22, %23 : vector<16x128xf32>
      %cst_21 = arith.constant dense<0.000000e+00> : vector<16xf32>
      %25 = vector.multi_reduction <add>, %24, %cst_21 [1] : vector<16x128xf32> to vector<16xf32>
      %26 = vector.shape_cast %25 : vector<16xf32> to vector<16x1xf32>
      %cst_22 = arith.constant 1.280000e+02 : f32
      %27 = vector.broadcast %cst_22 : f32 to vector<16x1xf32>
      %28 = arith.divf %26, %27 : vector<16x1xf32>
      %29 = vector.broadcast %28 : vector<16x1xf32> to vector<16x128xf32>
      %30 = arith.subf %24, %29 : vector<16x128xf32>
      %31 = arith.mulf %30, %30 : vector<16x128xf32>
      %cst_23 = arith.constant dense<0.000000e+00> : vector<16xf32>
      %32 = vector.multi_reduction <add>, %31, %cst_23 [1] : vector<16x128xf32> to vector<16xf32>
      %33 = vector.shape_cast %32 : vector<16xf32> to vector<16x1xf32>
      %cst_24 = arith.constant 1.280000e+02 : f32
      %34 = vector.broadcast %cst_24 : f32 to vector<16x1xf32>
      %35 = arith.divf %33, %34 : vector<16x1xf32>
      %cst_25 = arith.constant 9.99999974E-6 : f32
      %36 = vector.broadcast %cst_25 : f32 to vector<16x1xf32>
      %37 = arith.addf %35, %36 : vector<16x1xf32>
      %38 = math.rsqrt %37 : vector<16x1xf32>
      %39 = vector.broadcast %38 : vector<16x1xf32> to vector<16x128xf32>
      %40 = arith.mulf %30, %39 : vector<16x128xf32>
      %c0_26 = arith.constant 0 : index
      %c0_27 = arith.constant 0 : index
      %41 = vector.load %arg7[%c0_26, %c0_27] : memref<1x128xf32, #tpu.memory_space<vmem>>, vector<1x128xf32>
      %42 = vector.broadcast %41 : vector<1x128xf32> to vector<16x128xf32>
      %43 = arith.mulf %40, %42 : vector<16x128xf32>
      %c0_28 = arith.constant 0 : index
      %c0_29 = arith.constant 0 : index
      %44 = vector.load %arg8[%c0_28, %c0_29] : memref<1x128xf32, #tpu.memory_space<vmem>>, vector<1x128xf32>
      %45 = vector.broadcast %44 : vector<1x128xf32> to vector<16x128xf32>
      %46 = arith.addf %43, %45 : vector<16x128xf32>
      %c0_30 = arith.constant 0 : index
      %c0_31 = arith.constant 0 : index
      %47 = vector.load %arg9[%c0_30, %c0_31] : memref<16x128xf32, #tpu.memory_space<vmem>>, vector<16x128xf32>
      tpu.vector_store %arg9[%c0_30, %c0_31], %46 {strides = array<i32>} : memref<16x128xf32, #tpu.memory_space<vmem>>, vector<16x128xf32>,
    } else {
    }
    return
  }
  func.func @transform_0(%arg0: i32, %arg1: i32) -> (i32, i32) {
    %c0_i32 = arith.constant 0 : i32
    %c0_i32_0 = arith.constant 0 : i32
    return %arg0, %c0_i32 : i32, i32
  }
  func.func @transform_1(%arg0: i32, %arg1: i32) -> (i32, i32) {
    %c0_i32 = arith.constant 0 : i32
    %c0_i32_0 = arith.constant 0 : i32
    return %c0_i32, %arg1 : i32, i32
  }
  func.func @transform_2(%arg0: i32, %arg1: i32) -> (i32, i32) {
    %c0_i32 = arith.constant 0 : i32
    %c0_i32_0 = arith.constant 0 : i32
    return %c0_i32, %arg1 : i32, i32
  }
  func.func @transform_3(%arg0: i32, %arg1: i32) -> (i32, i32) {
    %c0_i32 = arith.constant 0 : i32
    %c0_i32_0 = arith.constant 0 : i32
    return %arg1, %c0_i32 : i32, i32
  }
  func.func @transform_4(%arg0: i32, %arg1: i32) -> (i32, i32) {
    %c0_i32 = arith.constant 0 : i32
    %c0_i32_0 = arith.constant 0 : i32
    %c0_i32_1 = arith.constant 0 : i32
    return %c0_i32, %c0_i32_0 : i32, i32
  }
  func.func @transform_5(%arg0: i32, %arg1: i32) -> (i32, i32) {
    %c0_i32 = arith.constant 0 : i32
    %c0_i32_0 = arith.constant 0 : i32
    %c0_i32_1 = arith.constant 0 : i32
    return %c0_i32, %c0_i32_0 : i32, i32
  }
  func.func @transform_6(%arg0: i32, %arg1: i32) -> (i32, i32) {
    %c0_i32 = arith.constant 0 : i32
    %c0_i32_0 = arith.constant 0 : i32
    %c0_i32_1 = arith.constant 0 : i32
    return %c0_i32, %c0_i32_0 : i32, i32
  }
  func.func @transform_7(%arg0: i32, %arg1: i32) -> (i32, i32) {
    %c0_i32 = arith.constant 0 : i32
    %c0_i32_0 = arith.constant 0 : i32
    return %arg0, %c0_i32 : i32, i32
  }
}

module attributes {stable_mosaic.version = 11 : i64} {
  func.func @_layernorm_kernel(%arg0: i32, %arg1: memref<16x128xf32, #tpu.memory_space<vmem>>, %arg2: memref<1x128xf32, #tpu.memory_space<vmem>>, %arg3: memref<1x128xf32, #tpu.memory_space<vmem>>, %arg4: memref<16x128xf32, #tpu.memory_space<vmem>>) attributes {dimension_semantics = [#tpu.dimension_semantics<parallel>], iteration_bounds = array<i64: 1>, scalar_prefetch = 0 : i64, scratch_operands = 0 : i64, tpu.core_type = #tpu.core_type<tc>, window_params = [{transform_indices = @transform_0, window_bounds = array<i64: 16, 128>}, {pipeline_mode = #tpu.pipeline_mode<synchronous>, transform_indices = @transform_1, window_bounds = array<i64: 1, 128>}, {pipeline_mode = #tpu.pipeline_mode<synchronous>, transform_indices = @transform_2, window_bounds = array<i64: 1, 128>}, {transform_indices = @transform_3, window_bounds = array<i64: 16, 128>}]} {
    %c0 = arith.constant 0 : index
    %c0_0 = arith.constant 0 : index
    %0 = vector.load %arg1[%c0, %c0_0] : memref<16x128xf32, #tpu.memory_space<vmem>>, vector<16x128xf32>
    %cst = arith.constant dense<0.000000e+00> : vector<16xf32>
    %1 = vector.multi_reduction <add>, %0, %cst [1] : vector<16x128xf32> to vector<16xf32>
    %2 = vector.shape_cast %1 : vector<16xf32> to vector<16x1xf32>
    %cst_1 = arith.constant 1.280000e+02 : f32
    %3 = vector.broadcast %cst_1 : f32 to vector<16x1xf32>
    %4 = arith.divf %2, %3 : vector<16x1xf32>
    %5 = vector.broadcast %4 : vector<16x1xf32> to vector<16x128xf32>
    %6 = arith.subf %0, %5 : vector<16x128xf32>
    %7 = arith.mulf %6, %6 : vector<16x128xf32>
    %cst_2 = arith.constant dense<0.000000e+00> : vector<16xf32>
    %8 = vector.multi_reduction <add>, %7, %cst_2 [1] : vector<16x128xf32> to vector<16xf32>
    %9 = vector.shape_cast %8 : vector<16xf32> to vector<16x1xf32>
    %cst_3 = arith.constant 1.280000e+02 : f32
    %10 = vector.broadcast %cst_3 : f32 to vector<16x1xf32>
    %11 = arith.divf %9, %10 : vector<16x1xf32>
    %cst_4 = arith.constant 9.99999974E-6 : f32
    %12 = vector.broadcast %cst_4 : f32 to vector<16x1xf32>
    %13 = arith.addf %11, %12 : vector<16x1xf32>
    %14 = math.rsqrt %13 : vector<16x1xf32>
    %15 = vector.broadcast %14 : vector<16x1xf32> to vector<16x128xf32>
    %16 = arith.mulf %6, %15 : vector<16x128xf32>
    %c0_5 = arith.constant 0 : index
    %c0_6 = arith.constant 0 : index
    %17 = vector.load %arg2[%c0_5, %c0_6] : memref<1x128xf32, #tpu.memory_space<vmem>>, vector<1x128xf32>
    %18 = vector.broadcast %17 : vector<1x128xf32> to vector<16x128xf32>
    %19 = arith.mulf %16, %18 : vector<16x128xf32>
    %c0_7 = arith.constant 0 : index
    %c0_8 = arith.constant 0 : index
    %20 = vector.load %arg3[%c0_7, %c0_8] : memref<1x128xf32, #tpu.memory_space<vmem>>, vector<1x128xf32>
    %21 = vector.broadcast %20 : vector<1x128xf32> to vector<16x128xf32>
    %22 = arith.addf %19, %21 : vector<16x128xf32>
    %c0_9 = arith.constant 0 : index
    %c0_10 = arith.constant 0 : index
    %23 = vector.load %arg4[%c0_9, %c0_10] : memref<16x128xf32, #tpu.memory_space<vmem>>, vector<16x128xf32>
    tpu.vector_store %arg4[%c0_9, %c0_10], %22 {strides = array<i32>} : memref<16x128xf32, #tpu.memory_space<vmem>>, vector<16x128xf32>,
    return
  }
  func.func @transform_0(%arg0: i32) -> (i32, i32) {
    %c0_i32 = arith.constant 0 : i32
    %c0_i32_0 = arith.constant 0 : i32
    return %arg0, %c0_i32 : i32, i32
  }
  func.func @transform_1(%arg0: i32) -> (i32, i32) {
    %c0_i32 = arith.constant 0 : i32
    %c0_i32_0 = arith.constant 0 : i32
    %c0_i32_1 = arith.constant 0 : i32
    return %c0_i32, %c0_i32_0 : i32, i32
  }
  func.func @transform_2(%arg0: i32) -> (i32, i32) {
    %c0_i32 = arith.constant 0 : i32
    %c0_i32_0 = arith.constant 0 : i32
    %c0_i32_1 = arith.constant 0 : i32
    return %c0_i32, %c0_i32_0 : i32, i32
  }
  func.func @transform_3(%arg0: i32) -> (i32, i32) {
    %c0_i32 = arith.constant 0 : i32
    %c0_i32_0 = arith.constant 0 : i32
    return %arg0, %c0_i32 : i32, i32
  }
}

module attributes {stable_mosaic.version = 11 : i64} {
  func.func @_matmul_kernel(%arg0: i32, %arg1: i32, %arg2: i32, %arg3: memref<16x128xf32, #tpu.memory_space<vmem>>, %arg4: memref<128x256xf32, #tpu.memory_space<vmem>>, %arg5: memref<1x256xf32, #tpu.memory_space<vmem>>, %arg6: memref<16x256xf32, #tpu.memory_space<vmem>>, %arg7: memref<16x256xf32, #tpu.memory_space<vmem>>) attributes {dimension_semantics = [#tpu.dimension_semantics<parallel>, #tpu.dimension_semantics<parallel>, #tpu.dimension_semantics<arbitrary>], iteration_bounds = array<i64: 1, 1, 1>, scalar_prefetch = 0 : i64, scratch_operands = 1 : i64, tpu.core_type = #tpu.core_type<tc>, window_params = [{transform_indices = @transform_0, window_bounds = array<i64: 16, 128>}, {transform_indices = @transform_1, window_bounds = array<i64: 128, 256>}, {transform_indices = @transform_2, window_bounds = array<i64: 1, 256>}, {transform_indices = @transform_3, window_bounds = array<i64: 16, 256>}]} {
    %c0_i32 = arith.constant 0 : i32
    %0 = arith.cmpi eq, %arg2, %c0_i32 : i32
    %1 = arith.extui %0 : i1 to i32
    %c0_i32_0 = arith.constant 0 : i32
    %2 = arith.cmpi ne, %1, %c0_i32_0 : i32
    scf.if %2 {
      %cst_10 = arith.constant 0.000000e+00 : f32
      %12 = vector.broadcast %cst_10 : f32 to vector<16x256xf32>
      %c0_11 = arith.constant 0 : index
      %c0_12 = arith.constant 0 : index
      %13 = vector.load %arg7[%c0_11, %c0_12] : memref<16x256xf32, #tpu.memory_space<vmem>>, vector<16x256xf32>
      tpu.vector_store %arg7[%c0_11, %c0_12], %12 {strides = array<i32>} : memref<16x256xf32, #tpu.memory_space<vmem>>, vector<16x256xf32>,
    } else {
    }
    %c0 = arith.constant 0 : index
    %c0_1 = arith.constant 0 : index
    %3 = vector.load %arg7[%c0, %c0_1] : memref<16x256xf32, #tpu.memory_space<vmem>>, vector<16x256xf32>
    %c0_2 = arith.constant 0 : index
    %c0_3 = arith.constant 0 : index
    %4 = vector.load %arg3[%c0_2, %c0_3] : memref<16x128xf32, #tpu.memory_space<vmem>>, vector<16x128xf32>
    %c0_4 = arith.constant 0 : index
    %c0_5 = arith.constant 0 : index
    %5 = vector.load %arg4[%c0_4, %c0_5] : memref<128x256xf32, #tpu.memory_space<vmem>>, vector<128x256xf32>
    %cst = arith.constant dense<0.000000e+00> : vector<16x256xf32>
    %6 = tpu.matmul %4, %5, %cst {dimension_numbers = #tpu.dot_dimension_numbers<[1], [0], [0], [1], [0, 0, 1, 1], [], []>} : vector<16x128xf32>, vector<128x256xf32>, vector<16x256xf32> -> vector<16x256xf32>
    %7 = arith.addf %3, %6 : vector<16x256xf32>
    %c0_6 = arith.constant 0 : index
    %c0_7 = arith.constant 0 : index
    %8 = vector.load %arg7[%c0_6, %c0_7] : memref<16x256xf32, #tpu.memory_space<vmem>>, vector<16x256xf32>
    tpu.vector_store %arg7[%c0_6, %c0_7], %7 {strides = array<i32>} : memref<16x256xf32, #tpu.memory_space<vmem>>, vector<16x256xf32>,
    %c0_i32_8 = arith.constant 0 : i32
    %9 = arith.cmpi eq, %arg2, %c0_i32_8 : i32
    %10 = arith.extui %9 : i1 to i32
    %c0_i32_9 = arith.constant 0 : i32
    %11 = arith.cmpi ne, %10, %c0_i32_9 : i32
    scf.if %11 {
      %c0_10 = arith.constant 0 : index
      %c0_11 = arith.constant 0 : index
      %12 = vector.load %arg7[%c0_10, %c0_11] : memref<16x256xf32, #tpu.memory_space<vmem>>, vector<16x256xf32>
      %c0_12 = arith.constant 0 : index
      %c0_13 = arith.constant 0 : index
      %13 = vector.load %arg5[%c0_12, %c0_13] : memref<1x256xf32, #tpu.memory_space<vmem>>, vector<1x256xf32>
      %14 = vector.broadcast %13 : vector<1x256xf32> to vector<16x256xf32>
      %15 = arith.addf %12, %14 : vector<16x256xf32>
      %c0_14 = arith.constant 0 : index
      %c0_15 = arith.constant 0 : index
      %16 = vector.load %arg6[%c0_14, %c0_15] : memref<16x256xf32, #tpu.memory_space<vmem>>, vector<16x256xf32>
      tpu.vector_store %arg6[%c0_14, %c0_15], %15 {strides = array<i32>} : memref<16x256xf32, #tpu.memory_space<vmem>>, vector<16x256xf32>,
    } else {
    }
    return
  }
  func.func @transform_0(%arg0: i32, %arg1: i32, %arg2: i32) -> (i32, i32) {
    %c0_i32 = arith.constant 0 : i32
    return %arg0, %arg2 : i32, i32
  }
  func.func @transform_1(%arg0: i32, %arg1: i32, %arg2: i32) -> (i32, i32) {
    %c0_i32 = arith.constant 0 : i32
    return %arg2, %arg1 : i32, i32
  }
  func.func @transform_2(%arg0: i32, %arg1: i32, %arg2: i32) -> (i32, i32) {
    %c0_i32 = arith.constant 0 : i32
    %c0_i32_0 = arith.constant 0 : i32
    return %c0_i32, %arg1 : i32, i32
  }
  func.func @transform_3(%arg0: i32, %arg1: i32, %arg2: i32) -> (i32, i32) {
    %c0_i32 = arith.constant 0 : i32
    return %arg0, %arg1 : i32, i32
  }
}

module attributes {stable_mosaic.version = 11 : i64} {
  func.func @_matmul_kernel(%arg0: i32, %arg1: i32, %arg2: i32, %arg3: memref<16x128xf32, #tpu.memory_space<vmem>>, %arg4: memref<128x128xf32, #tpu.memory_space<vmem>>, %arg5: memref<1x128xf32, #tpu.memory_space<vmem>>, %arg6: memref<16x128xf32, #tpu.memory_space<vmem>>, %arg7: memref<16x128xf32, #tpu.memory_space<vmem>>) attributes {dimension_semantics = [#tpu.dimension_semantics<parallel>, #tpu.dimension_semantics<parallel>, #tpu.dimension_semantics<arbitrary>], iteration_bounds = array<i64: 1, 1, 1>, scalar_prefetch = 0 : i64, scratch_operands = 1 : i64, tpu.core_type = #tpu.core_type<tc>, window_params = [{transform_indices = @transform_0, window_bounds = array<i64: 16, 128>}, {transform_indices = @transform_1, window_bounds = array<i64: 128, 128>}, {transform_indices = @transform_2, window_bounds = array<i64: 1, 128>}, {transform_indices = @transform_3, window_bounds = array<i64: 16, 128>}]} {
    %c0_i32 = arith.constant 0 : i32
    %0 = arith.cmpi eq, %arg2, %c0_i32 : i32
    %1 = arith.extui %0 : i1 to i32
    %c0_i32_0 = arith.constant 0 : i32
    %2 = arith.cmpi ne, %1, %c0_i32_0 : i32
    scf.if %2 {
      %cst_10 = arith.constant 0.000000e+00 : f32
      %12 = vector.broadcast %cst_10 : f32 to vector<16x128xf32>
      %c0_11 = arith.constant 0 : index
      %c0_12 = arith.constant 0 : index
      %13 = vector.load %arg7[%c0_11, %c0_12] : memref<16x128xf32, #tpu.memory_space<vmem>>, vector<16x128xf32>
      tpu.vector_store %arg7[%c0_11, %c0_12], %12 {strides = array<i32>} : memref<16x128xf32, #tpu.memory_space<vmem>>, vector<16x128xf32>,
    } else {
    }
    %c0 = arith.constant 0 : index
    %c0_1 = arith.constant 0 : index
    %3 = vector.load %arg7[%c0, %c0_1] : memref<16x128xf32, #tpu.memory_space<vmem>>, vector<16x128xf32>
    %c0_2 = arith.constant 0 : index
    %c0_3 = arith.constant 0 : index
    %4 = vector.load %arg3[%c0_2, %c0_3] : memref<16x128xf32, #tpu.memory_space<vmem>>, vector<16x128xf32>
    %c0_4 = arith.constant 0 : index
    %c0_5 = arith.constant 0 : index
    %5 = vector.load %arg4[%c0_4, %c0_5] : memref<128x128xf32, #tpu.memory_space<vmem>>, vector<128x128xf32>
    %cst = arith.constant dense<0.000000e+00> : vector<16x128xf32>
    %6 = tpu.matmul %4, %5, %cst {dimension_numbers = #tpu.dot_dimension_numbers<[1], [0], [0], [1], [0, 0, 1, 1], [], []>} : vector<16x128xf32>, vector<128x128xf32>, vector<16x128xf32> -> vector<16x128xf32>
    %7 = arith.addf %3, %6 : vector<16x128xf32>
    %c0_6 = arith.constant 0 : index
    %c0_7 = arith.constant 0 : index
    %8 = vector.load %arg7[%c0_6, %c0_7] : memref<16x128xf32, #tpu.memory_space<vmem>>, vector<16x128xf32>
    tpu.vector_store %arg7[%c0_6, %c0_7], %7 {strides = array<i32>} : memref<16x128xf32, #tpu.memory_space<vmem>>, vector<16x128xf32>,
    %c0_i32_8 = arith.constant 0 : i32
    %9 = arith.cmpi eq, %arg2, %c0_i32_8 : i32
    %10 = arith.extui %9 : i1 to i32
    %c0_i32_9 = arith.constant 0 : i32
    %11 = arith.cmpi ne, %10, %c0_i32_9 : i32
    scf.if %11 {
      %c0_10 = arith.constant 0 : index
      %c0_11 = arith.constant 0 : index
      %12 = vector.load %arg7[%c0_10, %c0_11] : memref<16x128xf32, #tpu.memory_space<vmem>>, vector<16x128xf32>
      %c0_12 = arith.constant 0 : index
      %c0_13 = arith.constant 0 : index
      %13 = vector.load %arg5[%c0_12, %c0_13] : memref<1x128xf32, #tpu.memory_space<vmem>>, vector<1x128xf32>
      %14 = vector.broadcast %13 : vector<1x128xf32> to vector<16x128xf32>
      %15 = arith.addf %12, %14 : vector<16x128xf32>
      %c0_14 = arith.constant 0 : index
      %c0_15 = arith.constant 0 : index
      %16 = vector.load %arg6[%c0_14, %c0_15] : memref<16x128xf32, #tpu.memory_space<vmem>>, vector<16x128xf32>
      tpu.vector_store %arg6[%c0_14, %c0_15], %15 {strides = array<i32>} : memref<16x128xf32, #tpu.memory_space<vmem>>, vector<16x128xf32>,
    } else {
    }
    return
  }
  func.func @transform_0(%arg0: i32, %arg1: i32, %arg2: i32) -> (i32, i32) {
    %c0_i32 = arith.constant 0 : i32
    return %arg0, %arg2 : i32, i32
  }
  func.func @transform_1(%arg0: i32, %arg1: i32, %arg2: i32) -> (i32, i32) {
    %c0_i32 = arith.constant 0 : i32
    return %arg2, %arg1 : i32, i32
  }
  func.func @transform_2(%arg0: i32, %arg1: i32, %arg2: i32) -> (i32, i32) {
    %c0_i32 = arith.constant 0 : i32
    %c0_i32_0 = arith.constant 0 : i32
    return %c0_i32, %arg1 : i32, i32
  }
  func.func @transform_3(%arg0: i32, %arg1: i32, %arg2: i32) -> (i32, i32) {
    %c0_i32 = arith.constant 0 : i32
    return %arg0, %arg1 : i32, i32
  }
}

module attributes {stable_mosaic.version = 11 : i64} {
  func.func @_attention_kernel(%arg0: i32, %arg1: memref<1x8x128xf32, #tpu.memory_space<vmem>>, %arg2: memref<1x8x128xf32, #tpu.memory_space<vmem>>, %arg3: memref<1x8x128xf32, #tpu.memory_space<vmem>>, %arg4: memref<1x8x128xf32, #tpu.memory_space<vmem>>) attributes {dimension_semantics = [#tpu.dimension_semantics<parallel>], iteration_bounds = array<i64: 2>, scalar_prefetch = 0 : i64, scratch_operands = 0 : i64, tpu.core_type = #tpu.core_type<tc>, window_params = [{transform_indices = @transform_0, window_bounds = array<i64: 1, 8, 128>}, {transform_indices = @transform_1, window_bounds = array<i64: 1, 8, 128>}, {transform_indices = @transform_2, window_bounds = array<i64: 1, 8, 128>}, {transform_indices = @transform_3, window_bounds = array<i64: 1, 8, 128>}]} {
    %c0 = arith.constant 0 : index
    %c0_0 = arith.constant 0 : index
    %c0_1 = arith.constant 0 : index
    %0 = vector.load %arg1[%c0, %c0_0, %c0_1] : memref<1x8x128xf32, #tpu.memory_space<vmem>>, vector<1x8x128xf32>
    %1 = vector.shape_cast %0 : vector<1x8x128xf32> to vector<8x128xf32>
    %c0_2 = arith.constant 0 : index
    %c0_3 = arith.constant 0 : index
    %c0_4 = arith.constant 0 : index
    %2 = vector.load %arg2[%c0_2, %c0_3, %c0_4] : memref<1x8x128xf32, #tpu.memory_space<vmem>>, vector<1x8x128xf32>
    %3 = vector.shape_cast %2 : vector<1x8x128xf32> to vector<8x128xf32>
    %c0_5 = arith.constant 0 : index
    %c0_6 = arith.constant 0 : index
    %c0_7 = arith.constant 0 : index
    %4 = vector.load %arg3[%c0_5, %c0_6, %c0_7] : memref<1x8x128xf32, #tpu.memory_space<vmem>>, vector<1x8x128xf32>
    %5 = vector.shape_cast %4 : vector<1x8x128xf32> to vector<8x128xf32>
    %6 = vector.extract_strided_slice %1 {offsets = [0, 0], sizes = [8, 64], strides = [1, 1]} : vector<8x128xf32> to vector<8x64xf32>
    %7 = vector.extract_strided_slice %3 {offsets = [0, 0], sizes = [8, 64], strides = [1, 1]} : vector<8x128xf32> to vector<8x64xf32>
    %8 = vector.extract_strided_slice %5 {offsets = [0, 0], sizes = [8, 64], strides = [1, 1]} : vector<8x128xf32> to vector<8x64xf32>
    %9 = tpu.transpose %7, [1, 0] : vector<8x64xf32> -> vector<64x8xf32>
    %cst = arith.constant dense<0.000000e+00> : vector<8x8xf32>
    %10 = tpu.matmul %6, %9, %cst {dimension_numbers = #tpu.dot_dimension_numbers<[1], [0], [0], [1], [0, 0, 1, 1], [], []>} : vector<8x64xf32>, vector<64x8xf32>, vector<8x8xf32> -> vector<8x8xf32>
    %cst_8 = arith.constant 1.250000e-01 : f32
    %11 = vector.broadcast %cst_8 : f32 to vector<8x8xf32>
    %12 = arith.mulf %10, %11 : vector<8x8xf32>
    %cst_9 = arith.constant dense<0xFF800000> : vector<8xf32>
    %13 = vector.multi_reduction <maximumf>, %12, %cst_9 [1] : vector<8x8xf32> to vector<8xf32>
    %14 = vector.shape_cast %13 : vector<8xf32> to vector<8x1xf32>
    %15 = vector.broadcast %14 : vector<8x1xf32> to vector<8x8xf32>
    %16 = arith.subf %12, %15 : vector<8x8xf32>
    %17 = math.exp %16 : vector<8x8xf32>
    %cst_10 = arith.constant dense<0.000000e+00> : vector<8xf32>
    %18 = vector.multi_reduction <add>, %17, %cst_10 [1] : vector<8x8xf32> to vector<8xf32>
    %19 = vector.shape_cast %18 : vector<8xf32> to vector<8x1xf32>
    %20 = tpu.reciprocal %19 {approx = true} : vector<8x1xf32> -> vector<8x1xf32>
    %21 = vector.broadcast %20 : vector<8x1xf32> to vector<8x8xf32>
    %22 = arith.mulf %17, %21 : vector<8x8xf32>
    %cst_11 = arith.constant dense<0.000000e+00> : vector<8x64xf32>
    %23 = tpu.matmul %22, %8, %cst_11 {dimension_numbers = #tpu.dot_dimension_numbers<[1], [0], [0], [1], [0, 0, 1, 1], [], []>} : vector<8x8xf32>, vector<8x64xf32>, vector<8x64xf32> -> vector<8x64xf32>
    %24 = vector.extract_strided_slice %1 {offsets = [0, 64], sizes = [8, 64], strides = [1, 1]} : vector<8x128xf32> to vector<8x64xf32>
    %25 = vector.extract_strided_slice %3 {offsets = [0, 64], sizes = [8, 64], strides = [1, 1]} : vector<8x128xf32> to vector<8x64xf32>
    %26 = vector.extract_strided_slice %5 {offsets = [0, 64], sizes = [8, 64], strides = [1, 1]} : vector<8x128xf32> to vector<8x64xf32>
    %27 = tpu.transpose %25, [1, 0] : vector<8x64xf32> -> vector<64x8xf32>
    %cst_12 = arith.constant dense<0.000000e+00> : vector<8x8xf32>
    %28 = tpu.matmul %24, %27, %cst_12 {dimension_numbers = #tpu.dot_dimension_numbers<[1], [0], [0], [1], [0, 0, 1, 1], [], []>} : vector<8x64xf32>, vector<64x8xf32>, vector<8x8xf32> -> vector<8x8xf32>
    %cst_13 = arith.constant 1.250000e-01 : f32
    %29 = vector.broadcast %cst_13 : f32 to vector<8x8xf32>
    %30 = arith.mulf %28, %29 : vector<8x8xf32>
    %cst_14 = arith.constant dense<0xFF800000> : vector<8xf32>
    %31 = vector.multi_reduction <maximumf>, %30, %cst_14 [1] : vector<8x8xf32> to vector<8xf32>
    %32 = vector.shape_cast %31 : vector<8xf32> to vector<8x1xf32>
    %33 = vector.broadcast %32 : vector<8x1xf32> to vector<8x8xf32>
    %34 = arith.subf %30, %33 : vector<8x8xf32>
    %35 = math.exp %34 : vector<8x8xf32>
    %cst_15 = arith.constant dense<0.000000e+00> : vector<8xf32>
    %36 = vector.multi_reduction <add>, %35, %cst_15 [1] : vector<8x8xf32> to vector<8xf32>
    %37 = vector.shape_cast %36 : vector<8xf32> to vector<8x1xf32>
    %38 = tpu.reciprocal %37 {approx = true} : vector<8x1xf32> -> vector<8x1xf32>
    %39 = vector.broadcast %38 : vector<8x1xf32> to vector<8x8xf32>
    %40 = arith.mulf %35, %39 : vector<8x8xf32>
    %cst_16 = arith.constant dense<0.000000e+00> : vector<8x64xf32>
    %41 = tpu.matmul %40, %26, %cst_16 {dimension_numbers = #tpu.dot_dimension_numbers<[1], [0], [0], [1], [0, 0, 1, 1], [], []>} : vector<8x8xf32>, vector<8x64xf32>, vector<8x64xf32> -> vector<8x64xf32>
    %42 = tpu.concatenate %23, %41 in 1 : vector<8x64xf32>, vector<8x64xf32> -> vector<8x128xf32>
    %c0_17 = arith.constant 0 : index
    %c0_18 = arith.constant 0 : index
    %c0_19 = arith.constant 0 : index
    %43 = vector.load %arg4[%c0_17, %c0_18, %c0_19] : memref<1x8x128xf32, #tpu.memory_space<vmem>>, vector<1x8x128xf32>
    %44 = vector.shape_cast %43 : vector<1x8x128xf32> to vector<8x128xf32>
    %45 = vector.shape_cast %42 : vector<8x128xf32> to vector<1x8x128xf32>
    tpu.vector_store %arg4[%c0_17, %c0_18, %c0_19], %45 {strides = array<i32>} : memref<1x8x128xf32, #tpu.memory_space<vmem>>, vector<1x8x128xf32>,
    return
  }
  func.func @transform_0(%arg0: i32) -> (i32, i32, i32) {
    %c0_i32 = arith.constant 0 : i32
    %c0_i32_0 = arith.constant 0 : i32
    %c0_i32_1 = arith.constant 0 : i32
    return %arg0, %c0_i32, %c0_i32_0 : i32, i32, i32
  }
  func.func @transform_1(%arg0: i32) -> (i32, i32, i32) {
    %c0_i32 = arith.constant 0 : i32
    %c0_i32_0 = arith.constant 0 : i32
    %c0_i32_1 = arith.constant 0 : i32
    return %arg0, %c0_i32, %c0_i32_0 : i32, i32, i32
  }
  func.func @transform_2(%arg0: i32) -> (i32, i32, i32) {
    %c0_i32 = arith.constant 0 : i32
    %c1_i32 = arith.constant 1 : i32
    %c0_i32_0 = arith.constant 0 : i32
    return %arg0, %c0_i32, %c1_i32 : i32, i32, i32
  }
  func.func @transform_3(%arg0: i32) -> (i32, i32, i32) {
    %c0_i32 = arith.constant 0 : i32
    %c0_i32_0 = arith.constant 0 : i32
    %c0_i32_1 = arith.constant 0 : i32
    return %arg0, %c0_i32, %c0_i32_0 : i32, i32, i32
  }
}

</mosaic_0001>

<bundles_post_ra>
// kernel: transformer_forward.36
= control target key start
LH: loop header
LB: loop body
LE: loop exit
PB: predicated region body
PF: predicated region fallthrough
CT: control target
= control target key end

     0   :  { %s741_s12 = smov 0   ;;  %s787_s0 = inlined_call_operand.vmem [shape: f32[2,8,384], index: 0, kind: input, shape index: {}, may-alias: {0,1,2}]   ;;  %s788_s1 = inlined_call_operand.vmem [shape: f32[2,8,384], index: 1, kind: input, shape index: {}, may-alias: {0,1,2}]   ;;  %s789_s2 = inlined_call_operand.vmem [shape: f32[2,8,384], index: 2, kind: input, shape index: {}, may-alias: {0,1,2}]   ;;  %s790_s3 = inlined_call_operand.vmem [shape: f32[2,8,128], index: 3, kind: output, shape index: {}]  }
   0x1 LB: > { %s643_s13 = sadd.s32 4294967295, %s716_s12   ;;  %p647_p0 = scmp.ge.s32.totalorder %s716_s12, 1  ;;  %s716_s12 = sphi %s741_s12, %s13_s12  }
   0x2   : > { %p159_p1 = scmp.lt.s32.totalorder %s716_s12, 3 }
   0x4   : > { %p160_p2 = pnand %p647_p0, %p159_p1 }
   0x5   : > { %p194_p3 = scmp.lt.s32.totalorder (!%p160_p2), %s643_s13, 1  ;;  %v718_v0 = vmov (!%p160_p2), 0.0   ;;  %vm719_vm0 = vmmov (!%p160_p2), 0   ;;  %vm218_vm1 = vcmask (!%p160_p2), 523264   ;;  %vm296_vm2 = vcmask (!%p160_p2), 64512   ;;  %s720_s21 = smov (!%p160_p2), 64  }
   0x6   : > { %163 = sbr.rel (%p160_p2) target bundleno = 1410 (0x582), region = 32  ;;  %670 = vmatprep.subr.mxu0 (!%p160_p2), %v718_v0  ;;  %672 = vmatprep.mubr.msk.f32.mxu0 (!%p160_p2), %vm719_vm0, %v718_v0 }
   0x7   : > { %675 = vmatprep.subr.mxu1 (!%p160_p2), %v718_v0  ;;  %677 = vmatprep.mubr.msk.f32.mxu1 (!%p160_p2), %vm719_vm0, %v718_v0 }
   0xd   : > { %s792_s13 = smov (!%p194_p3, %s643_s13), 1 }
   0xe   : > { %s690_s14 = smul.u32 24, %s792_s13  ;;  %s651_s25 = sshll.u32 %s792_s13, 3 }
   0xf   : > { %s214_s28 = scalar_lea.vmem %s790_s3, %s651_s25 }
  0x10   : > { %s599_s17 = scalar_lea.vmem %s788_s1, %s690_s14  ;;  %s198_s20 = scalar_lea.vmem %s787_s0, %s690_s14 }
  0x11   : > { %v652_v1 = vld [vmem:[%s599_s17 + $0x8] sm:$0xff]  ;;  %v215_v2 = vld [vmem:[%s198_s20] sm:$0xff]  ;;  %s603_s24 = scalar_lea.vmem %s789_s2, %s690_s14 }
  0x12   : > { %671 = vmatpush3.xpose.msk.msra.mxu0 %vm218_vm1, %v652_v1  ;;  %383 = vrot.lane.b32.xlu1 %v652_v1, %s720_s21  ;;  %v653_v12 = vld [vmem:[%s603_s24 + $0x10] sm:$0xff] }
  0x13   : > { %685 = vmatprep.subr.mxu0 %v718_v0  ;;  %676 = vmatpush3.msra.mxu1 %v653_v12 }
  0x14   : > { %680 = vmatprep.subr.mxu1 %v718_v0 }
  0x15   : > { %673 = vmatmul.mubr.msk.f32.vlgmr.msra.gmra.mrb[0].mxu0 %vm218_vm1, %v215_v2 }
  0x16   : > { %687 = vmatprep.mubr.msk.f32.mxu0 %vm719_vm0, %v718_v0  ;;  %381 = vrot.lane.b32.xlu1 %v215_v2, %s720_s21 }
  0x84   : > { %v384_v14 = vpop.permute.xlu1 %383 }
  0x88   : > { %v382_v17 = vpop.permute.xlu1 %381 }
  0xe8   : > { %v291_v3 = vpop.f32.mrb[0].mxu0 }
  0xe9   : > { %v295_v4 = vmul.f32 0.125, %v291_v3  ;;  %v674_v5 = vpop.f32.mrb[1].mxu0 }
  0xeb   : > { %v297_v6 = vsel %vm296_vm2, %v295_v4, -inf }
  0xec   : > { %298 = vmax.xlane.f32.xlu0 %v297_v6 }
 0x179   : > { %v299_v7 = vpop.xlane.xlu0 %298 }
 0x17a   : > { %v300_v8 = vsub.f32 %v295_v4, %v299_v7 }
 0x17c   : > { %v301_v9 = vmul.f32 1.442695, %v300_v8 }
 0x17e   : > { %702 = vpow2.f32 %v301_v9 }
 0x188   : > { %v703_v10 = vpop.eup %702 }
 0x189   : > { %v303_v11 = vsel %vm296_vm2, %v703_v10, 0.0 }
 0x18a   : > { %304 = vadd.xlane.f32.xlu0 %v303_v11 }
 0x217   : > { %v305_v13 = vpop.xlane.xlu0 %304 }
 0x218   : > { %704 = vrcp.f32 %v305_v13 }
 0x222   : > { %v705_v15 = vpop.eup %704 }
 0x223   : > { %v307_v16 = vmul.f32 %v705_v15, %v703_v10 }
 0x225   : > { %678 = vmatmul.mubr.msk.f32.vlgmr.msra.gmra.mrb[0].mxu1 %vm296_vm2, %v307_v16 }
 0x226   : > { %681 = vmatpush3.xpose.msk.msra.mxu1 %vm218_vm1, %v384_v14  ;;  %682 = vmatprep.mubr.msk.f32.mxu1 %vm719_vm0, %v718_v0 }
 0x229   : > { %683 = vmatmul.mubr.msk.f32.vlgmr.msra.gmra.mrb[2].mxu1 %vm218_vm1, %v382_v17 }
 0x2f8   : > { %v377_v18 = vpop.f32.mrb[0].mxu1 }
 0x2f9   : > { %v679_v19 = vpop.f32.mrb[1].mxu1 }
 0x2fc   : > { %v455_v20 = vpop.f32.mrb[2].mxu1 }
 0x2fd   : > { %v459_v21 = vmul.f32 0.125, %v455_v20  ;;  %v684_v22 = vpop.f32.mrb[3].mxu1 }
 0x2ff   : > { %v460_v23 = vsel %vm296_vm2, %v459_v21, -inf }
 0x300   : > { %461 = vmax.xlane.f32.xlu0 %v460_v23 }
 0x316   : > { %472 = vrot.lane.b32.xlu0 %v653_v12, %s720_s21 }
 0x38d   : > { %v462_v24 = vpop.xlane.xlu0 %461 }
 0x38e   : > { %v463_v25 = vsub.f32 %v459_v21, %v462_v24 }
 0x390   : > { %v464_v26 = vmul.f32 1.442695, %v463_v25 }
 0x391   : > { %v473_v29 = vpop.permute.xlu0 %472 }
 0x392   : > { %706 = vpow2.f32 %v464_v26  ;;  %686 = vmatpush3.msra.mxu0 %v473_v29 }
 0x39c   : > { %v707_v27 = vpop.eup %706 }
 0x39d   : > { %v466_v28 = vsel %vm296_vm2, %v707_v27, 0.0 }
 0x39e   : > { %467 = vadd.xlane.f32.xlu1 %v466_v28 }
 0x42b   : > { %v468_v30 = vpop.xlane.xlu1 %467 }
 0x42c   : > { %708 = vrcp.f32 %v468_v30 }
 0x436   : > { %v709_v31 = vpop.eup %708 }
 0x437   : > { %v470_v32 = vmul.f32 %v709_v31, %v707_v27 }
 0x439   : > { %688 = vmatmul.mubr.msk.f32.vlgmr.msra.gmra.mrb[2].mxu0 %vm296_vm2, %v470_v32 }
 0x50c   : > { %v544_v33 = vpop.f32.mrb[2].mxu0 }
 0x50d   : > { %549 = vrot.lane.b32.xlu0 %v544_v33, %s720_s21  ;;  %v689_v34 = vpop.f32.mrb[3].mxu0 }
 0x57f   : > { %v550_v35 = vpop.permute.xlu0 %549 }
 0x580   : > { %v552_v36 = vsel %vm218_vm1, %v377_v18, %v550_v35 }
 0x581   : > { %553 = vst [vmem:[%s214_s28] sm:$0xff] %v552_v36 }
 0x582 PF: > { %s13_s12 = sadd.s32 1, %s716_s12  }
 0x583   : > { %p10_p4 = scmp.ge.s32.totalorder %s13_s12, 4  }
 0x585   :  { %12 = sbr.rel (!%p10_p4) target bundleno = 1 (0x1), region = 68 }

// kernel: transformer_forward.35
= control target key start
LH: loop header
LB: loop body
LE: loop exit
PB: predicated region body
PF: predicated region fallthrough
CT: control target
= control target key end

     0   :  { %8 = vsyncpa [#allocation4], 0  ;;  %s446_s12 = smov [#allocation3]   ;;  %s511_s0 = inlined_call_operand.vmem [shape: f32[16,128], index: 0, kind: input, shape index: {}]   ;;  %s512_s1 = inlined_call_operand.hbm [shape: f32[128,384], index: 1, kind: input, shape index: {}]   ;;  %s513_s2 = inlined_call_operand.vmem [shape: f32[1,384], index: 2, kind: input, shape index: {}]   ;;  %s514_s3 = inlined_call_operand.vmem [shape: f32[16,384], index: 3, kind: output, shape index: {}]  }
   0x1   :  { %s16_s13 = sshll.u32 %s446_s12, 4  ;;  %s422_s16 = scalar_lea.hbm %s512_s1, 6144  ;;  %s17_s13 = int_to_ptr.vmem [resolvable:$true] %s16_s13 }
   0x2   :  { %p423_p0 = scmp.ne.s32.totalorder %s512_s1, %s422_s16  ;;  %p426_p1 = scmp.lt.u32.totalorder %s422_s16, %s512_s1 }
   0x4   :  { %p428_p2 = pnand %p426_p1, %p423_p0 }
   0x6   :  { %431 = shalt.err (!%p428_p2)
}
   0x7   :  { %s432_s21 = scalar_lea.vmem %s17_s13, 6144  ;;  %p437_p4 = scmp.lt.s32.totalorder %s17_s13, %s17_s13 }
   0x8   :  { %p433_p3 = scmp.ne.s32.totalorder %s17_s13, %s432_s21  ;;  %p438_p5 = scmp.lt.s32.totalorder %s432_s21, %s432_s21 }
   0xa   :  { %p439_p6 = por %p438_p5, %p437_p4 }
   0xc   :  { %p440_p7 = pnand %p439_p6, %p433_p3 }
   0xe   :  { %443 = shalt.err (!%p440_p7)
}
   0xf   :  { %s447_s22 = smov 384   ;;  %s448_s23 = smov 24  }
  0x10   :  { %22 = dma.hbm_to_vmem [thread:$0]  %s512_s1, 6144, %s17_s13, [#allocation4], %s447_s22, %s447_s22, %s448_s23  }
  0x11   :  { %444 = dma.done.wait [#allocation4], 6144  }
  0x12   :  { %445 = vsyncadd [#allocation4], 4294961152  ;;  %v449_v0 = vmov 0.0   ;;  %v47_v1 = vld [vmem:[#allocation3 + $0x8] sm:$0xff]  ;;  %v50_v2 = vld [vmem:[#allocation3 + $0x20] sm:$0xff] }
  0x13   :  { %158 = vmatprep.mubr.f32.mxu0 %v449_v0  ;;  %v46_v3 = vld [vmem:[#allocation3] sm:$0xff]  ;;  %v354_v4 = vpack.c.bf16 %v50_v2, %v47_v1  ;;  %v49_v5 = vld [vmem:[#allocation3 + $0x18] sm:$0xff]  ;;  %v48_v6 = vld [vmem:[#allocation3 + $0x10] sm:$0xff] }
  0x14   :  { %v51_v7 = vld [vmem:[#allocation3 + $0x28] sm:$0xff]  ;;  %v356_v8 = vpack.c.bf16 %v49_v5, %v46_v3  ;;  %v53_v10 = vld [vmem:[#allocation3 + $0x38] sm:$0xff]  ;;  %v56_v11 = vld [vmem:[#allocation3 + $0x50] sm:$0xff] }
  0x15   :  { %v386_v9 = vpack.c.bf16 %v51_v7, %v48_v6  ;;  %v52_v12 = vld [vmem:[#allocation3 + $0x30] sm:$0xff]  ;;  %355 = vmatprep.subr.bf16.mxu0 %v354_v4  ;;  %v358_v13 = vpack.c.bf16 %v56_v11, %v53_v10  ;;  %v55_v14 = vld [vmem:[#allocation3 + $0x48] sm:$0xff]  ;;  %v54_v15 = vld [vmem:[#allocation3 + $0x40] sm:$0xff] }
  0x16   :  { %v57_v16 = vld [vmem:[#allocation3 + $0x58] sm:$0xff]  ;;  %357 = vmatpush1.bf16.msra.mxu0 %v356_v8  ;;  %v360_v17 = vpack.c.bf16 %v55_v14, %v52_v12  ;;  %v59_v19 = vld [vmem:[#allocation3 + $0x68] sm:$0xff]  ;;  %v62_v20 = vld [vmem:[#allocation3 + $0x80] sm:$0xff]  ;;  %v269_v12 = vlaneseq }
  0x17   :  { %387 = vmatprep.subr.bf16.mxu1 %v386_v9  ;;  %v390_v18 = vpack.c.bf16 %v57_v16, %v54_v15  ;;  %v58_v21 = vld [vmem:[#allocation3 + $0x60] sm:$0xff]  ;;  %359 = vmatprep.subr.bf16.mxu0 %v358_v13  ;;  %v362_v22 = vpack.c.bf16 %v62_v20, %v59_v19  ;;  %v61_v23 = vld [vmem:[#allocation3 + $0x78] sm:$0xff]  ;;  %v60_v24 = vld [vmem:[#allocation3 + $0x70] sm:$0xff] }
  0x18   :  { %389 = vmatpush3.bf16.msra.mxu1 %v386_v9  ;;  %v63_v25 = vld [vmem:[#allocation3 + $0x88] sm:$0xff]  ;;  %v65_v27 = vld [vmem:[#allocation3 + $0x98] sm:$0xff]  ;;  %v68_v28 = vld [vmem:[#allocation3 + $0xb0] sm:$0xff]  ;;  %v364_v31 = vpack.c.bf16 %v61_v23, %v58_v21  ;;  %v270_v13 = vshrl.u32 %v269_v12, 7 }
  0x19   :  { %391 = vmatprep.subr.bf16.mxu1 %v390_v18  ;;  %v394_v26 = vpack.c.bf16 %v63_v25, %v60_v24  ;;  %v66_v29 = vld [vmem:[#allocation3 + $0xa0] sm:$0xff]  ;;  %v69_v30 = vld [vmem:[#allocation3 + $0xb8] sm:$0xff]  ;;  %v366_v32 = vpack.c.bf16 %v68_v28, %v65_v27  ;;  %v64_v33 = vld [vmem:[#allocation3 + $0x90] sm:$0xff] }
  0x1a   :  { %361 = vmatpush1.bf16.msra.mxu0 %v360_v17  ;;  %v67_v34 = vld [vmem:[#allocation3 + $0xa8] sm:$0xff]  ;;  %v398_v35 = vpack.c.bf16 %v69_v30, %v66_v29  ;;  %v74_v37 = vld [vmem:[#allocation3 + $0xe0] sm:$0xff]  ;;  %v72_v38 = vld [vmem:[#allocation3 + $0xd0] sm:$0xff]  ;;  %v271_v14 = vsub.s32 0, %v270_v13  ;;  %v275_v16 = vsub.s32 1, %v270_v13  ;;  %v279_v17 = vsub.s32 2, %v270_v13 }
  0x1b   :  { %363 = vmatprep.subr.bf16.mxu0 %v362_v22  ;;  %v71_v36 = vld [vmem:[#allocation3 + $0xc8] sm:$0xff]  ;;  %v368_v40 = vpack.c.bf16 %v67_v34, %v64_v33  ;;  %v70_v42 = vld [vmem:[#allocation3 + $0xc0] sm:$0xff]  ;;  %v73_v43 = vld [vmem:[#allocation3 + $0xd8] sm:$0xff] }
  0x1c   :  { %393 = vmatpush3.bf16.msra.mxu1 %v390_v18  ;;  %v75_v39 = vld [vmem:[#allocation3 + $0xe8] sm:$0xff]  ;;  %v370_v41 = vpack.c.bf16 %v74_v37, %v71_v36  ;;  %v77_v45 = vld [vmem:[#allocation3 + $0xf8] sm:$0xff]  ;;  %v80_v46 = vld [vmem:[#allocation3 + $0x110] sm:$0xff]  ;;  %v372_v49 = vpack.c.bf16 %v73_v43, %v70_v42 }
  0x1d   :  { %395 = vmatprep.subr.bf16.mxu1 %v394_v26  ;;  %v402_v44 = vpack.c.bf16 %v75_v39, %v72_v38  ;;  %v78_v47 = vld [vmem:[#allocation3 + $0x100] sm:$0xff]  ;;  %v81_v48 = vld [vmem:[#allocation3 + $0x118] sm:$0xff]  ;;  %v374_v50 = vpack.c.bf16 %v80_v46, %v77_v45  ;;  %v76_v51 = vld [vmem:[#allocation3 + $0xf0] sm:$0xff] }
  0x1e   :  { %365 = vmatpush1.bf16.msra.mxu0 %v364_v31  ;;  %v79_v52 = vld [vmem:[#allocation3 + $0x108] sm:$0xff]  ;;  %v44_v53 = vld [vmem:[%s511_s0] sm:$0xff]  ;;  %v406_v54 = vpack.c.bf16 %v81_v48, %v78_v47  ;;  %v84_v57 = vld [vmem:[#allocation3 + $0x130] sm:$0xff] }
  0x1f   :  { %367 = vmatprep.subr.bf16.mxu0 %v366_v32  ;;  %v83_v55 = vld [vmem:[#allocation3 + $0x128] sm:$0xff]  ;;  %v86_v56 = vld [vmem:[#allocation3 + $0x140] sm:$0xff]  ;;  %351 = vmatprep.mubr.f32.mxu1 %v44_v53  ;;  %v376_v59 = vpack.c.bf16 %v79_v52, %v76_v51  ;;  %v85_v62 = vld [vmem:[#allocation3 + $0x138] sm:$0xff] }
  0x20   :  { %397 = vmatpush3.bf16.msra.mxu1 %v394_v26  ;;  %v87_v58 = vld [vmem:[#allocation3 + $0x148] sm:$0xff]  ;;  %v378_v60 = vpack.c.bf16 %v86_v56, %v83_v55  ;;  %v82_v61 = vld [vmem:[#allocation3 + $0x120] sm:$0xff]  ;;  %v89_v1 = vld [vmem:[#allocation3 + $0x158] sm:$0xff] }
  0x21   :  { %399 = vmatprep.subr.bf16.mxu1 %v398_v35  ;;  %v410_v63 = vpack.c.bf16 %v87_v58, %v84_v57  ;;  %v92_v2 = vld [vmem:[#allocation3 + $0x170] sm:$0xff]  ;;  %v90_v3 = vld [vmem:[#allocation3 + $0x160] sm:$0xff]  ;;  %v93_v4 = vld [vmem:[#allocation3 + $0x178] sm:$0xff]  ;;  %v380_v5 = vpack.c.bf16 %v85_v62, %v82_v61 }
  0x22   :  { %369 = vmatpush1.bf16.msra.mxu0 %v368_v40  ;;  %v382_v6 = vpack.c.bf16 %v92_v2, %v89_v1  ;;  %v88_v7 = vld [vmem:[#allocation3 + $0x150] sm:$0xff]  ;;  %v91_v8 = vld [vmem:[#allocation3 + $0x168] sm:$0xff]  ;;  %v414_v9 = vpack.c.bf16 %v93_v4, %v90_v3  ;;  %v267_v15 = vld [vmem:[%s513_s2] sm:$0x7] }
  0x23   :  { %371 = vmatprep.subr.bf16.mxu0 %v370_v41  ;;  %v384_v10 = vpack.c.bf16 %v91_v8, %v88_v7  ;;  %v45_v11 = vld [vmem:[%s511_s0 + $0x8] sm:$0xff]  ;;  %v272_v18 = vrot.slane %v267_v15, %v271_v14  ;;  %v276_v19 = vrot.slane %v267_v15, %v275_v16  ;;  %v280_v20 = vrot.slane %v267_v15, %v279_v17 }
  0x24   :  { %401 = vmatpush3.bf16.msra.mxu1 %v398_v35 }
  0x25   :  { %403 = vmatprep.subr.bf16.mxu1 %v402_v44 }
  0x26   :  { %373 = vmatpush1.bf16.msra.mxu0 %v372_v49 }
  0x27   :  { %375 = vmatprep.subr.bf16.mxu0 %v374_v50 }
  0x28   :  { %405 = vmatpush3.bf16.msra.mxu1 %v402_v44 }
  0x29   :  { %407 = vmatprep.subr.bf16.mxu1 %v406_v54 }
  0x2a   :  { %377 = vmatpush1.bf16.msra.mxu0 %v376_v59 }
  0x2b   :  { %379 = vmatprep.subr.bf16.mxu0 %v378_v60 }
  0x2c   :  { %409 = vmatpush3.bf16.msra.mxu1 %v406_v54 }
  0x2d   :  { %411 = vmatprep.subr.bf16.mxu1 %v410_v63 }
  0x2e   :  { %381 = vmatpush1.bf16.msra.mxu0 %v380_v5 }
  0x2f   :  { %383 = vmatprep.subr.bf16.mxu0 %v382_v6 }
  0x30   :  { %413 = vmatpush3.bf16.msra.mxu1 %v410_v63 }
  0x31   :  { %415 = vmatprep.subr.bf16.mxu1 %v414_v9 }
  0x32   :  { %385 = vmatpush1.bf16.msra.mxu0 %v384_v10 }
  0x34   :  { %417 = vmatpush3.bf16.msra.mxu1 %v414_v9 }
  0x35   :  { %159 = vmatmul.mubr.f32.vlgmr.msra.gmra.mrb[0].mxu0 %v44_v53 }
  0x36   :  { %164 = vmatprep.mubr.f32.mxu0 %v449_v0 }
  0x37   :  { %352 = vmatmul.mubr.f32.vlgmr.msra.gmra.mrb[0].mxu1 %v45_v11 }
  0x39   :  { %165 = vmatmul.mubr.f32.gmra.mrb[2].mxu0 %v45_v11 }
 0x108   :  { %v160_v21 = vpop.f32.mrb[0].mxu0 }
 0x109   :  { %v284_v22 = vadd.f32 %v272_v18, %v160_v21  ;;  %v162_v23 = vpop.f32.mrb[1].mxu0 }
 0x10a   :  { %v353_v24 = vpop.f32.mrb[0].mxu1  ;;  %v285_v25 = vadd.f32 %v276_v19, %v162_v23 }
 0x10b   :  { %v289_v0 = vadd.f32 %v353_v24, %v280_v20  ;;  %v237_v26 = vpop.f32.mrb[1].mxu1  ;;  %290 = vst [vmem:[%s514_s3] sm:$0xff] %v284_v22 }
 0x10c   :  { %v286_v27 = vadd.f32 %v280_v20, %v237_v26  ;;  %291 = vst [vmem:[%s514_s3 + $0x8] sm:$0xff] %v285_v25  ;;  %v166_v28 = vpop.f32.mrb[2].mxu0 }
 0x10d   :  { %295 = vst [vmem:[%s514_s3 + $0x28] sm:$0xff] %v289_v0  ;;  %v287_v29 = vadd.f32 %v272_v18, %v166_v28  ;;  %v168_v30 = vpop.f32.mrb[3].mxu0 }
 0x10e   :  { %292 = vst [vmem:[%s514_s3 + $0x10] sm:$0xff] %v286_v27  ;;  %v288_v31 = vadd.f32 %v276_v19, %v168_v30 }
 0x10f   :  { %293 = vst [vmem:[%s514_s3 + $0x18] sm:$0xff] %v287_v29 }
 0x110   :  { %294 = vst [vmem:[%s514_s3 + $0x20] sm:$0xff] %v288_v31 }
 0x111   :  { %300 = vsyncpa [#allocation4], 1 }

// kernel: transformer_forward.38
= control target key start
LH: loop header
LB: loop body
LE: loop exit
PB: predicated region body
PF: predicated region fallthrough
CT: control target
= control target key end

     0   :  { %8 = vsyncpa [#allocation4], 0  ;;  %s267_s12 = smov [#allocation3]   ;;  %s317_s0 = inlined_call_operand.vmem [shape: f32[16,128], index: 0, kind: input, shape index: {}]   ;;  %s318_s1 = inlined_call_operand.hbm [shape: f32[128,128], index: 1, kind: input, shape index: {}]   ;;  %s319_s2 = inlined_call_operand.vmem [shape: f32[1,128], index: 2, kind: input, shape index: {}]   ;;  %s320_s3 = inlined_call_operand.vmem [shape: f32[16,128], index: 3, kind: output, shape index: {}]  }
   0x1   :  { %s16_s13 = sshll.u32 %s267_s12, 4  ;;  %s243_s16 = scalar_lea.hbm %s318_s1, 2048  ;;  %s17_s13 = int_to_ptr.vmem [resolvable:$true] %s16_s13 }
   0x2   :  { %p244_p0 = scmp.ne.s32.totalorder %s318_s1, %s243_s16  ;;  %p247_p1 = scmp.lt.u32.totalorder %s243_s16, %s318_s1 }
   0x4   :  { %p249_p2 = pnand %p247_p1, %p244_p0 }
   0x6   :  { %252 = shalt.err (!%p249_p2)
}
   0x7   :  { %s253_s21 = scalar_lea.vmem %s17_s13, 2048  ;;  %p258_p4 = scmp.lt.s32.totalorder %s17_s13, %s17_s13 }
   0x8   :  { %p254_p3 = scmp.ne.s32.totalorder %s17_s13, %s253_s21  ;;  %p259_p5 = scmp.lt.s32.totalorder %s253_s21, %s253_s21 }
   0xa   :  { %p260_p6 = por %p259_p5, %p258_p4 }
   0xc   :  { %p261_p7 = pnand %p260_p6, %p254_p3 }
   0xe   :  { %264 = shalt.err (!%p261_p7)
}
   0xf   :  { %s268_s22 = smov 128   ;;  %s269_s23 = smov 8  }
  0x10   :  { %22 = dma.hbm_to_vmem [thread:$0]  %s318_s1, 2048, %s17_s13, [#allocation4], %s268_s22, %s268_s22, %s269_s23  }
  0x11   :  { %265 = dma.done.wait [#allocation4], 2048  }
  0x12   :  { %266 = vsyncadd [#allocation4], 4294965248  ;;  %v38_v0 = vld [vmem:[#allocation3] sm:$0xff]  ;;  %v39_v1 = vld [vmem:[#allocation3 + $0x8] sm:$0xff] }
  0x13   :  { %v40_v2 = vld [vmem:[#allocation3 + $0x10] sm:$0xff]  ;;  %v208_v3 = vpack.c.bf16 %v39_v1, %v38_v0  ;;  %v41_v4 = vld [vmem:[#allocation3 + $0x18] sm:$0xff]  ;;  %v42_v6 = vld [vmem:[#allocation3 + $0x20] sm:$0xff] }
  0x14   :  { %v212_v5 = vpack.c.bf16 %v41_v4, %v40_v2  ;;  %v43_v7 = vld [vmem:[#allocation3 + $0x28] sm:$0xff]  ;;  %v36_v9 = vld [vmem:[%s317_s0] sm:$0xff]  ;;  %v44_v10 = vld [vmem:[#allocation3 + $0x30] sm:$0xff] }
  0x15   :  { %209 = vmatprep.subr.bf16.mxu0 %v208_v3  ;;  %v216_v8 = vpack.c.bf16 %v43_v7, %v42_v6  ;;  %v45_v11 = vld [vmem:[#allocation3 + $0x38] sm:$0xff]  ;;  %205 = vmatprep.mubr.f32.mxu0 %v36_v9  ;;  %v46_v13 = vld [vmem:[#allocation3 + $0x40] sm:$0xff]  ;;  %v47_v14 = vld [vmem:[#allocation3 + $0x48] sm:$0xff] }
  0x16   :  { %211 = vmatpush3.bf16.msra.mxu0 %v208_v3  ;;  %v220_v12 = vpack.c.bf16 %v45_v11, %v44_v10  ;;  %v224_v15 = vpack.c.bf16 %v47_v14, %v46_v13  ;;  %v48_v16 = vld [vmem:[#allocation3 + $0x50] sm:$0xff]  ;;  %v49_v17 = vld [vmem:[#allocation3 + $0x58] sm:$0xff]  ;;  %v50_v19 = vld [vmem:[#allocation3 + $0x60] sm:$0xff] }
  0x17   :  { %213 = vmatprep.subr.bf16.mxu0 %v212_v5  ;;  %v228_v18 = vpack.c.bf16 %v49_v17, %v48_v16  ;;  %v51_v20 = vld [vmem:[#allocation3 + $0x68] sm:$0xff]  ;;  %v52_v22 = vld [vmem:[#allocation3 + $0x70] sm:$0xff]  ;;  %v53_v23 = vld [vmem:[#allocation3 + $0x78] sm:$0xff] }
  0x18   :  { %v232_v21 = vpack.c.bf16 %v51_v20, %v50_v19  ;;  %v236_v24 = vpack.c.bf16 %v53_v23, %v52_v22  ;;  %v37_v25 = vld [vmem:[%s317_s0 + $0x8] sm:$0xff]  ;;  %v154_v26 = vld [vmem:[%s319_s2] ss:$0 sm:$0xff] }
  0x1a   :  { %215 = vmatpush3.bf16.msra.mxu0 %v212_v5 }
  0x1b   :  { %217 = vmatprep.subr.bf16.mxu0 %v216_v8 }
  0x1e   :  { %219 = vmatpush3.bf16.msra.mxu0 %v216_v8 }
  0x1f   :  { %221 = vmatprep.subr.bf16.mxu0 %v220_v12 }
  0x22   :  { %223 = vmatpush3.bf16.msra.mxu0 %v220_v12 }
  0x23   :  { %225 = vmatprep.subr.bf16.mxu0 %v224_v15 }
  0x26   :  { %227 = vmatpush3.bf16.msra.mxu0 %v224_v15 }
  0x27   :  { %229 = vmatprep.subr.bf16.mxu0 %v228_v18 }
  0x2a   :  { %231 = vmatpush3.bf16.msra.mxu0 %v228_v18 }
  0x2b   :  { %233 = vmatprep.subr.bf16.mxu0 %v232_v21 }
  0x2e   :  { %235 = vmatpush3.bf16.msra.mxu0 %v232_v21 }
  0x2f   :  { %237 = vmatprep.subr.bf16.mxu0 %v236_v24 }
  0x32   :  { %239 = vmatpush3.bf16.msra.mxu0 %v236_v24 }
  0x35   :  { %206 = vmatmul.mubr.f32.vlgmr.msra.gmra.mrb[0].mxu0 %v37_v25 }
 0x108   :  { %v207_v27 = vpop.f32.mrb[0].mxu0 }
 0x109   :  { %v146_v28 = vadd.f32 %v207_v27, %v154_v26  ;;  %v120_v29 = vpop.f32.mrb[1].mxu0 }
 0x10a   :  { %v145_v30 = vadd.f32 %v154_v26, %v120_v29 }
 0x10b   :  { %148 = vst [vmem:[%s320_s3 + $0x8] sm:$0xff] %v146_v28 }
 0x10c   :  { %147 = vst [vmem:[%s320_s3] sm:$0xff] %v145_v30 }
 0x10d   :  { %153 = vsyncpa [#allocation4], 1 }

// kernel: transformer_forward.37
= control target key start
LH: loop header
LB: loop body
LE: loop exit
PB: predicated region body
PF: predicated region fallthrough
CT: control target
= control target key end

     0   :  { %11 = vsyncpa [#allocation4], 0  ;;  %s327_s21 = smov [#allocation3]   ;;  %s404_s0 = inlined_call_operand.vmem [shape: f32[16,128], index: 0, kind: input, shape index: {}]   ;;  %s405_s1 = inlined_call_operand.hbm [shape: f32[128,128], index: 1, kind: input, shape index: {}]   ;;  %s406_s2 = inlined_call_operand.vmem [shape: f32[1,128], index: 2, kind: input, shape index: {}]   ;;  %s407_s3 = inlined_call_operand.vmem [shape: f32[16,128], index: 3, kind: input, shape index: {}]   ;;  %s408_s4 = inlined_call_operand.vmem [shape: f32[1,128], index: 4, kind: input, shape index: {}]   ;;  %s409_s5 = inlined_call_operand.vmem [shape: f32[1,128], index: 5, kind: input, shape index: {}]   ;;  %s410_s6 = inlined_call_operand.vmem [shape: f32[16,128], index: 6, kind: output, shape index: {}]  }
   0x1   :  { %s19_s22 = sshll.u32 %s327_s21, 4  ;;  %s303_s25 = scalar_lea.hbm %s405_s1, 2048  ;;  %s20_s22 = int_to_ptr.vmem [resolvable:$true] %s19_s22 }
   0x2   :  { %p304_p0 = scmp.ne.s32.totalorder %s405_s1, %s303_s25  ;;  %p307_p1 = scmp.lt.u32.totalorder %s303_s25, %s405_s1 }
   0x4   :  { %p309_p2 = pnand %p307_p1, %p304_p0 }
   0x6   :  { %312 = shalt.err (!%p309_p2)
}
   0x7   :  { %s313_s30 = scalar_lea.vmem %s20_s22, 2048  ;;  %p318_p4 = scmp.lt.s32.totalorder %s20_s22, %s20_s22 }
   0x8   :  { %p314_p3 = scmp.ne.s32.totalorder %s20_s22, %s313_s30  ;;  %p319_p5 = scmp.lt.s32.totalorder %s313_s30, %s313_s30 }
   0xa   :  { %p320_p6 = por %p319_p5, %p318_p4 }
   0xc   :  { %p321_p7 = pnand %p320_p6, %p314_p3 }
   0xe   :  { %324 = shalt.err (!%p321_p7)
}
   0xf   :  { %s328_s7 = smov 128   ;;  %s329_s8 = smov 8  }
  0x10   :  { %25 = dma.hbm_to_vmem [thread:$0]  %s405_s1, 2048, %s20_s22, [#allocation4], %s328_s7, %s328_s7, %s329_s8  }
  0x11   :  { %325 = dma.done.wait [#allocation4], 2048  }
  0x12   :  { %326 = vsyncadd [#allocation4], 4294965248  ;;  %v47_v0 = vld [vmem:[#allocation3] sm:$0xff]  ;;  %v48_v1 = vld [vmem:[#allocation3 + $0x8] sm:$0xff] }
  0x13   :  { %v49_v2 = vld [vmem:[#allocation3 + $0x10] sm:$0xff]  ;;  %v264_v3 = vpack.c.bf16 %v48_v1, %v47_v0  ;;  %v50_v4 = vld [vmem:[#allocation3 + $0x18] sm:$0xff]  ;;  %v51_v6 = vld [vmem:[#allocation3 + $0x20] sm:$0xff] }
  0x14   :  { %v268_v5 = vpack.c.bf16 %v50_v4, %v49_v2  ;;  %v52_v7 = vld [vmem:[#allocation3 + $0x28] sm:$0xff]  ;;  %v45_v9 = vld [vmem:[%s404_s0] sm:$0xff]  ;;  %v53_v10 = vld [vmem:[#allocation3 + $0x30] sm:$0xff] }
  0x15   :  { %265 = vmatprep.subr.bf16.mxu0 %v264_v3  ;;  %v272_v8 = vpack.c.bf16 %v52_v7, %v51_v6  ;;  %v54_v11 = vld [vmem:[#allocation3 + $0x38] sm:$0xff]  ;;  %261 = vmatprep.mubr.f32.mxu0 %v45_v9  ;;  %v55_v13 = vld [vmem:[#allocation3 + $0x40] sm:$0xff]  ;;  %v56_v14 = vld [vmem:[#allocation3 + $0x48] sm:$0xff] }
  0x16   :  { %267 = vmatpush3.bf16.msra.mxu0 %v264_v3  ;;  %v276_v12 = vpack.c.bf16 %v54_v11, %v53_v10  ;;  %v280_v15 = vpack.c.bf16 %v56_v14, %v55_v13  ;;  %v57_v16 = vld [vmem:[#allocation3 + $0x50] sm:$0xff]  ;;  %v58_v17 = vld [vmem:[#allocation3 + $0x58] sm:$0xff]  ;;  %v59_v19 = vld [vmem:[#allocation3 + $0x60] sm:$0xff] }
  0x17   :  { %269 = vmatprep.subr.bf16.mxu0 %v268_v5  ;;  %v284_v18 = vpack.c.bf16 %v58_v17, %v57_v16  ;;  %v60_v20 = vld [vmem:[#allocation3 + $0x68] sm:$0xff]  ;;  %v61_v22 = vld [vmem:[#allocation3 + $0x70] sm:$0xff]  ;;  %v62_v23 = vld [vmem:[#allocation3 + $0x78] sm:$0xff] }
  0x18   :  { %v288_v21 = vpack.c.bf16 %v60_v20, %v59_v19  ;;  %v292_v24 = vpack.c.bf16 %v62_v23, %v61_v22  ;;  %v46_v25 = vld [vmem:[%s404_s0 + $0x8] sm:$0xff]  ;;  %v208_v26 = vld [vmem:[%s406_s2] ss:$0 sm:$0xff] }
  0x19   :  { %v156_v29 = vld [vmem:[%s407_s3] sm:$0xff]  ;;  %v157_v33 = vld [vmem:[%s407_s3 + $0x8] sm:$0xff] }
  0x1a   :  { %271 = vmatpush3.bf16.msra.mxu0 %v268_v5  ;;  %v209_v50 = vld [vmem:[%s408_s4] ss:$0 sm:$0xff] }
  0x1b   :  { %273 = vmatprep.subr.bf16.mxu0 %v272_v8  ;;  %v210_v52 = vld [vmem:[%s409_s5] ss:$0 sm:$0xff] }
  0x1e   :  { %275 = vmatpush3.bf16.msra.mxu0 %v272_v8 }
  0x1f   :  { %277 = vmatprep.subr.bf16.mxu0 %v276_v12 }
  0x22   :  { %279 = vmatpush3.bf16.msra.mxu0 %v276_v12 }
  0x23   :  { %281 = vmatprep.subr.bf16.mxu0 %v280_v15 }
  0x26   :  { %283 = vmatpush3.bf16.msra.mxu0 %v280_v15 }
  0x27   :  { %285 = vmatprep.subr.bf16.mxu0 %v284_v18 }
  0x2a   :  { %287 = vmatpush3.bf16.msra.mxu0 %v284_v18 }
  0x2b   :  { %289 = vmatprep.subr.bf16.mxu0 %v288_v21 }
  0x2e   :  { %291 = vmatpush3.bf16.msra.mxu0 %v288_v21 }
  0x2f   :  { %293 = vmatprep.subr.bf16.mxu0 %v292_v24 }
  0x32   :  { %295 = vmatpush3.bf16.msra.mxu0 %v292_v24 }
  0x35   :  { %262 = vmatmul.mubr.f32.vlgmr.msra.gmra.mrb[0].mxu0 %v46_v25 }
 0x108   :  { %v263_v27 = vpop.f32.mrb[0].mxu0 }
 0x109   :  { %v129_v28 = vpop.f32.mrb[1].mxu0  ;;  %v155_v31 = vadd.f32 %v263_v27, %v208_v26 }
 0x10a   :  { %v154_v30 = vadd.f32 %v208_v26, %v129_v28 }
 0x10b   :  { %v159_v34 = vadd.f32 %v157_v33, %v155_v31 }
 0x10c   :  { %v158_v32 = vadd.f32 %v156_v29, %v154_v30 }
 0x10e   :  { %160 = vadd.xlane.f32.xlu0 %v158_v32 }
 0x112   :  { %162 = vadd.xlane.f32.xlu0 %v159_v34 }
 0x19b   :  { %v161_v35 = vpop.xlane.xlu0 %160 }
 0x19c   :  { %v165_v36 = vmul.f32 0.0078125, %v161_v35 }
 0x19e   :  { %v167_v37 = vsub.f32 %v158_v32, %v165_v36 }
 0x19f   :  { %v163_v38 = vpop.xlane.xlu0 %162 }
 0x1a0   :  { %v166_v39 = vmul.f32 0.0078125, %v163_v38  ;;  %v169_v40 = vmul.f32 %v167_v37, %v167_v37 }
 0x1a2   :  { %v168_v41 = vsub.f32 %v159_v34, %v166_v39  ;;  %171 = vadd.xlane.f32.xlu1 %v169_v40 }
 0x1a4   :  { %v170_v42 = vmul.f32 %v168_v41, %v168_v41 }
 0x1a6   :  { %173 = vadd.xlane.f32.xlu1 %v170_v42 }
 0x22f   :  { %v172_v43 = vpop.xlane.xlu1 %171 }
 0x230   :  { %v175_v44 = vmul.f32 0.0078125, %v172_v43 }
 0x232   :  { %v177_v45 = vadd.f32 1e-05, %v175_v44 }
 0x233   :  { %v174_v46 = vpop.xlane.xlu1 %173 }
 0x234   :  { %299 = vrsqrt.f32 %v177_v45  ;;  %v176_v47 = vmul.f32 0.0078125, %v174_v46 }
 0x236   :  { %v178_v48 = vadd.f32 1e-05, %v176_v47 }
 0x238   :  { %301 = vrsqrt.f32 %v178_v48 }
 0x23e   :  { %v300_v49 = vpop.eup %299 }
 0x23f   :  { %v181_v51 = vmul.f32 %v300_v49, %v167_v37 }
 0x241   :  { %v190_v53 = vmul.f32 %v209_v50, %v181_v51 }
 0x242   :  { %v302_v54 = vpop.eup %301 }
 0x243   :  { %v199_v55 = vadd.f32 %v210_v52, %v190_v53  ;;  %v182_v56 = vmul.f32 %v302_v54, %v168_v41 }
 0x245   :  { %201 = vst [vmem:[%s410_s6] sm:$0xff] %v199_v55  ;;  %v191_v57 = vmul.f32 %v209_v50, %v182_v56 }
 0x247   :  { %v200_v58 = vadd.f32 %v210_v52, %v191_v57 }
 0x249   :  { %202 = vst [vmem:[%s410_s6 + $0x8] sm:$0xff] %v200_v58 }
 0x24a   :  { %207 = vsyncpa [#allocation4], 1 }

// kernel: transformer_forward.28
= control target key start
LH: loop header
LB: loop body
LE: loop exit
PB: predicated region body
PF: predicated region fallthrough
CT: control target
= control target key end

     0   :  { %11 = vsyncpa [#allocation4], 0  ;;  %s551_s0 = inlined_call_operand.vmem [shape: f32[16,128], index: 0, kind: input, shape index: {}]   ;;  %s552_s1 = inlined_call_operand.hbm [shape: f32[128,128], index: 1, kind: input, shape index: {}]   ;;  %s553_s2 = inlined_call_operand.hbm [shape: f32[1,128], index: 2, kind: input, shape index: {}]   ;;  %s554_s3 = inlined_call_operand.vmem [shape: f32[16,128], index: 3, kind: input, shape index: {}]   ;;  %s555_s4 = inlined_call_operand.hbm [shape: f32[1,128], index: 4, kind: input, shape index: {}]   ;;  %s556_s5 = inlined_call_operand.hbm [shape: f32[1,128], index: 5, kind: input, shape index: {}]   ;;  %s557_s6 = inlined_call_operand.vmem [shape: f32[16,128], index: 6, kind: output, shape index: {}]  }
   0x1   :  { %12 = vsyncpa [#allocation6], 0 }
   0x2   :  { %13 = vsyncpa [#allocation9], 0  ;;  %s437_s21 = smov [#allocation5]   ;;  %s438_s23 = smov [#allocation3]  }
   0x3   :  { %s34_s22 = sshll.u32 %s437_s21, 4  ;;  %s21_s24 = sshll.u32 %s438_s23, 4  ;;  %s35_s22 = int_to_ptr.vmem [resolvable:$true] %s34_s22  ;;  %s478_s24 = int_to_ptr.vmem [resolvable:$true] %s21_s24 }
   0x4   :  { %s343_s27 = scalar_lea.hbm %s553_s2, 16 }
   0x5   :  { %p344_p0 = scmp.ne.s32.totalorder %s553_s2, %s343_s27  ;;  %p347_p1 = scmp.lt.u32.totalorder %s343_s27, %s553_s2 }
   0x7   :  { %p349_p2 = pnand %p347_p1, %p344_p0 }
   0x9   :  { %352 = shalt.err (!%p349_p2)
}
   0xa   :  { %s353_s8 = scalar_lea.vmem %s35_s22, 16  ;;  %s357_s9 = scalar_lea.vmem %s35_s22, 32 }
   0xb   :  { %p354_p3 = scmp.ne.s32.totalorder %s35_s22, %s353_s8  ;;  %p358_p4 = scmp.lt.s32.totalorder %s35_s22, %s35_s22 }
   0xc   :  { %p359_p5 = scmp.lt.s32.totalorder %s357_s9, %s353_s8 }
   0xe   :  { %p360_p6 = por %p359_p5, %p358_p4 }
  0x10   :  { %p361_p7 = pnand %p360_p6, %p354_p3 }
  0x12   :  { %364 = shalt.err (!%p361_p7)
}
  0x13   :  { %37 = dma.hbm_to_vmem [thread:$0]  %s553_s2, 16, %s35_s22, [#allocation6]  }
  0x14   :  { %s365_s14 = scalar_lea.hbm %s552_s1, 2048 }
  0x15   :  { %p366_p8 = scmp.ne.s32.totalorder %s552_s1, %s365_s14  ;;  %p369_p9 = scmp.lt.u32.totalorder %s365_s14, %s552_s1 }
  0x17   :  { %p371_p10 = pnand %p369_p9, %p366_p8 }
  0x19   :  { %374 = shalt.err (!%p371_p10)
}
  0x1a   :  { %s375_s19 = scalar_lea.vmem %s478_s24, 2048  ;;  %p380_p12 = scmp.lt.s32.totalorder %s478_s24, %s478_s24 }
  0x1b   :  { %p376_p11 = scmp.ne.s32.totalorder %s478_s24, %s375_s19  ;;  %p381_p13 = scmp.lt.s32.totalorder %s375_s19, %s375_s19 }
  0x1d   :  { %p382_p0 = por %p381_p13, %p380_p12 }
  0x1f   :  { %p383_p1 = pnand %p382_p0, %p376_p11 }
  0x21   :  { %386 = shalt.err (!%p383_p1)
}
  0x22   :  { %s439_s2 = smov 128   ;;  %s440_s20 = smov 8  }
  0x23   :  { %27 = dma.hbm_to_vmem [thread:$0]  %s552_s1, 2048, %s478_s24, [#allocation4], %s439_s2, %s439_s2, %s440_s20  }
  0x24   :  { %s441_s23 = smov [#allocation7]   ;;  %s442_s26 = smov [#allocation8]  }
  0x25   :  { %s46_s25 = sshll.u32 %s441_s23, 4  ;;  %s56_s27 = sshll.u32 %s442_s26, 4  ;;  %s47_s25 = int_to_ptr.vmem [resolvable:$true] %s46_s25  ;;  %s57_s27 = int_to_ptr.vmem [resolvable:$true] %s56_s27 }
  0x26   :  { %s387_s30 = scalar_lea.hbm %s555_s4, 16 }
  0x27   :  { %p388_p2 = scmp.ne.s32.totalorder %s555_s4, %s387_s30  ;;  %p391_p3 = scmp.lt.u32.totalorder %s387_s30, %s555_s4 }
  0x29   :  { %p393_p4 = pnand %p391_p3, %p388_p2 }
  0x2b   :  { %396 = shalt.err (!%p393_p4)
}
  0x2c   :  { %s397_s1 = scalar_lea.vmem %s47_s25, 16  ;;  %s401_s24 = scalar_lea.vmem %s47_s25, 32 }
  0x2d   :  { %p398_p5 = scmp.ne.s32.totalorder %s47_s25, %s397_s1  ;;  %p402_p6 = scmp.lt.s32.totalorder %s47_s25, %s47_s25 }
  0x2e   :  { %p403_p7 = scmp.lt.s32.totalorder %s401_s24, %s397_s1 }
  0x30   :  { %p404_p8 = por %p403_p7, %p402_p6 }
  0x32   :  { %p405_p9 = pnand %p404_p8, %p398_p5 }
  0x34   :  { %408 = shalt.err (!%p405_p9)
}
  0x35   :  { %49 = dma.hbm_to_vmem [thread:$0]  %s555_s4, 16, %s47_s25, [#allocation6]  }
  0x36   :  { %s409_s15 = scalar_lea.hbm %s556_s5, 16 }
  0x37   :  { %p410_p10 = scmp.ne.s32.totalorder %s556_s5, %s409_s15  ;;  %p413_p11 = scmp.lt.u32.totalorder %s409_s15, %s556_s5 }
  0x39   :  { %p415_p12 = pnand %p413_p11, %p410_p10 }
  0x3b   :  { %418 = shalt.err (!%p415_p12)
}
  0x3c   :  { %s419_s2 = scalar_lea.vmem %s57_s27, 16  ;;  %s423_s20 = scalar_lea.vmem %s57_s27, 32 }
  0x3d   :  { %p420_p13 = scmp.ne.s32.totalorder %s57_s27, %s419_s2  ;;  %p424_p0 = scmp.lt.s32.totalorder %s57_s27, %s57_s27 }
  0x3e   :  { %p425_p1 = scmp.lt.s32.totalorder %s423_s20, %s419_s2 }
  0x40   :  { %p426_p2 = por %p425_p1, %p424_p0 }
  0x42   :  { %p427_p3 = pnand %p426_p2, %p420_p13 }
  0x44   :  { %430 = shalt.err (!%p427_p3)
}
  0x45   :  { %59 = dma.hbm_to_vmem [thread:$0]  %s556_s5, 16, %s57_s27, [#allocation9]  }
  0x46   :  { %431 = dma.done.wait [#allocation4], 2048  }
  0x47   :  { %432 = vsyncadd [#allocation4], 4294965248 }
  0x48   :  { %433 = dma.done.wait [#allocation6], 32  }
  0x49   :  { %434 = vsyncadd [#allocation6], 4294967264 }
  0x4a   :  { %435 = dma.done.wait [#allocation9], 16  }
  0x4b   :  { %436 = vsyncadd [#allocation9], 4294967280  ;;  %v82_v0 = vld [vmem:[#allocation3] sm:$0xff]  ;;  %v83_v1 = vld [vmem:[#allocation3 + $0x8] sm:$0xff] }
  0x4c   :  { %v84_v2 = vld [vmem:[#allocation3 + $0x10] sm:$0xff]  ;;  %v301_v3 = vpack.c.bf16 %v83_v1, %v82_v0  ;;  %v85_v4 = vld [vmem:[#allocation3 + $0x18] sm:$0xff]  ;;  %v86_v6 = vld [vmem:[#allocation3 + $0x20] sm:$0xff] }
  0x4d   :  { %v305_v5 = vpack.c.bf16 %v85_v4, %v84_v2  ;;  %v87_v7 = vld [vmem:[#allocation3 + $0x28] sm:$0xff]  ;;  %v80_v9 = vld [vmem:[%s551_s0] sm:$0xff]  ;;  %v88_v10 = vld [vmem:[#allocation3 + $0x30] sm:$0xff] }
  0x4e   :  { %302 = vmatprep.subr.bf16.mxu0 %v301_v3  ;;  %v309_v8 = vpack.c.bf16 %v87_v7, %v86_v6  ;;  %v89_v11 = vld [vmem:[#allocation3 + $0x38] sm:$0xff]  ;;  %298 = vmatprep.mubr.f32.mxu0 %v80_v9  ;;  %v90_v13 = vld [vmem:[#allocation3 + $0x40] sm:$0xff]  ;;  %v91_v14 = vld [vmem:[#allocation3 + $0x48] sm:$0xff] }
  0x4f   :  { %304 = vmatpush3.bf16.msra.mxu0 %v301_v3  ;;  %v313_v12 = vpack.c.bf16 %v89_v11, %v88_v10  ;;  %v317_v15 = vpack.c.bf16 %v91_v14, %v90_v13  ;;  %v92_v16 = vld [vmem:[#allocation3 + $0x50] sm:$0xff]  ;;  %v93_v17 = vld [vmem:[#allocation3 + $0x58] sm:$0xff]  ;;  %v94_v19 = vld [vmem:[#allocation3 + $0x60] sm:$0xff] }
  0x50   :  { %306 = vmatprep.subr.bf16.mxu0 %v305_v5  ;;  %v321_v18 = vpack.c.bf16 %v93_v17, %v92_v16  ;;  %v95_v20 = vld [vmem:[#allocation3 + $0x68] sm:$0xff]  ;;  %v96_v22 = vld [vmem:[#allocation3 + $0x70] sm:$0xff]  ;;  %v97_v23 = vld [vmem:[#allocation3 + $0x78] sm:$0xff] }
  0x51   :  { %v325_v21 = vpack.c.bf16 %v95_v20, %v94_v19  ;;  %v329_v24 = vpack.c.bf16 %v97_v23, %v96_v22  ;;  %v81_v25 = vld [vmem:[%s551_s0 + $0x8] sm:$0xff]  ;;  %v245_v26 = vld [vmem:[#allocation5] ss:$0 sm:$0xff]  ;;  %v246_v50 = vld [vmem:[#allocation7] ss:$0 sm:$0xff] }
  0x52   :  { %v191_v29 = vld [vmem:[%s554_s3] sm:$0xff]  ;;  %v192_v33 = vld [vmem:[%s554_s3 + $0x8] sm:$0xff] }
  0x53   :  { %308 = vmatpush3.bf16.msra.mxu0 %v305_v5  ;;  %v247_v52 = vld [vmem:[#allocation8] ss:$0 sm:$0xff] }
  0x54   :  { %310 = vmatprep.subr.bf16.mxu0 %v309_v8 }
  0x57   :  { %312 = vmatpush3.bf16.msra.mxu0 %v309_v8 }
  0x58   :  { %314 = vmatprep.subr.bf16.mxu0 %v313_v12 }
  0x5b   :  { %316 = vmatpush3.bf16.msra.mxu0 %v313_v12 }
  0x5c   :  { %318 = vmatprep.subr.bf16.mxu0 %v317_v15 }
  0x5f   :  { %320 = vmatpush3.bf16.msra.mxu0 %v317_v15 }
  0x60   :  { %322 = vmatprep.subr.bf16.mxu0 %v321_v18 }
  0x63   :  { %324 = vmatpush3.bf16.msra.mxu0 %v321_v18 }
  0x64   :  { %326 = vmatprep.subr.bf16.mxu0 %v325_v21 }
  0x67   :  { %328 = vmatpush3.bf16.msra.mxu0 %v325_v21 }
  0x68   :  { %330 = vmatprep.subr.bf16.mxu0 %v329_v24 }
  0x6b   :  { %332 = vmatpush3.bf16.msra.mxu0 %v329_v24 }
  0x6e   :  { %299 = vmatmul.mubr.f32.vlgmr.msra.gmra.mrb[0].mxu0 %v81_v25 }
 0x141   :  { %v300_v27 = vpop.f32.mrb[0].mxu0 }
 0x142   :  { %v164_v28 = vpop.f32.mrb[1].mxu0  ;;  %v190_v31 = vadd.f32 %v300_v27, %v245_v26 }
 0x143   :  { %v189_v30 = vadd.f32 %v245_v26, %v164_v28 }
 0x144   :  { %v194_v34 = vadd.f32 %v192_v33, %v190_v31 }
 0x145   :  { %v193_v32 = vadd.f32 %v191_v29, %v189_v30 }
 0x147   :  { %195 = vadd.xlane.f32.xlu0 %v193_v32 }
 0x14b   :  { %197 = vadd.xlane.f32.xlu0 %v194_v34 }
 0x1d4   :  { %v196_v35 = vpop.xlane.xlu0 %195 }
 0x1d5   :  { %v200_v36 = vmul.f32 0.0078125, %v196_v35 }
 0x1d7   :  { %v202_v37 = vsub.f32 %v193_v32, %v200_v36 }
 0x1d8   :  { %v198_v38 = vpop.xlane.xlu0 %197 }
 0x1d9   :  { %v201_v39 = vmul.f32 0.0078125, %v198_v38  ;;  %v204_v40 = vmul.f32 %v202_v37, %v202_v37 }
 0x1db   :  { %v203_v41 = vsub.f32 %v194_v34, %v201_v39  ;;  %206 = vadd.xlane.f32.xlu1 %v204_v40 }
 0x1dd   :  { %v205_v42 = vmul.f32 %v203_v41, %v203_v41 }
 0x1df   :  { %208 = vadd.xlane.f32.xlu1 %v205_v42 }
 0x268   :  { %v207_v43 = vpop.xlane.xlu1 %206 }
 0x269   :  { %v210_v44 = vmul.f32 0.0078125, %v207_v43 }
 0x26b   :  { %v212_v45 = vadd.f32 1e-05, %v210_v44 }
 0x26c   :  { %v209_v46 = vpop.xlane.xlu1 %208 }
 0x26d   :  { %339 = vrsqrt.f32 %v212_v45  ;;  %v211_v47 = vmul.f32 0.0078125, %v209_v46 }
 0x26f   :  { %v213_v48 = vadd.f32 1e-05, %v211_v47 }
 0x271   :  { %341 = vrsqrt.f32 %v213_v48 }
 0x277   :  { %v340_v49 = vpop.eup %339 }
 0x278   :  { %v216_v51 = vmul.f32 %v340_v49, %v202_v37 }
 0x27a   :  { %v225_v53 = vmul.f32 %v246_v50, %v216_v51 }
 0x27b   :  { %v342_v54 = vpop.eup %341 }
 0x27c   :  { %v234_v55 = vadd.f32 %v247_v52, %v225_v53  ;;  %v217_v56 = vmul.f32 %v342_v54, %v203_v41 }
 0x27e   :  { %236 = vst [vmem:[%s557_s6] sm:$0xff] %v234_v55  ;;  %v226_v57 = vmul.f32 %v246_v50, %v217_v56 }
 0x280   :  { %v235_v58 = vadd.f32 %v247_v52, %v226_v57 }
 0x282   :  { %237 = vst [vmem:[%s557_s6 + $0x8] sm:$0xff] %v235_v58 }
 0x283   :  { %242 = vsyncpa [#allocation4], 1 }
 0x284   :  { %243 = vsyncpa [#allocation6], 1 }
 0x285   :  { %244 = vsyncpa [#allocation9], 1 }

// kernel: transformer_forward.30
= control target key start
LH: loop header
LB: loop body
LE: loop exit
PB: predicated region body
PF: predicated region fallthrough
CT: control target
= control target key end

     0   :  { %v404_v3 = vmov 0.0   ;;  %s598_s1 = inlined_call_operand.vmem [shape: f32[128,384], index: 1, kind: input, shape index: {}]   ;;  %s599_s0 = inlined_call_operand.vmem [shape: f32[16,128], index: 0, kind: input, shape index: {}]   ;;  %s600_s2 = inlined_call_operand.vmem [shape: f32[1,384], index: 2, kind: input, shape index: {}]   ;;  %s601_s3 = inlined_call_operand.vmem [shape: f32[16,384], index: 3, kind: output, shape index: {}]  }
   0x1   :  { %v33_v0 = vld [vmem:[%s598_s1 + $0x8] sm:$0xff]  ;;  %v36_v1 = vld [vmem:[%s598_s1 + $0x20] sm:$0xff]  ;;  %144 = vmatprep.mubr.f32.mxu0 %v404_v3  ;;  %v35_v5 = vld [vmem:[%s598_s1 + $0x18] sm:$0xff] }
   0x2   :  { %v32_v2 = vld [vmem:[%s598_s1] sm:$0xff]  ;;  %v339_v4 = vpack.c.bf16 %v36_v1, %v33_v0  ;;  %v34_v6 = vld [vmem:[%s598_s1 + $0x10] sm:$0xff]  ;;  %v37_v7 = vld [vmem:[%s598_s1 + $0x28] sm:$0xff] }
   0x3   :  { %v341_v8 = vpack.c.bf16 %v35_v5, %v32_v2  ;;  %v371_v9 = vpack.c.bf16 %v37_v7, %v34_v6  ;;  %v39_v10 = vld [vmem:[%s598_s1 + $0x38] sm:$0xff]  ;;  %v42_v11 = vld [vmem:[%s598_s1 + $0x50] sm:$0xff]  ;;  %v41_v14 = vld [vmem:[%s598_s1 + $0x48] sm:$0xff] }
   0x4   :  { %v38_v12 = vld [vmem:[%s598_s1 + $0x30] sm:$0xff]  ;;  %340 = vmatprep.subr.bf16.mxu0 %v339_v4  ;;  %v343_v13 = vpack.c.bf16 %v42_v11, %v39_v10  ;;  %v40_v15 = vld [vmem:[%s598_s1 + $0x40] sm:$0xff]  ;;  %v43_v16 = vld [vmem:[%s598_s1 + $0x58] sm:$0xff] }
   0x5   :  { %342 = vmatpush1.bf16.msra.mxu0 %v341_v8  ;;  %372 = vmatprep.subr.bf16.mxu1 %v371_v9  ;;  %v345_v17 = vpack.c.bf16 %v41_v14, %v38_v12  ;;  %v375_v18 = vpack.c.bf16 %v43_v16, %v40_v15  ;;  %v45_v19 = vld [vmem:[%s598_s1 + $0x68] sm:$0xff]  ;;  %v48_v20 = vld [vmem:[%s598_s1 + $0x80] sm:$0xff]  ;;  %v47_v23 = vld [vmem:[%s598_s1 + $0x78] sm:$0xff]  ;;  %v255_v12 = vlaneseq }
   0x6   :  { %v44_v21 = vld [vmem:[%s598_s1 + $0x60] sm:$0xff]  ;;  %344 = vmatprep.subr.bf16.mxu0 %v343_v13  ;;  %374 = vmatpush3.bf16.msra.mxu1 %v371_v9  ;;  %v347_v22 = vpack.c.bf16 %v48_v20, %v45_v19  ;;  %v46_v24 = vld [vmem:[%s598_s1 + $0x70] sm:$0xff]  ;;  %v49_v25 = vld [vmem:[%s598_s1 + $0x88] sm:$0xff] }
   0x7   :  { %376 = vmatprep.subr.bf16.mxu1 %v375_v18  ;;  %v379_v26 = vpack.c.bf16 %v49_v25, %v46_v24  ;;  %v51_v27 = vld [vmem:[%s598_s1 + $0x98] sm:$0xff]  ;;  %v54_v28 = vld [vmem:[%s598_s1 + $0xb0] sm:$0xff]  ;;  %v52_v29 = vld [vmem:[%s598_s1 + $0xa0] sm:$0xff]  ;;  %v349_v31 = vpack.c.bf16 %v47_v23, %v44_v21  ;;  %v256_v13 = vshrl.u32 %v255_v12, 7 }
   0x8   :  { %v55_v30 = vld [vmem:[%s598_s1 + $0xb8] sm:$0xff]  ;;  %v351_v32 = vpack.c.bf16 %v54_v28, %v51_v27  ;;  %v50_v33 = vld [vmem:[%s598_s1 + $0x90] sm:$0xff]  ;;  %v53_v34 = vld [vmem:[%s598_s1 + $0xa8] sm:$0xff] }
   0x9   :  { %346 = vmatpush1.bf16.msra.mxu0 %v345_v17  ;;  %v383_v35 = vpack.c.bf16 %v55_v30, %v52_v29  ;;  %v57_v36 = vld [vmem:[%s598_s1 + $0xc8] sm:$0xff]  ;;  %v60_v37 = vld [vmem:[%s598_s1 + $0xe0] sm:$0xff]  ;;  %v58_v38 = vld [vmem:[%s598_s1 + $0xd0] sm:$0xff]  ;;  %v353_v40 = vpack.c.bf16 %v53_v34, %v50_v33  ;;  %v257_v14 = vsub.s32 0, %v256_v13  ;;  %v261_v16 = vsub.s32 1, %v256_v13 }
   0xa   :  { %348 = vmatprep.subr.bf16.mxu0 %v347_v22  ;;  %378 = vmatpush3.bf16.msra.mxu1 %v375_v18  ;;  %v61_v39 = vld [vmem:[%s598_s1 + $0xe8] sm:$0xff]  ;;  %v355_v41 = vpack.c.bf16 %v60_v37, %v57_v36  ;;  %v56_v42 = vld [vmem:[%s598_s1 + $0xc0] sm:$0xff]  ;;  %v59_v43 = vld [vmem:[%s598_s1 + $0xd8] sm:$0xff]  ;;  %v265_v17 = vsub.s32 2, %v256_v13 }
   0xb   :  { %380 = vmatprep.subr.bf16.mxu1 %v379_v26  ;;  %v387_v44 = vpack.c.bf16 %v61_v39, %v58_v38  ;;  %v63_v45 = vld [vmem:[%s598_s1 + $0xf8] sm:$0xff]  ;;  %v66_v46 = vld [vmem:[%s598_s1 + $0x110] sm:$0xff]  ;;  %v64_v47 = vld [vmem:[%s598_s1 + $0x100] sm:$0xff]  ;;  %v357_v49 = vpack.c.bf16 %v59_v43, %v56_v42 }
   0xc   :  { %v67_v48 = vld [vmem:[%s598_s1 + $0x118] sm:$0xff]  ;;  %v359_v50 = vpack.c.bf16 %v66_v46, %v63_v45  ;;  %v62_v51 = vld [vmem:[%s598_s1 + $0xf0] sm:$0xff]  ;;  %v65_v52 = vld [vmem:[%s598_s1 + $0x108] sm:$0xff] }
   0xd   :  { %350 = vmatpush1.bf16.msra.mxu0 %v349_v31  ;;  %v30_v53 = vld [vmem:[%s599_s0] sm:$0xff]  ;;  %v391_v54 = vpack.c.bf16 %v67_v48, %v64_v47  ;;  %v69_v55 = vld [vmem:[%s598_s1 + $0x128] sm:$0xff]  ;;  %v70_v57 = vld [vmem:[%s598_s1 + $0x130] sm:$0xff]  ;;  %v361_v59 = vpack.c.bf16 %v65_v52, %v62_v51 }
   0xe   :  { %352 = vmatprep.subr.bf16.mxu0 %v351_v32  ;;  %382 = vmatpush3.bf16.msra.mxu1 %v379_v26  ;;  %v72_v56 = vld [vmem:[%s598_s1 + $0x140] sm:$0xff]  ;;  %v73_v58 = vld [vmem:[%s598_s1 + $0x148] sm:$0xff]  ;;  %v71_v62 = vld [vmem:[%s598_s1 + $0x138] sm:$0xff] }
   0xf   :  { %384 = vmatprep.subr.bf16.mxu1 %v383_v35  ;;  %336 = vmatprep.mubr.f32.mxu1 %v30_v53  ;;  %v363_v60 = vpack.c.bf16 %v72_v56, %v69_v55  ;;  %v68_v61 = vld [vmem:[%s598_s1 + $0x120] sm:$0xff]  ;;  %v395_v63 = vpack.c.bf16 %v73_v58, %v70_v57  ;;  %v75_v0 = vld [vmem:[%s598_s1 + $0x158] sm:$0xff]  ;;  %v78_v1 = vld [vmem:[%s598_s1 + $0x170] sm:$0xff] }
  0x10   :  { %v76_v2 = vld [vmem:[%s598_s1 + $0x160] sm:$0xff]  ;;  %v79_v4 = vld [vmem:[%s598_s1 + $0x178] sm:$0xff]  ;;  %v365_v5 = vpack.c.bf16 %v71_v62, %v68_v61  ;;  %v367_v6 = vpack.c.bf16 %v78_v1, %v75_v0  ;;  %v74_v7 = vld [vmem:[%s598_s1 + $0x150] sm:$0xff] }
  0x11   :  { %354 = vmatpush1.bf16.msra.mxu0 %v353_v40  ;;  %v77_v8 = vld [vmem:[%s598_s1 + $0x168] sm:$0xff]  ;;  %v399_v9 = vpack.c.bf16 %v79_v4, %v76_v2  ;;  %v253_v15 = vld [vmem:[%s600_s2] sm:$0x7] }
  0x12   :  { %356 = vmatprep.subr.bf16.mxu0 %v355_v41  ;;  %386 = vmatpush3.bf16.msra.mxu1 %v383_v35  ;;  %v369_v10 = vpack.c.bf16 %v77_v8, %v74_v7  ;;  %v31_v11 = vld [vmem:[%s599_s0 + $0x8] sm:$0xff]  ;;  %v258_v18 = vrot.slane %v253_v15, %v257_v14  ;;  %v262_v19 = vrot.slane %v253_v15, %v261_v16 }
  0x13   :  { %388 = vmatprep.subr.bf16.mxu1 %v387_v44  ;;  %v266_v20 = vrot.slane %v253_v15, %v265_v17 }
  0x15   :  { %358 = vmatpush1.bf16.msra.mxu0 %v357_v49 }
  0x16   :  { %360 = vmatprep.subr.bf16.mxu0 %v359_v50  ;;  %390 = vmatpush3.bf16.msra.mxu1 %v387_v44 }
  0x17   :  { %392 = vmatprep.subr.bf16.mxu1 %v391_v54 }
  0x19   :  { %362 = vmatpush1.bf16.msra.mxu0 %v361_v59 }
  0x1a   :  { %364 = vmatprep.subr.bf16.mxu0 %v363_v60  ;;  %394 = vmatpush3.bf16.msra.mxu1 %v391_v54 }
  0x1b   :  { %396 = vmatprep.subr.bf16.mxu1 %v395_v63 }
  0x1d   :  { %366 = vmatpush1.bf16.msra.mxu0 %v365_v5 }
  0x1e   :  { %368 = vmatprep.subr.bf16.mxu0 %v367_v6  ;;  %398 = vmatpush3.bf16.msra.mxu1 %v395_v63 }
  0x1f   :  { %400 = vmatprep.subr.bf16.mxu1 %v399_v9 }
  0x21   :  { %370 = vmatpush1.bf16.msra.mxu0 %v369_v10 }
  0x22   :  { %402 = vmatpush3.bf16.msra.mxu1 %v399_v9 }
  0x24   :  { %145 = vmatmul.mubr.f32.vlgmr.msra.gmra.mrb[0].mxu0 %v30_v53 }
  0x25   :  { %150 = vmatprep.mubr.f32.mxu0 %v404_v3  ;;  %337 = vmatmul.mubr.f32.vlgmr.msra.gmra.mrb[0].mxu1 %v31_v11 }
  0x28   :  { %151 = vmatmul.mubr.f32.gmra.mrb[2].mxu0 %v31_v11 }
  0xf7   :  { %v146_v21 = vpop.f32.mrb[0].mxu0 }
  0xf8   :  { %v270_v22 = vadd.f32 %v258_v18, %v146_v21  ;;  %v148_v23 = vpop.f32.mrb[1].mxu0  ;;  %v338_v24 = vpop.f32.mrb[0].mxu1 }
  0xf9   :  { %v271_v25 = vadd.f32 %v262_v19, %v148_v23  ;;  %v275_v3 = vadd.f32 %v338_v24, %v266_v20  ;;  %v223_v26 = vpop.f32.mrb[1].mxu1 }
  0xfa   :  { %276 = vst [vmem:[%s601_s3] sm:$0xff] %v270_v22  ;;  %v272_v27 = vadd.f32 %v266_v20, %v223_v26 }
  0xfb   :  { %277 = vst [vmem:[%s601_s3 + $0x8] sm:$0xff] %v271_v25  ;;  %281 = vst [vmem:[%s601_s3 + $0x28] sm:$0xff] %v275_v3  ;;  %v152_v28 = vpop.f32.mrb[2].mxu0 }
  0xfc   :  { %v273_v29 = vadd.f32 %v258_v18, %v152_v28  ;;  %278 = vst [vmem:[%s601_s3 + $0x10] sm:$0xff] %v272_v27  ;;  %v154_v30 = vpop.f32.mrb[3].mxu0 }
  0xfd   :  { %v274_v31 = vadd.f32 %v262_v19, %v154_v30 }
  0xfe   :  { %279 = vst [vmem:[%s601_s3 + $0x18] sm:$0xff] %v273_v29 }
  0xff   :  { %280 = vst [vmem:[%s601_s3 + $0x20] sm:$0xff] %v274_v31 }

// kernel: transformer_forward.32
= control target key start
LH: loop header
LB: loop body
LE: loop exit
PB: predicated region body
PF: predicated region fallthrough
CT: control target
= control target key end

     0   :  { %s395_s1 = inlined_call_operand.vmem [shape: f32[128,128], index: 1, kind: input, shape index: {}]   ;;  %s396_s0 = inlined_call_operand.vmem [shape: f32[16,128], index: 0, kind: input, shape index: {}]   ;;  %s397_s2 = inlined_call_operand.vmem [shape: f32[1,128], index: 2, kind: input, shape index: {}]   ;;  %s398_s3 = inlined_call_operand.vmem [shape: f32[16,128], index: 3, kind: input, shape index: {}]   ;;  %s399_s4 = inlined_call_operand.vmem [shape: f32[1,128], index: 4, kind: input, shape index: {}]   ;;  %s400_s5 = inlined_call_operand.vmem [shape: f32[1,128], index: 5, kind: input, shape index: {}]   ;;  %s401_s6 = inlined_call_operand.vmem [shape: f32[16,128], index: 6, kind: output, shape index: {}]  }
   0x1   :  { %v33_v0 = vld [vmem:[%s395_s1] sm:$0xff]  ;;  %v34_v1 = vld [vmem:[%s395_s1 + $0x8] sm:$0xff]  ;;  %v35_v2 = vld [vmem:[%s395_s1 + $0x10] sm:$0xff] }
   0x2   :  { %v249_v3 = vpack.c.bf16 %v34_v1, %v33_v0  ;;  %v36_v4 = vld [vmem:[%s395_s1 + $0x18] sm:$0xff]  ;;  %v37_v6 = vld [vmem:[%s395_s1 + $0x20] sm:$0xff]  ;;  %v38_v7 = vld [vmem:[%s395_s1 + $0x28] sm:$0xff] }
   0x3   :  { %v253_v5 = vpack.c.bf16 %v36_v4, %v35_v2  ;;  %v257_v8 = vpack.c.bf16 %v38_v7, %v37_v6  ;;  %v31_v9 = vld [vmem:[%s396_s0] sm:$0xff]  ;;  %v39_v10 = vld [vmem:[%s395_s1 + $0x30] sm:$0xff]  ;;  %v40_v11 = vld [vmem:[%s395_s1 + $0x38] sm:$0xff] }
   0x4   :  { %250 = vmatprep.subr.bf16.mxu0 %v249_v3  ;;  %246 = vmatprep.mubr.f32.mxu0 %v31_v9  ;;  %v261_v12 = vpack.c.bf16 %v40_v11, %v39_v10  ;;  %v41_v13 = vld [vmem:[%s395_s1 + $0x40] sm:$0xff]  ;;  %v42_v14 = vld [vmem:[%s395_s1 + $0x48] sm:$0xff]  ;;  %v43_v16 = vld [vmem:[%s395_s1 + $0x50] sm:$0xff] }
   0x5   :  { %252 = vmatpush3.bf16.msra.mxu0 %v249_v3  ;;  %v265_v15 = vpack.c.bf16 %v42_v14, %v41_v13  ;;  %v44_v17 = vld [vmem:[%s395_s1 + $0x58] sm:$0xff]  ;;  %v45_v19 = vld [vmem:[%s395_s1 + $0x60] sm:$0xff]  ;;  %v46_v20 = vld [vmem:[%s395_s1 + $0x68] sm:$0xff] }
   0x6   :  { %254 = vmatprep.subr.bf16.mxu0 %v253_v5  ;;  %v269_v18 = vpack.c.bf16 %v44_v17, %v43_v16  ;;  %v273_v21 = vpack.c.bf16 %v46_v20, %v45_v19  ;;  %v47_v22 = vld [vmem:[%s395_s1 + $0x70] sm:$0xff]  ;;  %v48_v23 = vld [vmem:[%s395_s1 + $0x78] sm:$0xff]  ;;  %v32_v25 = vld [vmem:[%s396_s0 + $0x8] sm:$0xff] }
   0x7   :  { %v277_v24 = vpack.c.bf16 %v48_v23, %v47_v22  ;;  %v193_v26 = vld [vmem:[%s397_s2] ss:$0 sm:$0xff]  ;;  %v143_v33 = vld [vmem:[%s398_s3 + $0x8] sm:$0xff] }
   0x8   :  { %v142_v29 = vld [vmem:[%s398_s3] sm:$0xff] }
   0x9   :  { %256 = vmatpush3.bf16.msra.mxu0 %v253_v5  ;;  %v194_v50 = vld [vmem:[%s399_s4] ss:$0 sm:$0xff] }
   0xa   :  { %258 = vmatprep.subr.bf16.mxu0 %v257_v8  ;;  %v195_v52 = vld [vmem:[%s400_s5] ss:$0 sm:$0xff] }
   0xd   :  { %260 = vmatpush3.bf16.msra.mxu0 %v257_v8 }
   0xe   :  { %262 = vmatprep.subr.bf16.mxu0 %v261_v12 }
  0x11   :  { %264 = vmatpush3.bf16.msra.mxu0 %v261_v12 }
  0x12   :  { %266 = vmatprep.subr.bf16.mxu0 %v265_v15 }
  0x15   :  { %268 = vmatpush3.bf16.msra.mxu0 %v265_v15 }
  0x16   :  { %270 = vmatprep.subr.bf16.mxu0 %v269_v18 }
  0x19   :  { %272 = vmatpush3.bf16.msra.mxu0 %v269_v18 }
  0x1a   :  { %274 = vmatprep.subr.bf16.mxu0 %v273_v21 }
  0x1d   :  { %276 = vmatpush3.bf16.msra.mxu0 %v273_v21 }
  0x1e   :  { %278 = vmatprep.subr.bf16.mxu0 %v277_v24 }
  0x21   :  { %280 = vmatpush3.bf16.msra.mxu0 %v277_v24 }
  0x24   :  { %247 = vmatmul.mubr.f32.vlgmr.msra.gmra.mrb[0].mxu0 %v32_v25 }
  0xf7   :  { %v248_v27 = vpop.f32.mrb[0].mxu0 }
  0xf8   :  { %v115_v28 = vpop.f32.mrb[1].mxu0  ;;  %v141_v31 = vadd.f32 %v248_v27, %v193_v26 }
  0xf9   :  { %v140_v30 = vadd.f32 %v193_v26, %v115_v28 }
  0xfa   :  { %v145_v34 = vadd.f32 %v143_v33, %v141_v31 }
  0xfb   :  { %v144_v32 = vadd.f32 %v142_v29, %v140_v30 }
  0xfd   :  { %146 = vadd.xlane.f32.xlu0 %v144_v32 }
 0x101   :  { %148 = vadd.xlane.f32.xlu0 %v145_v34 }
 0x18a   :  { %v147_v35 = vpop.xlane.xlu0 %146 }
 0x18b   :  { %v151_v36 = vmul.f32 0.0078125, %v147_v35 }
 0x18d   :  { %v153_v37 = vsub.f32 %v144_v32, %v151_v36 }
 0x18e   :  { %v149_v38 = vpop.xlane.xlu0 %148 }
 0x18f   :  { %v152_v39 = vmul.f32 0.0078125, %v149_v38  ;;  %v155_v40 = vmul.f32 %v153_v37, %v153_v37 }
 0x191   :  { %v154_v41 = vsub.f32 %v145_v34, %v152_v39  ;;  %157 = vadd.xlane.f32.xlu1 %v155_v40 }
 0x193   :  { %v156_v42 = vmul.f32 %v154_v41, %v154_v41 }
 0x195   :  { %159 = vadd.xlane.f32.xlu1 %v156_v42 }
 0x21e   :  { %v158_v43 = vpop.xlane.xlu1 %157 }
 0x21f   :  { %v161_v44 = vmul.f32 0.0078125, %v158_v43 }
 0x221   :  { %v163_v45 = vadd.f32 1e-05, %v161_v44 }
 0x222   :  { %v160_v46 = vpop.xlane.xlu1 %159 }
 0x223   :  { %281 = vrsqrt.f32 %v163_v45  ;;  %v162_v47 = vmul.f32 0.0078125, %v160_v46 }
 0x225   :  { %v164_v48 = vadd.f32 1e-05, %v162_v47 }
 0x227   :  { %283 = vrsqrt.f32 %v164_v48 }
 0x22d   :  { %v282_v49 = vpop.eup %281 }
 0x22e   :  { %v167_v51 = vmul.f32 %v282_v49, %v153_v37 }
 0x230   :  { %v176_v53 = vmul.f32 %v194_v50, %v167_v51 }
 0x231   :  { %v284_v54 = vpop.eup %283 }
 0x232   :  { %v185_v55 = vadd.f32 %v195_v52, %v176_v53  ;;  %v168_v56 = vmul.f32 %v284_v54, %v154_v41 }
 0x234   :  { %187 = vst [vmem:[%s401_s6] sm:$0xff] %v185_v55  ;;  %v177_v57 = vmul.f32 %v194_v50, %v168_v56 }
 0x236   :  { %v186_v58 = vadd.f32 %v195_v52, %v177_v57 }
 0x238   :  { %188 = vst [vmem:[%s401_s6 + $0x8] sm:$0xff] %v186_v58 }

// kernel: transformer_forward.29
= control target key start
LH: loop header
LB: loop body
LE: loop exit
PB: predicated region body
PF: predicated region fallthrough
CT: control target
= control target key end

     0   :  { %12 = vsyncpa [#allocation5], 0  ;;  %s2117_s0 = inlined_call_operand.vmem [shape: f32[16,128], index: 0, kind: input, shape index: {}]   ;;  %s2118_s1 = inlined_call_operand.vmem [shape: f32[128,2048], index: 1, kind: input, shape index: {}]   ;;  %s2119_s2 = inlined_call_operand.vmem [shape: f32[1,2048], index: 2, kind: input, shape index: {}]   ;;  %s2120_s3 = inlined_call_operand.hbm [shape: f32[2048,128], index: 3, kind: input, shape index: {}]   ;;  %s2121_s4 = inlined_call_operand.vmem [shape: f32[1,128], index: 4, kind: input, shape index: {}]   ;;  %s2122_s5 = inlined_call_operand.vmem [shape: f32[1,128], index: 5, kind: input, shape index: {}]   ;;  %s2123_s6 = inlined_call_operand.hbm [shape: f32[1,128], index: 6, kind: input, shape index: {}]   ;;  %s2124_s7 = inlined_call_operand.vmem [shape: f32[16,128], index: 7, kind: output, shape index: {}]  }
   0x1   :  { %14 = vsyncpa [#allocation5 + $0x1], 0 }
   0x2   :  { %15 = vsyncpa [#allocation7], 0  ;;  %s1655_s24 = smov 0   ;;  %s1657_s25 = smov 0  }
   0x3   :  { %s1659_s26 = smov 0   ;;  %s1661_s27 = smov 0  }
   0x4   :  { %s1663_s28 = smov 0   ;;  %s1665_s29 = smov 0  }
   0x5 LB: > { %s1197_s30 = sadd.s32 4294967295, %s1607_s29   ;;  %s30_s8 = sadd.s32 1, %s1603_s28  ;;  %s1607_s29 = sphi %s1665_s29, %s21_s29   ;;  %s1603_s28 = sphi %s1663_s28, %s2144_s28   ;;  %s1599_s27 = sphi %s1661_s27, %s2143_s27   ;;  %s1595_s26 = sphi %s1659_s26, %s2142_s26   ;;  %s1591_s25 = sphi %s1657_s25, %s2141_s25   ;;  %s1587_s24 = sphi %s1655_s24, %s2140_s24  }
   0x6   : > { %p31_p0 = scmp.ge.s32.totalorder %s30_s8, 4  ;;  %s66_s9 = sadd.s32 1, %s1595_s26 }
   0x7   : > { %p73_p1 = scmp.ne.s32.totalorder %s1595_s26, %s1591_s25  ;;  %p74_p2 = scmp.eq.s32.totalorder %s1607_s29, 0 }
   0x8   : > { %s2146_s8 = smov (%p31_p0, %s30_s8), 0  ;;  %p131_p4 = scmp.ne.s32.totalorder %s1591_s25, %s1587_s24 }
   0x9   : > { %p1691_p3 = por %p74_p2, %p73_p1  ;;  %s63_s11 = ssub.s32 %s1603_s28, %s2146_s8 }
   0xa   : > { %p1698_p5 = scmp.eq.s32.totalorder %s1197_s30, 0  ;;  %p64_p6 = scmp.eq.s32.totalorder %s63_s11, 0 }
   0xb   : > { %s2130_s10 = scalar_select %p1691_p3, 1, 0 }
   0xc   : > { %s2131_s12 = scalar_select %p1698_p5, 1, 0 }
   0xd   : > { %p1198_p7 = scmp.ge.s32.totalorder %s1607_s29, 1  ;;  %p1705_p8 = por %p1698_p5, %p131_p4 }
   0xe   : > { %p231_p9 = scmp.lt.s32.totalorder %s1607_s29, 5  ;;  %s1609_s16 = smov [#allocation6]  }
   0xf   : > { %s2132_s13 = scalar_select %p1705_p8, 1, 0 }
  0x10   : > { %s1711_s14 = scalar_select %p64_p6, %s1595_s26, %s66_s9  }
  0x11   : > { %p1713_p10 = pnand %p1198_p7, %p231_p9  ;;  %s259_s17 = sshll.u32 %s1609_s16, 4  ;;  %s260_s17 = int_to_ptr.vmem [resolvable:$true] %s259_s17 }
  0x12   : > { %s1497_s21 = scalar_lea.hbm %s2123_s6, 16 }
  0x13   : > { %s2133_s15 = scalar_select %p1713_p10, 1, 0 }
  0x14   : > { %p1434_p11 = pneg %p1713_p10  ;;  %p1498_p13 = scmp.ne.s32.totalorder %s2123_s6, %s1497_s21 }
  0x15   : > { %p1504_p4 = scmp.lt.u32.totalorder %s1497_s21, %s2123_s6 }
  0x16   : > { %p1721_p12 = pnand %p1434_p11, %p1698_p5 }
  0x18   : > { %p1499_p0 = pneg %p1721_p12 }
  0x1a   : > { %p1500_p1 = pnand %p1499_p0, %p1498_p13 }
  0x1c   : > { %p1501_p2 = pneg %p1500_p1 }
  0x1e   : > { %p1506_p6 = pnand %p1504_p4, %p1501_p2 }
  0x20   : > { %1509 = shalt.err (!%p1506_p6)
}
  0x21   : > { %s1510_s9 = scalar_lea.vmem %s260_s17, 16  ;;  %s1517_s11 = scalar_lea.vmem %s260_s17, 32 }
  0x22   : > { %p1511_p7 = scmp.ne.s32.totalorder %s260_s17, %s1510_s9  ;;  %p1518_p5 = scmp.lt.s32.totalorder %s260_s17, %s260_s17 }
  0x23   : > { %p1519_p8 = scmp.lt.s32.totalorder %s1517_s11, %s1510_s9 }
  0x24   : > { %p1513_p9 = pnand %p1511_p7, %p1499_p0 }
  0x25   : > { %p1520_p10 = por %p1519_p8, %p1518_p5 }
  0x26   : > { %p1514_p11 = pneg %p1513_p9 }
  0x28   : > { %p1521_p3 = pnand %p1520_p10, %p1514_p11 }
  0x2a   : > { %1524 = shalt.err (!%p1521_p3)
}
  0x2b   : > { %1437 = dma.hbm_to_vmem [thread:$0]  (!%p1721_p12), %s2123_s6, 16, %s260_s17, [#allocation7]  }
  0x2c   : > { %p1201_p13 = scmp.ge.s32.totalorder %s1607_s29, 4 }
  0x2d   : > { %p2135_p1 = scmp.ne.s32.totalorder (!%p1201_p13), %s2130_s10, 0 }
  0x2e   : > { %266 = sbr.rel (%p1201_p13) target bundleno = 116 (0x74), region = 32 }
  0x35   : > { %269 = sbr.rel (!%p2135_p1) target bundleno = 89 (0x59), region = 36  ;;  %s271_s20 = sand.u32 (%p2135_p1), 1, %s1595_s26  }
  0x36   : > { %s1222_s21 = sshll.u32 (%p2135_p1), %s1603_s28, 5  ;;  %s1202_s22 = sshll.u32 (%p2135_p1), %s271_s20, 9 }
  0x37   : > { %s1749_s30 = scalar_lea.vmem (%p2135_p1), %s2118_s1, %s1222_s21  ;;  %s1754_s17 = scalar_lea.vmem (%p2135_p1), [#allocation3], %s1202_s22 }
  0x38   : > { %v289_v0 = vld [vmem:[%s1749_s30] sm:$0xff] (%p2135_p1)  ;;  %v291_v1 = vld [vmem:[%s1749_s30 + $0x8] sm:$0xff] (%p2135_p1)  ;;  %v293_v2 = vld [vmem:[%s1749_s30 + $0x10] sm:$0xff] (%p2135_p1) }
  0x39   : > { %290 = vst [vmem:[%s1754_s17] sm:$0xff] (%p2135_p1), %v289_v0  ;;  %292 = vst [vmem:[%s1754_s17 + $0x8] sm:$0xff] (%p2135_p1), %v291_v1  ;;  %v295_v3 = vld [vmem:[%s1749_s30 + $0x18] sm:$0xff] (%p2135_p1)  ;;  %v297_v4 = vld [vmem:[%s1749_s30 + $0x80] sm:$0xff] (%p2135_p1) }
  0x3a   : > { %294 = vst [vmem:[%s1754_s17 + $0x10] sm:$0xff] (%p2135_p1), %v293_v2  ;;  %v299_v5 = vld [vmem:[%s1749_s30 + $0x88] sm:$0xff] (%p2135_p1)  ;;  %296 = vst [vmem:[%s1754_s17 + $0x18] sm:$0xff] (%p2135_p1), %v295_v3  ;;  %v301_v6 = vld [vmem:[%s1749_s30 + $0x90] sm:$0xff] (%p2135_p1) }
  0x3b   : > { %298 = vst [vmem:[%s1754_s17 + $0x20] sm:$0xff] (%p2135_p1), %v297_v4  ;;  %300 = vst [vmem:[%s1754_s17 + $0x28] sm:$0xff] (%p2135_p1), %v299_v5  ;;  %v303_v7 = vld [vmem:[%s1749_s30 + $0x98] sm:$0xff] (%p2135_p1)  ;;  %v305_v8 = vld [vmem:[%s1749_s30 + $0x100] sm:$0xff] (%p2135_p1) }
  0x3c   : > { %302 = vst [vmem:[%s1754_s17 + $0x30] sm:$0xff] %v301_v6  ;;  %304 = vst [vmem:[%s1754_s17 + $0x38] sm:$0xff] %v303_v7  ;;  %v307_v9 = vld [vmem:[%s1749_s30 + $0x108] sm:$0xff]  ;;  %v309_v10 = vld [vmem:[%s1749_s30 + $0x110] sm:$0xff] }
  0x3d   : > { %306 = vst [vmem:[%s1754_s17 + $0x40] sm:$0xff] %v305_v8  ;;  %v311_v11 = vld [vmem:[%s1749_s30 + $0x118] sm:$0xff]  ;;  %308 = vst [vmem:[%s1754_s17 + $0x48] sm:$0xff] %v307_v9  ;;  %v313_v12 = vld [vmem:[%s1749_s30 + $0x180] sm:$0xff] }
  0x3e   : > { %310 = vst [vmem:[%s1754_s17 + $0x50] sm:$0xff] %v309_v10  ;;  %312 = vst [vmem:[%s1754_s17 + $0x58] sm:$0xff] %v311_v11  ;;  %v315_v13 = vld [vmem:[%s1749_s30 + $0x188] sm:$0xff]  ;;  %v317_v14 = vld [vmem:[%s1749_s30 + $0x190] sm:$0xff] }
  0x3f   : > { %314 = vst [vmem:[%s1754_s17 + $0x60] sm:$0xff] %v313_v12  ;;  %316 = vst [vmem:[%s1754_s17 + $0x68] sm:$0xff] %v315_v13  ;;  %v319_v15 = vld [vmem:[%s1749_s30 + $0x198] sm:$0xff]  ;;  %v321_v16 = vld [vmem:[%s1749_s30 + $0x200] sm:$0xff] }
  0x40   : > { %318 = vst [vmem:[%s1754_s17 + $0x70] sm:$0xff] %v317_v14  ;;  %v323_v17 = vld [vmem:[%s1749_s30 + $0x208] sm:$0xff]  ;;  %320 = vst [vmem:[%s1754_s17 + $0x78] sm:$0xff] %v319_v15  ;;  %v325_v18 = vld [vmem:[%s1749_s30 + $0x210] sm:$0xff] }
  0x41   : > { %322 = vst [vmem:[%s1754_s17 + $0x80] sm:$0xff] %v321_v16  ;;  %324 = vst [vmem:[%s1754_s17 + $0x88] sm:$0xff] %v323_v17  ;;  %v327_v19 = vld [vmem:[%s1749_s30 + $0x218] sm:$0xff]  ;;  %v329_v20 = vld [vmem:[%s1749_s30 + $0x280] sm:$0xff] }
  0x42   : > { %326 = vst [vmem:[%s1754_s17 + $0x90] sm:$0xff] %v325_v18  ;;  %328 = vst [vmem:[%s1754_s17 + $0x98] sm:$0xff] %v327_v19  ;;  %v331_v21 = vld [vmem:[%s1749_s30 + $0x288] sm:$0xff]  ;;  %v333_v22 = vld [vmem:[%s1749_s30 + $0x290] sm:$0xff] }
  0x43   : > { %330 = vst [vmem:[%s1754_s17 + $0xa0] sm:$0xff] %v329_v20  ;;  %v335_v23 = vld [vmem:[%s1749_s30 + $0x298] sm:$0xff]  ;;  %332 = vst [vmem:[%s1754_s17 + $0xa8] sm:$0xff] %v331_v21  ;;  %v337_v24 = vld [vmem:[%s1749_s30 + $0x300] sm:$0xff] }
  0x44   : > { %334 = vst [vmem:[%s1754_s17 + $0xb0] sm:$0xff] %v333_v22  ;;  %336 = vst [vmem:[%s1754_s17 + $0xb8] sm:$0xff] %v335_v23  ;;  %v339_v25 = vld [vmem:[%s1749_s30 + $0x308] sm:$0xff]  ;;  %v341_v26 = vld [vmem:[%s1749_s30 + $0x310] sm:$0xff] }
  0x45   : > { %338 = vst [vmem:[%s1754_s17 + $0xc0] sm:$0xff] %v337_v24  ;;  %340 = vst [vmem:[%s1754_s17 + $0xc8] sm:$0xff] %v339_v25  ;;  %v343_v27 = vld [vmem:[%s1749_s30 + $0x318] sm:$0xff]  ;;  %v345_v28 = vld [vmem:[%s1749_s30 + $0x380] sm:$0xff] }
  0x46   : > { %342 = vst [vmem:[%s1754_s17 + $0xd0] sm:$0xff] %v341_v26  ;;  %v347_v29 = vld [vmem:[%s1749_s30 + $0x388] sm:$0xff]  ;;  %344 = vst [vmem:[%s1754_s17 + $0xd8] sm:$0xff] %v343_v27  ;;  %v349_v30 = vld [vmem:[%s1749_s30 + $0x390] sm:$0xff] }
  0x47   : > { %346 = vst [vmem:[%s1754_s17 + $0xe0] sm:$0xff] %v345_v28  ;;  %348 = vst [vmem:[%s1754_s17 + $0xe8] sm:$0xff] %v347_v29  ;;  %v351_v31 = vld [vmem:[%s1749_s30 + $0x398] sm:$0xff]  ;;  %v353_v32 = vld [vmem:[%s1749_s30 + $0x400] sm:$0xff] }
  0x48   : > { %350 = vst [vmem:[%s1754_s17 + $0xf0] sm:$0xff] %v349_v30  ;;  %352 = vst [vmem:[%s1754_s17 + $0xf8] sm:$0xff] %v351_v31  ;;  %v355_v33 = vld [vmem:[%s1749_s30 + $0x408] sm:$0xff]  ;;  %v357_v34 = vld [vmem:[%s1749_s30 + $0x410] sm:$0xff] }
  0x49   : > { %354 = vst [vmem:[%s1754_s17 + $0x100] sm:$0xff] %v353_v32  ;;  %v359_v35 = vld [vmem:[%s1749_s30 + $0x418] sm:$0xff]  ;;  %356 = vst [vmem:[%s1754_s17 + $0x108] sm:$0xff] %v355_v33  ;;  %v361_v36 = vld [vmem:[%s1749_s30 + $0x480] sm:$0xff] }
  0x4a   : > { %358 = vst [vmem:[%s1754_s17 + $0x110] sm:$0xff] %v357_v34  ;;  %360 = vst [vmem:[%s1754_s17 + $0x118] sm:$0xff] %v359_v35  ;;  %v363_v37 = vld [vmem:[%s1749_s30 + $0x488] sm:$0xff]  ;;  %v365_v38 = vld [vmem:[%s1749_s30 + $0x490] sm:$0xff] }
  0x4b   : > { %362 = vst [vmem:[%s1754_s17 + $0x120] sm:$0xff] %v361_v36  ;;  %364 = vst [vmem:[%s1754_s17 + $0x128] sm:$0xff] %v363_v37  ;;  %v367_v39 = vld [vmem:[%s1749_s30 + $0x498] sm:$0xff]  ;;  %v369_v40 = vld [vmem:[%s1749_s30 + $0x500] sm:$0xff] }
  0x4c   : > { %366 = vst [vmem:[%s1754_s17 + $0x130] sm:$0xff] %v365_v38  ;;  %v371_v41 = vld [vmem:[%s1749_s30 + $0x508] sm:$0xff]  ;;  %368 = vst [vmem:[%s1754_s17 + $0x138] sm:$0xff] %v367_v39  ;;  %v373_v42 = vld [vmem:[%s1749_s30 + $0x510] sm:$0xff] }
  0x4d   : > { %370 = vst [vmem:[%s1754_s17 + $0x140] sm:$0xff] %v369_v40  ;;  %372 = vst [vmem:[%s1754_s17 + $0x148] sm:$0xff] %v371_v41  ;;  %v375_v43 = vld [vmem:[%s1749_s30 + $0x518] sm:$0xff]  ;;  %v377_v44 = vld [vmem:[%s1749_s30 + $0x580] sm:$0xff] }
  0x4e   : > { %374 = vst [vmem:[%s1754_s17 + $0x150] sm:$0xff] %v373_v42  ;;  %376 = vst [vmem:[%s1754_s17 + $0x158] sm:$0xff] %v375_v43  ;;  %v379_v45 = vld [vmem:[%s1749_s30 + $0x588] sm:$0xff]  ;;  %v381_v46 = vld [vmem:[%s1749_s30 + $0x590] sm:$0xff] }
  0x4f   : > { %378 = vst [vmem:[%s1754_s17 + $0x160] sm:$0xff] %v377_v44  ;;  %v383_v47 = vld [vmem:[%s1749_s30 + $0x598] sm:$0xff]  ;;  %380 = vst [vmem:[%s1754_s17 + $0x168] sm:$0xff] %v379_v45  ;;  %v385_v48 = vld [vmem:[%s1749_s30 + $0x600] sm:$0xff] }
  0x50   : > { %382 = vst [vmem:[%s1754_s17 + $0x170] sm:$0xff] %v381_v46  ;;  %384 = vst [vmem:[%s1754_s17 + $0x178] sm:$0xff] %v383_v47  ;;  %v387_v49 = vld [vmem:[%s1749_s30 + $0x608] sm:$0xff]  ;;  %v389_v50 = vld [vmem:[%s1749_s30 + $0x610] sm:$0xff] }
  0x51   : > { %386 = vst [vmem:[%s1754_s17 + $0x180] sm:$0xff] %v385_v48  ;;  %388 = vst [vmem:[%s1754_s17 + $0x188] sm:$0xff] %v387_v49  ;;  %v391_v51 = vld [vmem:[%s1749_s30 + $0x618] sm:$0xff]  ;;  %v393_v52 = vld [vmem:[%s1749_s30 + $0x680] sm:$0xff] }
  0x52   : > { %390 = vst [vmem:[%s1754_s17 + $0x190] sm:$0xff] %v389_v50  ;;  %v395_v53 = vld [vmem:[%s1749_s30 + $0x688] sm:$0xff]  ;;  %392 = vst [vmem:[%s1754_s17 + $0x198] sm:$0xff] %v391_v51  ;;  %v397_v54 = vld [vmem:[%s1749_s30 + $0x690] sm:$0xff] }
  0x53   : > { %394 = vst [vmem:[%s1754_s17 + $0x1a0] sm:$0xff] %v393_v52  ;;  %396 = vst [vmem:[%s1754_s17 + $0x1a8] sm:$0xff] %v395_v53  ;;  %v399_v55 = vld [vmem:[%s1749_s30 + $0x698] sm:$0xff]  ;;  %v401_v56 = vld [vmem:[%s1749_s30 + $0x700] sm:$0xff] }
  0x54   : > { %398 = vst [vmem:[%s1754_s17 + $0x1b0] sm:$0xff] %v397_v54  ;;  %400 = vst [vmem:[%s1754_s17 + $0x1b8] sm:$0xff] %v399_v55  ;;  %v403_v57 = vld [vmem:[%s1749_s30 + $0x708] sm:$0xff]  ;;  %v405_v58 = vld [vmem:[%s1749_s30 + $0x710] sm:$0xff] }
  0x55   : > { %402 = vst [vmem:[%s1754_s17 + $0x1c0] sm:$0xff] %v401_v56  ;;  %v407_v59 = vld [vmem:[%s1749_s30 + $0x718] sm:$0xff]  ;;  %404 = vst [vmem:[%s1754_s17 + $0x1c8] sm:$0xff] %v403_v57  ;;  %v409_v60 = vld [vmem:[%s1749_s30 + $0x780] sm:$0xff] }
  0x56   : > { %406 = vst [vmem:[%s1754_s17 + $0x1d0] sm:$0xff] %v405_v58  ;;  %408 = vst [vmem:[%s1754_s17 + $0x1d8] sm:$0xff] %v407_v59  ;;  %v411_v61 = vld [vmem:[%s1749_s30 + $0x788] sm:$0xff]  ;;  %v413_v62 = vld [vmem:[%s1749_s30 + $0x790] sm:$0xff] }
  0x57   : > { %410 = vst [vmem:[%s1754_s17 + $0x1e0] sm:$0xff] %v409_v60  ;;  %412 = vst [vmem:[%s1754_s17 + $0x1e8] sm:$0xff] %v411_v61  ;;  %v415_v63 = vld [vmem:[%s1749_s30 + $0x798] sm:$0xff] }
  0x58   : > { %414 = vst [vmem:[%s1754_s17 + $0x1f0] sm:$0xff] %v413_v62  ;;  %416 = vst [vmem:[%s1754_s17 + $0x1f8] sm:$0xff] %v415_v63 }
  0x59 PF: > { %s431_s18 = sand.u32 1, %s1595_s26   ;;  %s1223_s9 = sshll.u32 %s1603_s28, 13 }
  0x5a   : > { %s1205_s11 = sshll.u32 %s431_s18, 9  ;;  %s1886_s20 = scalar_lea.hbm %s2120_s3, %s1223_s9 }
  0x5b   : > { %s435_s21 = scalar_lea.vmem [#allocation4], %s1205_s11  ;;  %s1890_s23 = scalar_lea.sflag [#allocation5], %s431_s18 }
  0x5c   : > { %s442_s22 = sshll.u32 %s435_s21, 4  ;;  %s1525_s24 = scalar_lea.hbm %s1886_s20, 8192  ;;  %s1888_s22 = int_to_ptr.vmem [resolvable:$true] %s442_s22 }
  0x5d   : > { %p1526_p3 = scmp.ne.s32.totalorder %s1886_s20, %s1525_s24  ;;  %p2136_p5 = scmp.ne.s32.totalorder %s2130_s10, 0 }
  0x5e   : > { %s1529_s9 = scalar_lea.hbm %s2120_s3, 32768  ;;  %p1530_p12 = scmp.lt.u32.totalorder %s1886_s20, %s2120_s3 }
  0x5f   : > { %p1527_p8 = pnand %p1526_p3, %p2136_p5  ;;  %p1531_p0 = scmp.lt.u32.totalorder %s1529_s9, %s1525_s24 }
  0x60   : > { %p1533_p4 = scmp.lt.u32.totalorder %s1525_s24, %s1886_s20 }
  0x61   : > { %p1528_p10 = pneg %p1527_p8  ;;  %p1532_p2 = por %p1531_p0, %p1530_p12 }
  0x63   : > { %p1534_p6 = por %p1533_p4, %p1532_p2 }
  0x65   : > { %p1535_p7 = pnand %p1534_p6, %p1528_p10 }
  0x67   : > { %1538 = shalt.err (!%p1535_p7)
}
  0x68   : > { %s1539_s18 = scalar_lea.vmem %s1888_s22, 8192  ;;  %s1610_s11 = smov [#allocation4]  }
  0x69   : > { %p1540_p9 = scmp.ne.s32.totalorder %s1888_s22, %s1539_s18  ;;  %s1543_s21 = sshll.u32 %s1610_s11, 4  ;;  %s1544_s21 = int_to_ptr.vmem [resolvable:$false] %s1543_s21 }
  0x6a   : > { %s1545_s30 = scalar_lea.vmem %s1544_s21, 16384  ;;  %p1546_p1 = scmp.lt.s32.totalorder %s1888_s22, %s1544_s21 }
  0x6b   : > { %p1541_p11 = pnand %p1540_p9, %p2136_p5  ;;  %p1547_p3 = scmp.lt.s32.totalorder %s1545_s30, %s1539_s18 }
  0x6d   : > { %p1542_p13 = pneg %p1541_p11  ;;  %p1548_p8 = por %p1547_p3, %p1546_p1 }
  0x6f   : > { %p1549_p12 = pnand %p1548_p8, %p1542_p13 }
  0x71   : > { %1552 = shalt.err (!%p1549_p12)
}
  0x72   : > { %s1611_s24 = smov 128   ;;  %s1612_s17 = smov 8  }
  0x73   : > { %1430 = dma.hbm_to_vmem [thread:$0]  (%p2136_p5), %s1886_s20, 8192, %s1888_s22, %s1890_s23, %s1611_s24, %s1611_s24, %s1612_s17  }
  0x74 PF: > { %p2137_p10 = scmp.ne.s32.totalorder %s2133_s15, 0 }
  0x75   : > { %s457_s9 = sand.u32 (!%p2137_p10), 1, %s1591_s25   ;;  %p2138_p0 = scmp.ne.s32.totalorder (!%p2137_p10), %s2132_s13, 0 }
  0x76   : > { %454 = sbr.rel (%p2137_p10) target bundleno = 940 (0x3ac), region = 67  ;;  %s1209_s16 = sshll.u32 (!%p2137_p10), %s457_s9, 9 }
  0x77   : > { %s1917_s19 = scalar_lea.vmem (!%p2137_p10), [#allocation3], %s1209_s16  ;;  %s464_s18 = scalar_lea.sflag (!%p2137_p10), [#allocation5], %s457_s9 }
  0x78   : > { %s1919_s11 = scalar_lea.vmem (!%p2137_p10), [#allocation4], %s1209_s16 }
  0x7d   : > { %1578 = dma.done.wait (%p2138_p0), %s464_s18, 8192  }
  0x7e   : > { %1580 = vsyncadd (%p2138_p0), %s464_s18, 4294959104  ;;  %p2139_p5 = scmp.ne.s32.totalorder %s2131_s12, 0 }
  0x80   : > { %1582 = dma.done.wait (%p2139_p5), [#allocation7], 16  }
  0x81   : > { %1584 = vsyncadd (%p2139_p5), [#allocation7], 4294967280  ;;  %s1212_s10 = sshll.u32 %s1599_s27, 2  ;;  %p1213_p4 = scmp.ne.s32.totalorder %s1599_s27, 0 }
  0x82   : > { %p523_p2 = scmp.lt.s32.totalorder %s1212_s10, 15  ;;  %v1613_v0 = vmov (!%p1213_p4), 0.0  }
  0x83   : > { %537 = sbr.rel (%p1213_p4) target bundleno = 138 (0x8a), region = 83  ;;  %538 = vst [vmem:[#allocation2] sm:$0xff] (!%p1213_p4), %v1613_v0  ;;  %539 = vst [vmem:[#allocation2 + $0x8] sm:$0xff] (!%p1213_p4), %v1613_v0 }
  0x84   : > { %s2148_s10 = smov (!%p523_p2, %s1212_s10), 15 }
  0x85   : > { %s525_s22 = scalar_lea.vmem %s2119_s2, %s2148_s10 }
  0x8a PF: > { %v543_v1 = vld [vmem:[%s1917_s19 + $0x8] sm:$0xff]  ;;  %v545_v3 = vld [vmem:[%s1917_s19 + $0x18] sm:$0xff]  ;;  %v542_v6 = vld [vmem:[%s1917_s19] sm:$0xff]  ;;  %v1614_v8 = vmov 0.0   ;;  %p1214_p6 = scmp.ne.s32.totalorder %s1599_s27, 3 }
  0x8b   : > { %v547_v2 = vld [vmem:[%s1917_s19 + $0x28] sm:$0xff]  ;;  %v549_v5 = vld [vmem:[%s1917_s19 + $0x38] sm:$0xff]  ;;  %v546_v7 = vld [vmem:[%s1917_s19 + $0x20] sm:$0xff]  ;;  %692 = vmatprep.mubr.f32.mxu0 %v1614_v8  ;;  %769 = vmatprep.mubr.f32.mxu1 %v1614_v8 }
  0x8c   : > { %v1300_v4 = vpack.c.bf16 %v547_v2, %v543_v1  ;;  %v1332_v9 = vpack.c.bf16 %v549_v5, %v545_v3  ;;  %v1302_v10 = vpack.c.bf16 %v546_v7, %v542_v6  ;;  %v544_v11 = vld [vmem:[%s1917_s19 + $0x10] sm:$0xff]  ;;  %v551_v13 = vld [vmem:[%s1917_s19 + $0x48] sm:$0xff]  ;;  %v553_v16 = vld [vmem:[%s1917_s19 + $0x58] sm:$0xff] }
  0x8d   : > { %v548_v12 = vld [vmem:[%s1917_s19 + $0x30] sm:$0xff]  ;;  %v555_v15 = vld [vmem:[%s1917_s19 + $0x68] sm:$0xff]  ;;  %v557_v17 = vld [vmem:[%s1917_s19 + $0x78] sm:$0xff] }
  0x8e   : > { %1301 = vmatprep.subr.bf16.mxu0 %v1300_v4  ;;  %v1334_v14 = vpack.c.bf16 %v548_v12, %v544_v11  ;;  %1333 = vmatprep.subr.bf16.mxu1 %v1332_v9  ;;  %v1304_v18 = vpack.c.bf16 %v555_v15, %v551_v13  ;;  %v1336_v19 = vpack.c.bf16 %v557_v17, %v553_v16  ;;  %v550_v20 = vld [vmem:[%s1917_s19 + $0x40] sm:$0xff]  ;;  %v552_v22 = vld [vmem:[%s1917_s19 + $0x50] sm:$0xff]  ;;  %v559_v25 = vld [vmem:[%s1917_s19 + $0x88] sm:$0xff] }
  0x8f   : > { %1303 = vmatpush1.bf16.msra.mxu0 %v1302_v10  ;;  %v554_v21 = vld [vmem:[%s1917_s19 + $0x60] sm:$0xff]  ;;  %v556_v24 = vld [vmem:[%s1917_s19 + $0x70] sm:$0xff]  ;;  %v563_v26 = vld [vmem:[%s1917_s19 + $0xa8] sm:$0xff] }
  0x90   : > { %1335 = vmatpush1.bf16.msra.mxu1 %v1334_v14  ;;  %v1306_v23 = vpack.c.bf16 %v554_v21, %v550_v20  ;;  %1305 = vmatprep.subr.bf16.mxu0 %v1304_v18  ;;  %v1338_v27 = vpack.c.bf16 %v556_v24, %v552_v22  ;;  %v1308_v28 = vpack.c.bf16 %v563_v26, %v559_v25  ;;  %v561_v29 = vld [vmem:[%s1917_s19 + $0x98] sm:$0xff]  ;;  %v558_v31 = vld [vmem:[%s1917_s19 + $0x80] sm:$0xff]  ;;  %v560_v34 = vld [vmem:[%s1917_s19 + $0x90] sm:$0xff] }
  0x91   : > { %1337 = vmatprep.subr.bf16.mxu1 %v1336_v19  ;;  %v565_v30 = vld [vmem:[%s1917_s19 + $0xb8] sm:$0xff]  ;;  %v562_v33 = vld [vmem:[%s1917_s19 + $0xa0] sm:$0xff]  ;;  %v564_v35 = vld [vmem:[%s1917_s19 + $0xb0] sm:$0xff] }
  0x92   : > { %v1340_v32 = vpack.c.bf16 %v565_v30, %v561_v29  ;;  %v1310_v36 = vpack.c.bf16 %v562_v33, %v558_v31  ;;  %v567_v37 = vld [vmem:[%s1917_s19 + $0xc8] sm:$0xff]  ;;  %v569_v39 = vld [vmem:[%s1917_s19 + $0xd8] sm:$0xff]  ;;  %v1342_v40 = vpack.c.bf16 %v564_v35, %v560_v34  ;;  %v566_v43 = vld [vmem:[%s1917_s19 + $0xc0] sm:$0xff] }
  0x93   : > { %1307 = vmatpush1.bf16.msra.mxu0 %v1306_v23  ;;  %v571_v38 = vld [vmem:[%s1917_s19 + $0xe8] sm:$0xff]  ;;  %v573_v42 = vld [vmem:[%s1917_s19 + $0xf8] sm:$0xff]  ;;  %v570_v44 = vld [vmem:[%s1917_s19 + $0xe0] sm:$0xff] }
  0x94   : > { %1339 = vmatpush1.bf16.msra.mxu1 %v1338_v27  ;;  %1309 = vmatprep.subr.bf16.mxu0 %v1308_v28  ;;  %v1312_v41 = vpack.c.bf16 %v571_v38, %v567_v37  ;;  %v1344_v45 = vpack.c.bf16 %v573_v42, %v569_v39  ;;  %v568_v46 = vld [vmem:[%s1917_s19 + $0xd0] sm:$0xff]  ;;  %v575_v48 = vld [vmem:[%s1917_s19 + $0x108] sm:$0xff]  ;;  %v577_v50 = vld [vmem:[%s1917_s19 + $0x118] sm:$0xff]  ;;  %v1314_v52 = vpack.c.bf16 %v570_v44, %v566_v43 }
  0x95   : > { %1341 = vmatprep.subr.bf16.mxu1 %v1340_v32  ;;  %v572_v47 = vld [vmem:[%s1917_s19 + $0xf0] sm:$0xff]  ;;  %v579_v49 = vld [vmem:[%s1917_s19 + $0x128] sm:$0xff]  ;;  %v581_v51 = vld [vmem:[%s1917_s19 + $0x138] sm:$0xff] }
  0x96   : > { %v1346_v53 = vpack.c.bf16 %v572_v47, %v568_v46  ;;  %v1316_v54 = vpack.c.bf16 %v579_v49, %v575_v48  ;;  %v574_v55 = vld [vmem:[%s1917_s19 + $0x100] sm:$0xff]  ;;  %v576_v57 = vld [vmem:[%s1917_s19 + $0x110] sm:$0xff]  ;;  %v1348_v58 = vpack.c.bf16 %v581_v51, %v577_v50  ;;  %v583_v60 = vld [vmem:[%s1917_s19 + $0x148] sm:$0xff] }
  0x97   : > { %1311 = vmatpush1.bf16.msra.mxu0 %v1310_v36  ;;  %v578_v56 = vld [vmem:[%s1917_s19 + $0x120] sm:$0xff]  ;;  %v580_v59 = vld [vmem:[%s1917_s19 + $0x130] sm:$0xff]  ;;  %v587_v61 = vld [vmem:[%s1917_s19 + $0x168] sm:$0xff] }
  0x98   : > { %1343 = vmatpush1.bf16.msra.mxu1 %v1342_v40  ;;  %1313 = vmatprep.subr.bf16.mxu0 %v1312_v41  ;;  %v585_v62 = vld [vmem:[%s1917_s19 + $0x158] sm:$0xff]  ;;  %v1318_v0 = vpack.c.bf16 %v578_v56, %v574_v55  ;;  %v1350_v1 = vpack.c.bf16 %v580_v59, %v576_v57  ;;  %v1320_v2 = vpack.c.bf16 %v587_v61, %v583_v60  ;;  %v582_v3 = vld [vmem:[%s1917_s19 + $0x140] sm:$0xff]  ;;  %v584_v5 = vld [vmem:[%s1917_s19 + $0x150] sm:$0xff] }
  0x99   : > { %1345 = vmatprep.subr.bf16.mxu1 %v1344_v45  ;;  %v589_v63 = vld [vmem:[%s1917_s19 + $0x178] sm:$0xff]  ;;  %v586_v4 = vld [vmem:[%s1917_s19 + $0x160] sm:$0xff]  ;;  %v588_v7 = vld [vmem:[%s1917_s19 + $0x170] sm:$0xff] }
  0x9a   : > { %v1352_v6 = vpack.c.bf16 %v589_v63, %v585_v62  ;;  %v591_v9 = vld [vmem:[%s1917_s19 + $0x188] sm:$0xff]  ;;  %v593_v11 = vld [vmem:[%s1917_s19 + $0x198] sm:$0xff]  ;;  %v1322_v13 = vpack.c.bf16 %v586_v4, %v582_v3  ;;  %v1354_v14 = vpack.c.bf16 %v588_v7, %v584_v5  ;;  %v590_v16 = vld [vmem:[%s1917_s19 + $0x180] sm:$0xff] }
  0x9b   : > { %1315 = vmatpush1.bf16.msra.mxu0 %v1314_v52  ;;  %v595_v10 = vld [vmem:[%s1917_s19 + $0x1a8] sm:$0xff]  ;;  %v597_v12 = vld [vmem:[%s1917_s19 + $0x1b8] sm:$0xff]  ;;  %v594_v17 = vld [vmem:[%s1917_s19 + $0x1a0] sm:$0xff] }
  0x9c   : > { %1347 = vmatpush1.bf16.msra.mxu1 %v1346_v53  ;;  %1317 = vmatprep.subr.bf16.mxu0 %v1316_v54  ;;  %v1324_v15 = vpack.c.bf16 %v595_v10, %v591_v9  ;;  %v592_v18 = vld [vmem:[%s1917_s19 + $0x190] sm:$0xff]  ;;  %v1356_v19 = vpack.c.bf16 %v597_v12, %v593_v11  ;;  %v599_v21 = vld [vmem:[%s1917_s19 + $0x1c8] sm:$0xff]  ;;  %v601_v23 = vld [vmem:[%s1917_s19 + $0x1d8] sm:$0xff]  ;;  %v1326_v25 = vpack.c.bf16 %v594_v17, %v590_v16 }
  0x9d   : > { %1349 = vmatprep.subr.bf16.mxu1 %v1348_v58  ;;  %v596_v20 = vld [vmem:[%s1917_s19 + $0x1b0] sm:$0xff]  ;;  %v603_v22 = vld [vmem:[%s1917_s19 + $0x1e8] sm:$0xff]  ;;  %v605_v24 = vld [vmem:[%s1917_s19 + $0x1f8] sm:$0xff] }
  0x9e   : > { %v1358_v26 = vpack.c.bf16 %v596_v20, %v592_v18  ;;  %v1328_v27 = vpack.c.bf16 %v603_v22, %v599_v21  ;;  %v598_v28 = vld [vmem:[%s1917_s19 + $0x1c0] sm:$0xff]  ;;  %v600_v30 = vld [vmem:[%s1917_s19 + $0x1d0] sm:$0xff]  ;;  %v1360_v31 = vpack.c.bf16 %v605_v24, %v601_v23  ;;  %v809_v34 = vld [vmem:[%s1919_s11 + $0x88] sm:$0xff] }
  0x9f   : > { %1319 = vmatpush1.bf16.msra.mxu0 %v1318_v0  ;;  %v602_v29 = vld [vmem:[%s1917_s19 + $0x1e0] sm:$0xff]  ;;  %v604_v32 = vld [vmem:[%s1917_s19 + $0x1f0] sm:$0xff]  ;;  %v841_v36 = vld [vmem:[%s1919_s11 + $0x188] sm:$0xff] }
  0xa0   : > { %1351 = vmatpush1.bf16.msra.mxu1 %v1350_v1  ;;  %1321 = vmatprep.subr.bf16.mxu0 %v1320_v2  ;;  %v808_v33 = vld [vmem:[%s1919_s11 + $0x80] sm:$0xff]  ;;  %v1330_v37 = vpack.c.bf16 %v602_v29, %v598_v28  ;;  %v1362_v38 = vpack.c.bf16 %v604_v32, %v600_v30  ;;  %v793_v42 = vld [vmem:[%s1919_s11 + $0x8] sm:$0xff]  ;;  %v810_v45 = vld [vmem:[%s1919_s11 + $0x90] sm:$0xff] }
  0xa1   : > { %1353 = vmatprep.subr.bf16.mxu1 %v1352_v6  ;;  %v840_v35 = vld [vmem:[%s1919_s11 + $0x180] sm:$0xff]  ;;  %v1364_v39 = vpack.c.bf16 %v809_v34, %v808_v33  ;;  %v825_v44 = vld [vmem:[%s1919_s11 + $0x108] sm:$0xff]  ;;  %v811_v46 = vld [vmem:[%s1919_s11 + $0x98] sm:$0xff] }
  0xa2   : > { %v1396_v40 = vpack.c.bf16 %v841_v36, %v840_v35  ;;  %v792_v41 = vld [vmem:[%s1919_s11] sm:$0xff]  ;;  %v540_v47 = vld [vmem:[%s2117_s0] sm:$0xff]  ;;  %v843_v49 = vld [vmem:[%s1919_s11 + $0x198] sm:$0xff]  ;;  %v1368_v52 = vpack.c.bf16 %v811_v46, %v810_v45 }
  0xa3   : > { %1323 = vmatpush1.bf16.msra.mxu0 %v1322_v13  ;;  %v824_v43 = vld [vmem:[%s1919_s11 + $0x100] sm:$0xff]  ;;  %v842_v48 = vld [vmem:[%s1919_s11 + $0x190] sm:$0xff]  ;;  %v1366_v50 = vpack.c.bf16 %v793_v42, %v792_v41  ;;  %v795_v54 = vld [vmem:[%s1919_s11 + $0x18] sm:$0xff] }
  0xa4   : > { %1355 = vmatpush1.bf16.msra.mxu1 %v1354_v14  ;;  %1325 = vmatprep.subr.bf16.mxu0 %v1324_v15  ;;  %v1398_v51 = vpack.c.bf16 %v825_v44, %v824_v43  ;;  %v794_v53 = vld [vmem:[%s1919_s11 + $0x10] sm:$0xff]  ;;  %v1400_v56 = vpack.c.bf16 %v843_v49, %v842_v48  ;;  %v827_v57 = vld [vmem:[%s1919_s11 + $0x118] sm:$0xff]  ;;  %v812_v58 = vld [vmem:[%s1919_s11 + $0xa0] sm:$0xff] }
  0xa5   : > { %1357 = vmatprep.subr.bf16.mxu1 %v1356_v19  ;;  %v826_v55 = vld [vmem:[%s1919_s11 + $0x110] sm:$0xff]  ;;  %v813_v59 = vld [vmem:[%s1919_s11 + $0xa8] sm:$0xff]  ;;  %v541_v60 = vld [vmem:[%s2117_s0 + $0x8] sm:$0xff]  ;;  %v1370_v63 = vpack.c.bf16 %v795_v54, %v794_v53 }
  0xa6   : > { %v844_v61 = vld [vmem:[%s1919_s11 + $0x1a0] sm:$0xff]  ;;  %v845_v62 = vld [vmem:[%s1919_s11 + $0x1a8] sm:$0xff]  ;;  %v1402_v0 = vpack.c.bf16 %v827_v57, %v826_v55  ;;  %v1372_v1 = vpack.c.bf16 %v813_v59, %v812_v58  ;;  %v814_v7 = vld [vmem:[%s1919_s11 + $0xb0] sm:$0xff] }
  0xa7   : > { %1327 = vmatpush1.bf16.msra.mxu0 %v1326_v25  ;;  %v796_v2 = vld [vmem:[%s1919_s11 + $0x20] sm:$0xff]  ;;  %v797_v3 = vld [vmem:[%s1919_s11 + $0x28] sm:$0xff]  ;;  %v1404_v5 = vpack.c.bf16 %v845_v62, %v844_v61  ;;  %v846_v9 = vld [vmem:[%s1919_s11 + $0x1b0] sm:$0xff] }
  0xa8   : > { %1359 = vmatpush1.bf16.msra.mxu1 %v1358_v26  ;;  %1329 = vmatprep.subr.bf16.mxu0 %v1328_v27  ;;  %v828_v4 = vld [vmem:[%s1919_s11 + $0x120] sm:$0xff]  ;;  %v829_v6 = vld [vmem:[%s1919_s11 + $0x128] sm:$0xff]  ;;  %v847_v10 = vld [vmem:[%s1919_s11 + $0x1b8] sm:$0xff]  ;;  %v1374_v11 = vpack.c.bf16 %v797_v3, %v796_v2 }
  0xa9   : > { %1361 = vmatprep.subr.bf16.mxu1 %v1360_v31  ;;  %v1406_v12 = vpack.c.bf16 %v829_v6, %v828_v4  ;;  %v798_v14 = vld [vmem:[%s1919_s11 + $0x30] sm:$0xff]  ;;  %v799_v15 = vld [vmem:[%s1919_s11 + $0x38] sm:$0xff]  ;;  %v1408_v17 = vpack.c.bf16 %v847_v10, %v846_v9  ;;  %v816_v19 = vld [vmem:[%s1919_s11 + $0xc0] sm:$0xff] }
  0xaa   : > { %v830_v16 = vld [vmem:[%s1919_s11 + $0x130] sm:$0xff]  ;;  %v831_v18 = vld [vmem:[%s1919_s11 + $0x138] sm:$0xff]  ;;  %v817_v20 = vld [vmem:[%s1919_s11 + $0xc8] sm:$0xff]  ;;  %v1378_v23 = vpack.c.bf16 %v799_v15, %v798_v14 }
  0xab   : > { %1331 = vmatpush1.bf16.msra.mxu0 %v1330_v37  ;;  %v848_v21 = vld [vmem:[%s1919_s11 + $0x1c0] sm:$0xff]  ;;  %v849_v22 = vld [vmem:[%s1919_s11 + $0x1c8] sm:$0xff]  ;;  %v1410_v24 = vpack.c.bf16 %v831_v18, %v830_v16  ;;  %v1380_v25 = vpack.c.bf16 %v817_v20, %v816_v19  ;;  %v818_v31 = vld [vmem:[%s1919_s11 + $0xd0] sm:$0xff] }
  0xac   : > { %1363 = vmatpush1.bf16.msra.mxu1 %v1362_v38  ;;  %1365 = vmatprep.subr.bf16.mxu0 %v1364_v39  ;;  %v800_v26 = vld [vmem:[%s1919_s11 + $0x40] sm:$0xff]  ;;  %v801_v27 = vld [vmem:[%s1919_s11 + $0x48] sm:$0xff]  ;;  %v1412_v29 = vpack.c.bf16 %v849_v22, %v848_v21  ;;  %v819_v32 = vld [vmem:[%s1919_s11 + $0xd8] sm:$0xff] }
  0xad   : > { %1397 = vmatprep.subr.bf16.mxu1 %v1396_v40  ;;  %v832_v28 = vld [vmem:[%s1919_s11 + $0x140] sm:$0xff]  ;;  %v833_v30 = vld [vmem:[%s1919_s11 + $0x148] sm:$0xff]  ;;  %v850_v33 = vld [vmem:[%s1919_s11 + $0x1d0] sm:$0xff]  ;;  %v1382_v35 = vpack.c.bf16 %v801_v27, %v800_v26  ;;  %v1384_v37 = vpack.c.bf16 %v819_v32, %v818_v31 }
  0xae   : > { %693 = vmatmul.mubr.f32.vlgmr.msra.gmra.mrb[0].mxu0 %v540_v47  ;;  %v851_v34 = vld [vmem:[%s1919_s11 + $0x1d8] sm:$0xff]  ;;  %v1414_v36 = vpack.c.bf16 %v833_v30, %v832_v28  ;;  %v802_v38 = vld [vmem:[%s1919_s11 + $0x50] sm:$0xff]  ;;  %v820_v43 = vld [vmem:[%s1919_s11 + $0xe0] sm:$0xff] }
  0xaf   : > { %770 = vmatmul.mubr.f32.vlgmr.msra.gmra.mrb[0].mxu1 %v540_v47  ;;  %698 = vmatprep.mubr.f32.mxu0 %v1614_v8  ;;  %v803_v39 = vld [vmem:[%s1919_s11 + $0x58] sm:$0xff]  ;;  %v834_v40 = vld [vmem:[%s1919_s11 + $0x150] sm:$0xff]  ;;  %v1416_v41 = vpack.c.bf16 %v851_v34, %v850_v33  ;;  %v821_v44 = vld [vmem:[%s1919_s11 + $0xe8] sm:$0xff] }
  0xb0   : > { %775 = vmatprep.mubr.f32.mxu1 %v1614_v8  ;;  %1367 = vmatpush3.bf16.msra.mxu0 %v1366_v50  ;;  %v815_v8 = vld [vmem:[%s1919_s11 + $0xb8] sm:$0xff]  ;;  %v852_v45 = vld [vmem:[%s1919_s11 + $0x1e0] sm:$0xff]  ;;  %v853_v46 = vld [vmem:[%s1919_s11 + $0x1e8] sm:$0xff]  ;;  %v1386_v47 = vpack.c.bf16 %v803_v39, %v802_v38  ;;  %v1388_v49 = vpack.c.bf16 %v821_v44, %v820_v43 }
  0xb1   : > { %1399 = vmatpush3.bf16.msra.mxu1 %v1398_v51  ;;  %1369 = vmatprep.subr.bf16.mxu0 %v1368_v52  ;;  %v1376_v13 = vpack.c.bf16 %v815_v8, %v814_v7  ;;  %v835_v42 = vld [vmem:[%s1919_s11 + $0x158] sm:$0xff]  ;;  %v1420_v50 = vpack.c.bf16 %v853_v46, %v852_v45  ;;  %v804_v51 = vld [vmem:[%s1919_s11 + $0x60] sm:$0xff]  ;;  %v805_v52 = vld [vmem:[%s1919_s11 + $0x68] sm:$0xff] }
  0xb2   : > { %699 = vmatmul.mubr.f32.gmra.mrb[2].mxu0 %v541_v60  ;;  %1401 = vmatprep.subr.bf16.mxu1 %v1400_v56  ;;  %v1418_v48 = vpack.c.bf16 %v835_v42, %v834_v40  ;;  %v836_v53 = vld [vmem:[%s1919_s11 + $0x160] sm:$0xff]  ;;  %v1390_v54 = vpack.c.bf16 %v805_v52, %v804_v51  ;;  %v837_v55 = vld [vmem:[%s1919_s11 + $0x168] sm:$0xff]  ;;  %v822_v57 = vld [vmem:[%s1919_s11 + $0xf0] sm:$0xff] }
  0xb3   : > { %776 = vmatmul.mubr.f32.gmra.mrb[2].mxu1 %v541_v60  ;;  %v1422_v56 = vpack.c.bf16 %v837_v55, %v836_v53  ;;  %v823_v58 = vld [vmem:[%s1919_s11 + $0xf8] sm:$0xff]  ;;  %v854_v59 = vld [vmem:[%s1919_s11 + $0x1f0] sm:$0xff] }
  0xb4   : > { %1371 = vmatpush3.bf16.msra.mxu0 %v1370_v63  ;;  %v1392_v60 = vpack.c.bf16 %v823_v58, %v822_v57  ;;  %v855_v61 = vld [vmem:[%s1919_s11 + $0x1f8] sm:$0xff]  ;;  %v806_v62 = vld [vmem:[%s1919_s11 + $0x70] sm:$0xff] }
  0xb5   : > { %1403 = vmatpush3.bf16.msra.mxu1 %v1402_v0  ;;  %1373 = vmatprep.subr.bf16.mxu0 %v1372_v1  ;;  %v807_v63 = vld [vmem:[%s1919_s11 + $0x78] sm:$0xff]  ;;  %v1424_v0 = vpack.c.bf16 %v855_v61, %v854_v59  ;;  %v838_v2 = vld [vmem:[%s1919_s11 + $0x170] sm:$0xff] }
  0xb6   : > { %1405 = vmatprep.subr.bf16.mxu1 %v1404_v5  ;;  %v1394_v1 = vpack.c.bf16 %v807_v63, %v806_v62  ;;  %v839_v3 = vld [vmem:[%s1919_s11 + $0x178] sm:$0xff]  ;;  %v608_v5 = vlaneseq  ;;  %v606_v8 = vld [vmem:[%s525_s22] sm:$0xf] }
  0xb7   : > { %v1426_v4 = vpack.c.bf16 %v839_v3, %v838_v2  ;;  %v790_v46 = vld [vmem:[#allocation2] sm:$0xff]  ;;  %v791_v55 = vld [vmem:[#allocation2 + $0x8] sm:$0xff] }
  0xb8   : > { %1375 = vmatpush3.bf16.msra.mxu0 %v1374_v11  ;;  %v609_v6 = vshrl.u32 %v608_v5, 7  ;;  %v1215_v59 = vld [vmem:[%s2121_s4] ss:$0 sm:$0xff] (!%p1214_p6) }
  0xb9   : > { %1407 = vmatpush3.bf16.msra.mxu1 %v1406_v12  ;;  %1377 = vmatprep.subr.bf16.mxu0 %v1376_v13 }
  0xba   : > { %1409 = vmatprep.subr.bf16.mxu1 %v1408_v17  ;;  %v610_v7 = vsub.s32 0, %v609_v6  ;;  %v618_v9 = vsub.s32 2, %v609_v6  ;;  %v614_v10 = vsub.s32 1, %v609_v6  ;;  %v622_v11 = vsub.s32 3, %v609_v6 }
  0xbc   : > { %1379 = vmatpush3.bf16.msra.mxu0 %v1378_v23  ;;  %v611_v12 = vrot.slane %v606_v8, %v610_v7  ;;  %v619_v13 = vrot.slane %v606_v8, %v618_v9  ;;  %v615_v14 = vrot.slane %v606_v8, %v614_v10  ;;  %v623_v15 = vrot.slane %v606_v8, %v622_v11 }
  0xbd   : > { %1411 = vmatpush3.bf16.msra.mxu1 %v1410_v24  ;;  %1381 = vmatprep.subr.bf16.mxu0 %v1380_v25 }
  0xbe   : > { %1413 = vmatprep.subr.bf16.mxu1 %v1412_v29 }
  0xc0   : > { %1383 = vmatpush3.bf16.msra.mxu0 %v1382_v35 }
  0xc1   : > { %1415 = vmatpush3.bf16.msra.mxu1 %v1414_v36  ;;  %1385 = vmatprep.subr.bf16.mxu0 %v1384_v37 }
  0xc2   : > { %1417 = vmatprep.subr.bf16.mxu1 %v1416_v41 }
  0xc4   : > { %1387 = vmatpush3.bf16.msra.mxu0 %v1386_v47 }
  0xc5   : > { %1419 = vmatpush3.bf16.msra.mxu1 %v1418_v48  ;;  %1389 = vmatprep.subr.bf16.mxu0 %v1388_v49 }
  0xc6   : > { %1421 = vmatprep.subr.bf16.mxu1 %v1420_v50 }
  0xc8   : > { %1391 = vmatpush3.bf16.msra.mxu0 %v1390_v54 }
  0xc9   : > { %1423 = vmatpush3.bf16.msra.mxu1 %v1422_v56  ;;  %1393 = vmatprep.subr.bf16.mxu0 %v1392_v60  ;;  %v1025_v60 = vld [vmem:[%s2117_s0] sm:$0xff] (!%p1214_p6) }
  0xca   : > { %1425 = vmatprep.subr.bf16.mxu1 %v1424_v0  ;;  %v1026_v0 = vld [vmem:[%s2117_s0 + $0x8] sm:$0xff] (!%p1214_p6) }
  0xcc   : > { %1395 = vmatpush3.bf16.msra.mxu0 %v1394_v1 }
  0xcd   : > { %1427 = vmatpush3.bf16.msra.mxu1 %v1426_v4 }
 0x181   : > { %v694_v16 = vpop.f32.mrb[0].mxu0 }
 0x182   : > { %v695_v17 = vadd.f32 %v694_v16, %v611_v12  ;;  %v771_v18 = vpop.f32.mrb[0].mxu1  ;;  %v696_v19 = vpop.f32.mrb[1].mxu0 }
 0x183   : > { %v772_v20 = vadd.f32 %v771_v18, %v619_v13  ;;  %v697_v21 = vadd.f32 %v696_v19, %v615_v14  ;;  %v773_v22 = vpop.f32.mrb[1].mxu1  ;;  %v1216_v18 = vld [vmem:[%s2122_s5] ss:$0 sm:$0xff] (!%p1214_p6) }
 0x184   : > { %v774_v23 = vadd.f32 %v773_v22, %v623_v15  ;;  %v782_v26 = vmax.f32 %v695_v17, 0.0 }
 0x185   : > { %v783_v24 = vmax.f32 %v697_v21, 0.0  ;;  %v700_v25 = vpop.f32.mrb[2].mxu0  ;;  %v784_v31 = vmax.f32 %v772_v20, 0.0  ;;  %v1217_v20 = vld [vmem:[#allocation6] ss:$0 sm:$0xff] (!%p1214_p6) }
 0x186   : > { %v785_v27 = vmax.f32 %v774_v23, 0.0  ;;  %v701_v28 = vadd.f32 %v700_v25, %v611_v12  ;;  %v777_v29 = vpop.f32.mrb[2].mxu1  ;;  %v702_v30 = vpop.f32.mrb[3].mxu0 }
 0x187   : > { %v778_v32 = vadd.f32 %v777_v29, %v619_v13  ;;  %v703_v33 = vadd.f32 %v702_v30, %v615_v14  ;;  %v779_v34 = vpop.f32.mrb[3].mxu1  ;;  %920 = vmatprep.mubr.f32.mxu0 %v783_v24 }
 0x188   : > { %v780_v35 = vadd.f32 %v779_v34, %v623_v15  ;;  %995 = vmatprep.mubr.f32.mxu1 %v785_v27  ;;  %921 = vmatmul.mubr.f32.vlgmr.msra.gmra.mrb[4].mxu0 %v782_v26  ;;  %v786_v37 = vmax.f32 %v701_v28, 0.0 }
 0x189   : > { %v787_v36 = vmax.f32 %v703_v33, 0.0  ;;  %996 = vmatmul.mubr.f32.vlgmr.msra.gmra.mrb[4].mxu1 %v784_v31  ;;  %v788_v39 = vmax.f32 %v778_v32, 0.0 }
 0x18a   : > { %v789_v38 = vmax.f32 %v780_v35, 0.0 }
 0x18b   : > { %925 = vmatprep.mubr.f32.mxu0 %v787_v36 }
 0x18c   : > { %1000 = vmatprep.mubr.f32.mxu1 %v789_v38  ;;  %926 = vmatmul.mubr.f32.gmra.mrb[6].mxu0 %v786_v37 }
 0x18d   : > { %1001 = vmatmul.mubr.f32.gmra.mrb[6].mxu1 %v788_v39 }
 0x25b   : > { %v1256_v40 = vpop.f32.mrb[4].mxu0 }
 0x25c   : > { %v1294_v41 = vpop.f32.mrb[4].mxu1  ;;  %v1257_v42 = vpop.f32.mrb[5].mxu0 }
 0x25d   : > { %v1258_v43 = vadd.f32 %v1257_v42, %v1256_v40  ;;  %v1295_v44 = vpop.f32.mrb[5].mxu1 }
 0x25e   : > { %v1296_v45 = vadd.f32 %v1295_v44, %v1294_v41 }
 0x25f   : > { %v1259_v47 = vpop.f32.mrb[6].mxu0 }
 0x260   : > { %v998_v48 = vadd.f32 %v1296_v45, %v1258_v43  ;;  %v1297_v49 = vpop.f32.mrb[6].mxu1  ;;  %v1260_v50 = vpop.f32.mrb[7].mxu0 }
 0x261   : > { %v1261_v51 = vadd.f32 %v1260_v50, %v1259_v47  ;;  %v1298_v52 = vpop.f32.mrb[7].mxu1 }
 0x262   : > { %v1006_v53 = vadd.f32 %v998_v48, %v790_v46  ;;  %v1299_v54 = vadd.f32 %v1298_v52, %v1297_v49  ;;  %1013 = sbr.rel (%p1214_p6) target bundleno = 940 (0x3ac), region = 87 }
 0x264   : > { %1008 = vst [vmem:[#allocation2] sm:$0xff] %v1006_v53  ;;  %v1003_v56 = vadd.f32 %v1299_v54, %v1261_v51 }
 0x266   : > { %v1007_v57 = vadd.f32 %v1003_v56, %v791_v55 }
 0x268   : > { %1009 = vst [vmem:[#allocation2 + $0x8] sm:$0xff] %v1007_v57 }
 0x26b   : > { %v1014_v58 = vld [vmem:[#allocation2] sm:$0xff] }
 0x26c   : > { %v1023_v61 = vadd.f32 %v1215_v59, %v1014_v58 }
 0x26e   : > { %v1027_v1 = vadd.f32 %v1025_v60, %v1023_v61 }
 0x26f   : > { %v1015_v62 = vld [vmem:[#allocation2 + $0x8] sm:$0xff] }
 0x270   : > { %v1024_v63 = vadd.f32 %v1215_v59, %v1015_v62  ;;  %1029 = vadd.xlane.f32.xlu0 %v1027_v1 }
 0x272   : > { %v1028_v2 = vadd.f32 %v1026_v0, %v1024_v63 }
 0x274   : > { %1031 = vadd.xlane.f32.xlu0 %v1028_v2 }
 0x2fd   : > { %v1030_v3 = vpop.xlane.xlu0 %1029 }
 0x2fe   : > { %v1034_v4 = vmul.f32 0.0078125, %v1030_v3 }
 0x300   : > { %v1036_v5 = vsub.f32 %v1027_v1, %v1034_v4 }
 0x301   : > { %v1032_v6 = vpop.xlane.xlu0 %1031 }
 0x302   : > { %v1035_v7 = vmul.f32 0.0078125, %v1032_v6  ;;  %v1038_v8 = vmul.f32 %v1036_v5, %v1036_v5 }
 0x304   : > { %v1037_v9 = vsub.f32 %v1028_v2, %v1035_v7  ;;  %1040 = vadd.xlane.f32.xlu1 %v1038_v8 }
 0x306   : > { %v1039_v10 = vmul.f32 %v1037_v9, %v1037_v9 }
 0x308   : > { %1042 = vadd.xlane.f32.xlu1 %v1039_v10 }
 0x391   : > { %v1041_v11 = vpop.xlane.xlu1 %1040 }
 0x392   : > { %v1044_v12 = vmul.f32 0.0078125, %v1041_v11 }
 0x394   : > { %v1046_v13 = vadd.f32 1e-05, %v1044_v12 }
 0x395   : > { %v1043_v14 = vpop.xlane.xlu1 %1042 }
 0x396   : > { %1493 = vrsqrt.f32 %v1046_v13  ;;  %v1045_v15 = vmul.f32 0.0078125, %v1043_v14 }
 0x398   : > { %v1047_v16 = vadd.f32 1e-05, %v1045_v15 }
 0x39a   : > { %1495 = vrsqrt.f32 %v1047_v16 }
 0x3a0   : > { %v1494_v17 = vpop.eup %1493 }
 0x3a1   : > { %v1050_v19 = vmul.f32 %v1494_v17, %v1036_v5 }
 0x3a3   : > { %v1059_v21 = vmul.f32 %v1216_v18, %v1050_v19 }
 0x3a4   : > { %v1496_v22 = vpop.eup %1495 }
 0x3a5   : > { %v1068_v23 = vadd.f32 %v1217_v20, %v1059_v21  ;;  %v1051_v24 = vmul.f32 %v1496_v22, %v1037_v9 }
 0x3a7   : > { %1070 = vst [vmem:[%s2124_s7] sm:$0xff] %v1068_v23  ;;  %v1060_v25 = vmul.f32 %v1216_v18, %v1051_v24 }
 0x3a9   : > { %v1069_v26 = vadd.f32 %v1217_v20, %v1060_v25 }
 0x3ab   : > { %1071 = vst [vmem:[%s2124_s7 + $0x8] sm:$0xff] %v1069_v26 }
 0x3ac PF: > { %s21_s29 = sadd.s32 1, %s1607_s29   ;;  %s2140_s24 = smov %s1591_s25 }
 0x3ad   : > { %p18_p7 = scmp.ge.s32.totalorder %s21_s29, 6   ;;  %s2141_s25 = smov %s1595_s26 }
 0x3ae   : > { %s2142_s26 = smov %s1711_s14  ;;  %s2143_s27 = smov %s1603_s28 }
 0x3af   : > { %s2144_s28 = smov %s2146_s8  ;;  %20 = sbr.rel (!%p18_p7) target bundleno = 5 (0x5), region = 137 }
 0x3b6   :  { %1094 = vsyncpa [#allocation5], 1 }
 0x3b7   :  { %1096 = vsyncpa [#allocation5 + $0x1], 1 }
 0x3b8   :  { %1097 = vsyncpa [#allocation7], 1 }

// kernel: transformer_forward.34
= control target key start
LH: loop header
LB: loop body
LE: loop exit
PB: predicated region body
PF: predicated region fallthrough
CT: control target
= control target key end

     0   :  { %s107_s0 = inlined_call_operand.vmem [shape: f32[16,128], index: 0, kind: input, shape index: {}]   ;;  %s108_s1 = inlined_call_operand.vmem [shape: f32[1,128], index: 1, kind: input, shape index: {}]   ;;  %s109_s2 = inlined_call_operand.vmem [shape: f32[1,128], index: 2, kind: input, shape index: {}]   ;;  %s110_s3 = inlined_call_operand.vmem [shape: f32[16,128], index: 3, kind: output, shape index: {}]  }
   0x1   :  { %v14_v0 = vld [vmem:[%s107_s0] sm:$0xff]  ;;  %v15_v1 = vld [vmem:[%s107_s0 + $0x8] sm:$0xff] }
   0x2   :  { %16 = vadd.xlane.f32.xlu0 %v14_v0  ;;  %v63_v17 = vld [vmem:[%s108_s1] ss:$0 sm:$0xff] }
   0x3   :  { %v64_v19 = vld [vmem:[%s109_s2] ss:$0 sm:$0xff] }
   0x6   :  { %18 = vadd.xlane.f32.xlu0 %v15_v1 }
  0x8f   :  { %v17_v2 = vpop.xlane.xlu0 %16 }
  0x90   :  { %v21_v3 = vmul.f32 0.0078125, %v17_v2 }
  0x92   :  { %v23_v4 = vsub.f32 %v14_v0, %v21_v3 }
  0x93   :  { %v19_v5 = vpop.xlane.xlu0 %18 }
  0x94   :  { %v22_v6 = vmul.f32 0.0078125, %v19_v5  ;;  %v25_v7 = vmul.f32 %v23_v4, %v23_v4 }
  0x96   :  { %v24_v8 = vsub.f32 %v15_v1, %v22_v6  ;;  %27 = vadd.xlane.f32.xlu1 %v25_v7 }
  0x98   :  { %v26_v9 = vmul.f32 %v24_v8, %v24_v8 }
  0x9a   :  { %29 = vadd.xlane.f32.xlu1 %v26_v9 }
 0x123   :  { %v28_v10 = vpop.xlane.xlu1 %27 }
 0x124   :  { %v31_v11 = vmul.f32 0.0078125, %v28_v10 }
 0x126   :  { %v33_v12 = vadd.f32 1e-05, %v31_v11 }
 0x127   :  { %v30_v13 = vpop.xlane.xlu1 %29 }
 0x128   :  { %65 = vrsqrt.f32 %v33_v12  ;;  %v32_v14 = vmul.f32 0.0078125, %v30_v13 }
 0x12a   :  { %v34_v15 = vadd.f32 1e-05, %v32_v14 }
 0x12c   :  { %67 = vrsqrt.f32 %v34_v15 }
 0x132   :  { %v66_v16 = vpop.eup %65 }
 0x133   :  { %v37_v18 = vmul.f32 %v66_v16, %v23_v4 }
 0x135   :  { %v46_v20 = vmul.f32 %v63_v17, %v37_v18 }
 0x136   :  { %v68_v21 = vpop.eup %67 }
 0x137   :  { %v55_v22 = vadd.f32 %v64_v19, %v46_v20  ;;  %v38_v23 = vmul.f32 %v68_v21, %v24_v8 }
 0x139   :  { %57 = vst [vmem:[%s110_s3] sm:$0xff] %v55_v22  ;;  %v47_v24 = vmul.f32 %v63_v17, %v38_v23 }
 0x13b   :  { %v56_v25 = vadd.f32 %v64_v19, %v47_v24 }
 0x13d   :  { %58 = vst [vmem:[%s110_s3 + $0x8] sm:$0xff] %v56_v25 }

// kernel: transformer_forward.33
= control target key start
LH: loop header
LB: loop body
LE: loop exit
PB: predicated region body
PF: predicated region fallthrough
CT: control target
= control target key end

     0   :  { %s1498_s24 = smov 0   ;;  %s1500_s25 = smov 0   ;;  %s1872_s0 = inlined_call_operand.vmem [shape: f32[16,128], index: 0, kind: input, shape index: {}]   ;;  %s1873_s1 = inlined_call_operand.vmem [shape: f32[128,2048], index: 1, kind: input, shape index: {}]   ;;  %s1874_s2 = inlined_call_operand.vmem [shape: f32[1,2048], index: 2, kind: input, shape index: {}]   ;;  %s1875_s3 = inlined_call_operand.vmem [shape: f32[2048,128], index: 3, kind: input, shape index: {}]   ;;  %s1876_s4 = inlined_call_operand.vmem [shape: f32[1,128], index: 4, kind: input, shape index: {}]   ;;  %s1877_s5 = inlined_call_operand.vmem [shape: f32[1,128], index: 5, kind: input, shape index: {}]   ;;  %s1878_s6 = inlined_call_operand.vmem [shape: f32[1,128], index: 6, kind: input, shape index: {}]   ;;  %s1879_s7 = inlined_call_operand.vmem [shape: f32[16,128], index: 7, kind: output, shape index: {}]  }
   0x1   :  { %s1502_s26 = smov 0   ;;  %s1504_s27 = smov 0  }
   0x2   :  { %s1506_s28 = smov 0  }
   0x3 LB: > { %s26_s29 = sadd.s32 1, %s1450_s27  ;;  %p69_p1 = scmp.ne.s32.totalorder %s1442_s25, %s1438_s24  ;;  %s1454_s28 = sphi %s1506_s28, %s17_s28   ;;  %s1450_s27 = sphi %s1504_s27, %s1883_s27   ;;  %s1446_s26 = sphi %s1502_s26, %s1882_s26   ;;  %s1442_s25 = sphi %s1500_s25, %s1881_s25   ;;  %s1438_s24 = sphi %s1498_s24, %s1880_s24  }
   0x4   : > { %p27_p0 = scmp.ge.s32.totalorder %s26_s29, 4  ;;  %p70_p2 = scmp.eq.s32.totalorder %s1454_s28, 0 }
   0x5   : > { %s62_s8 = sadd.s32 1, %s1442_s25  ;;  %p1147_p5 = scmp.ge.s32.totalorder %s1454_s28, 4 }
   0x6   : > { %s1885_s29 = smov (%p27_p0, %s26_s29), 0  ;;  %p71_p3 = por %p70_p2, %p69_p1 }
   0x7   : > { %s59_s30 = ssub.s32 %s1450_s27, %s1885_s29  ;;  %254 = sbr.rel (%p1147_p5) target bundleno = 50 (0x32), region = 32 }
   0x8   : > { %p60_p4 = scmp.eq.s32.totalorder %s59_s30, 0 }
   0xa   : > { %s1533_s9 = scalar_select %p60_p4, %s1442_s25, %s62_s8  }
   0xe   : > { %257 = sbr.rel (!%p71_p3) target bundleno = 50 (0x32), region = 36  ;;  %s259_s10 = sand.u32 (%p71_p3), 1, %s1442_s25  }
   0xf   : > { %s1165_s11 = sshll.u32 (%p71_p3), %s1450_s27, 5  ;;  %s1148_s12 = sshll.u32 (%p71_p3), %s259_s10, 9 }
  0x10   : > { %s1541_s15 = scalar_lea.vmem (%p71_p3), %s1873_s1, %s1165_s11  ;;  %s1546_s16 = scalar_lea.vmem (%p71_p3), [#allocation3], %s1148_s12 }
  0x11   : > { %v277_v0 = vld [vmem:[%s1541_s15] sm:$0xff] (%p71_p3)  ;;  %v279_v1 = vld [vmem:[%s1541_s15 + $0x8] sm:$0xff] (%p71_p3)  ;;  %v281_v2 = vld [vmem:[%s1541_s15 + $0x10] sm:$0xff] (%p71_p3) }
  0x12   : > { %278 = vst [vmem:[%s1546_s16] sm:$0xff] (%p71_p3), %v277_v0  ;;  %280 = vst [vmem:[%s1546_s16 + $0x8] sm:$0xff] (%p71_p3), %v279_v1  ;;  %v283_v3 = vld [vmem:[%s1541_s15 + $0x18] sm:$0xff] (%p71_p3)  ;;  %v285_v4 = vld [vmem:[%s1541_s15 + $0x80] sm:$0xff] (%p71_p3) }
  0x13   : > { %282 = vst [vmem:[%s1546_s16 + $0x10] sm:$0xff] (%p71_p3), %v281_v2  ;;  %v287_v5 = vld [vmem:[%s1541_s15 + $0x88] sm:$0xff] (%p71_p3)  ;;  %284 = vst [vmem:[%s1546_s16 + $0x18] sm:$0xff] (%p71_p3), %v283_v3  ;;  %v289_v6 = vld [vmem:[%s1541_s15 + $0x90] sm:$0xff] (%p71_p3) }
  0x14   : > { %286 = vst [vmem:[%s1546_s16 + $0x20] sm:$0xff] (%p71_p3), %v285_v4  ;;  %288 = vst [vmem:[%s1546_s16 + $0x28] sm:$0xff] (%p71_p3), %v287_v5  ;;  %v291_v7 = vld [vmem:[%s1541_s15 + $0x98] sm:$0xff] (%p71_p3)  ;;  %v293_v8 = vld [vmem:[%s1541_s15 + $0x100] sm:$0xff] (%p71_p3) }
  0x15   : > { %290 = vst [vmem:[%s1546_s16 + $0x30] sm:$0xff] %v289_v6  ;;  %292 = vst [vmem:[%s1546_s16 + $0x38] sm:$0xff] %v291_v7  ;;  %v295_v9 = vld [vmem:[%s1541_s15 + $0x108] sm:$0xff]  ;;  %v297_v10 = vld [vmem:[%s1541_s15 + $0x110] sm:$0xff] }
  0x16   : > { %294 = vst [vmem:[%s1546_s16 + $0x40] sm:$0xff] %v293_v8  ;;  %v299_v11 = vld [vmem:[%s1541_s15 + $0x118] sm:$0xff]  ;;  %296 = vst [vmem:[%s1546_s16 + $0x48] sm:$0xff] %v295_v9  ;;  %v301_v12 = vld [vmem:[%s1541_s15 + $0x180] sm:$0xff] }
  0x17   : > { %298 = vst [vmem:[%s1546_s16 + $0x50] sm:$0xff] %v297_v10  ;;  %300 = vst [vmem:[%s1546_s16 + $0x58] sm:$0xff] %v299_v11  ;;  %v303_v13 = vld [vmem:[%s1541_s15 + $0x188] sm:$0xff]  ;;  %v305_v14 = vld [vmem:[%s1541_s15 + $0x190] sm:$0xff] }
  0x18   : > { %302 = vst [vmem:[%s1546_s16 + $0x60] sm:$0xff] %v301_v12  ;;  %304 = vst [vmem:[%s1546_s16 + $0x68] sm:$0xff] %v303_v13  ;;  %v307_v15 = vld [vmem:[%s1541_s15 + $0x198] sm:$0xff]  ;;  %v309_v16 = vld [vmem:[%s1541_s15 + $0x200] sm:$0xff] }
  0x19   : > { %306 = vst [vmem:[%s1546_s16 + $0x70] sm:$0xff] %v305_v14  ;;  %v311_v17 = vld [vmem:[%s1541_s15 + $0x208] sm:$0xff]  ;;  %308 = vst [vmem:[%s1546_s16 + $0x78] sm:$0xff] %v307_v15  ;;  %v313_v18 = vld [vmem:[%s1541_s15 + $0x210] sm:$0xff] }
  0x1a   : > { %310 = vst [vmem:[%s1546_s16 + $0x80] sm:$0xff] %v309_v16  ;;  %312 = vst [vmem:[%s1546_s16 + $0x88] sm:$0xff] %v311_v17  ;;  %v315_v19 = vld [vmem:[%s1541_s15 + $0x218] sm:$0xff]  ;;  %v317_v20 = vld [vmem:[%s1541_s15 + $0x280] sm:$0xff] }
  0x1b   : > { %314 = vst [vmem:[%s1546_s16 + $0x90] sm:$0xff] %v313_v18  ;;  %316 = vst [vmem:[%s1546_s16 + $0x98] sm:$0xff] %v315_v19  ;;  %v319_v21 = vld [vmem:[%s1541_s15 + $0x288] sm:$0xff]  ;;  %v321_v22 = vld [vmem:[%s1541_s15 + $0x290] sm:$0xff] }
  0x1c   : > { %318 = vst [vmem:[%s1546_s16 + $0xa0] sm:$0xff] %v317_v20  ;;  %v323_v23 = vld [vmem:[%s1541_s15 + $0x298] sm:$0xff]  ;;  %320 = vst [vmem:[%s1546_s16 + $0xa8] sm:$0xff] %v319_v21  ;;  %v325_v24 = vld [vmem:[%s1541_s15 + $0x300] sm:$0xff] }
  0x1d   : > { %322 = vst [vmem:[%s1546_s16 + $0xb0] sm:$0xff] %v321_v22  ;;  %324 = vst [vmem:[%s1546_s16 + $0xb8] sm:$0xff] %v323_v23  ;;  %v327_v25 = vld [vmem:[%s1541_s15 + $0x308] sm:$0xff]  ;;  %v329_v26 = vld [vmem:[%s1541_s15 + $0x310] sm:$0xff] }
  0x1e   : > { %326 = vst [vmem:[%s1546_s16 + $0xc0] sm:$0xff] %v325_v24  ;;  %328 = vst [vmem:[%s1546_s16 + $0xc8] sm:$0xff] %v327_v25  ;;  %v331_v27 = vld [vmem:[%s1541_s15 + $0x318] sm:$0xff]  ;;  %v333_v28 = vld [vmem:[%s1541_s15 + $0x380] sm:$0xff] }
  0x1f   : > { %330 = vst [vmem:[%s1546_s16 + $0xd0] sm:$0xff] %v329_v26  ;;  %v335_v29 = vld [vmem:[%s1541_s15 + $0x388] sm:$0xff]  ;;  %332 = vst [vmem:[%s1546_s16 + $0xd8] sm:$0xff] %v331_v27  ;;  %v337_v30 = vld [vmem:[%s1541_s15 + $0x390] sm:$0xff] }
  0x20   : > { %334 = vst [vmem:[%s1546_s16 + $0xe0] sm:$0xff] %v333_v28  ;;  %336 = vst [vmem:[%s1546_s16 + $0xe8] sm:$0xff] %v335_v29  ;;  %v339_v31 = vld [vmem:[%s1541_s15 + $0x398] sm:$0xff]  ;;  %v341_v32 = vld [vmem:[%s1541_s15 + $0x400] sm:$0xff] }
  0x21   : > { %338 = vst [vmem:[%s1546_s16 + $0xf0] sm:$0xff] %v337_v30  ;;  %340 = vst [vmem:[%s1546_s16 + $0xf8] sm:$0xff] %v339_v31  ;;  %v343_v33 = vld [vmem:[%s1541_s15 + $0x408] sm:$0xff]  ;;  %v345_v34 = vld [vmem:[%s1541_s15 + $0x410] sm:$0xff] }
  0x22   : > { %342 = vst [vmem:[%s1546_s16 + $0x100] sm:$0xff] %v341_v32  ;;  %v347_v35 = vld [vmem:[%s1541_s15 + $0x418] sm:$0xff]  ;;  %344 = vst [vmem:[%s1546_s16 + $0x108] sm:$0xff] %v343_v33  ;;  %v349_v36 = vld [vmem:[%s1541_s15 + $0x480] sm:$0xff] }
  0x23   : > { %346 = vst [vmem:[%s1546_s16 + $0x110] sm:$0xff] %v345_v34  ;;  %348 = vst [vmem:[%s1546_s16 + $0x118] sm:$0xff] %v347_v35  ;;  %v351_v37 = vld [vmem:[%s1541_s15 + $0x488] sm:$0xff]  ;;  %v353_v38 = vld [vmem:[%s1541_s15 + $0x490] sm:$0xff] }
  0x24   : > { %350 = vst [vmem:[%s1546_s16 + $0x120] sm:$0xff] %v349_v36  ;;  %352 = vst [vmem:[%s1546_s16 + $0x128] sm:$0xff] %v351_v37  ;;  %v355_v39 = vld [vmem:[%s1541_s15 + $0x498] sm:$0xff]  ;;  %v357_v40 = vld [vmem:[%s1541_s15 + $0x500] sm:$0xff] }
  0x25   : > { %354 = vst [vmem:[%s1546_s16 + $0x130] sm:$0xff] %v353_v38  ;;  %v359_v41 = vld [vmem:[%s1541_s15 + $0x508] sm:$0xff]  ;;  %356 = vst [vmem:[%s1546_s16 + $0x138] sm:$0xff] %v355_v39  ;;  %v361_v42 = vld [vmem:[%s1541_s15 + $0x510] sm:$0xff] }
  0x26   : > { %358 = vst [vmem:[%s1546_s16 + $0x140] sm:$0xff] %v357_v40  ;;  %360 = vst [vmem:[%s1546_s16 + $0x148] sm:$0xff] %v359_v41  ;;  %v363_v43 = vld [vmem:[%s1541_s15 + $0x518] sm:$0xff]  ;;  %v365_v44 = vld [vmem:[%s1541_s15 + $0x580] sm:$0xff] }
  0x27   : > { %362 = vst [vmem:[%s1546_s16 + $0x150] sm:$0xff] %v361_v42  ;;  %364 = vst [vmem:[%s1546_s16 + $0x158] sm:$0xff] %v363_v43  ;;  %v367_v45 = vld [vmem:[%s1541_s15 + $0x588] sm:$0xff]  ;;  %v369_v46 = vld [vmem:[%s1541_s15 + $0x590] sm:$0xff] }
  0x28   : > { %366 = vst [vmem:[%s1546_s16 + $0x160] sm:$0xff] %v365_v44  ;;  %v371_v47 = vld [vmem:[%s1541_s15 + $0x598] sm:$0xff]  ;;  %368 = vst [vmem:[%s1546_s16 + $0x168] sm:$0xff] %v367_v45  ;;  %v373_v48 = vld [vmem:[%s1541_s15 + $0x600] sm:$0xff] }
  0x29   : > { %370 = vst [vmem:[%s1546_s16 + $0x170] sm:$0xff] %v369_v46  ;;  %372 = vst [vmem:[%s1546_s16 + $0x178] sm:$0xff] %v371_v47  ;;  %v375_v49 = vld [vmem:[%s1541_s15 + $0x608] sm:$0xff]  ;;  %v377_v50 = vld [vmem:[%s1541_s15 + $0x610] sm:$0xff] }
  0x2a   : > { %374 = vst [vmem:[%s1546_s16 + $0x180] sm:$0xff] %v373_v48  ;;  %376 = vst [vmem:[%s1546_s16 + $0x188] sm:$0xff] %v375_v49  ;;  %v379_v51 = vld [vmem:[%s1541_s15 + $0x618] sm:$0xff]  ;;  %v381_v52 = vld [vmem:[%s1541_s15 + $0x680] sm:$0xff] }
  0x2b   : > { %378 = vst [vmem:[%s1546_s16 + $0x190] sm:$0xff] %v377_v50  ;;  %v383_v53 = vld [vmem:[%s1541_s15 + $0x688] sm:$0xff]  ;;  %380 = vst [vmem:[%s1546_s16 + $0x198] sm:$0xff] %v379_v51  ;;  %v385_v54 = vld [vmem:[%s1541_s15 + $0x690] sm:$0xff] }
  0x2c   : > { %382 = vst [vmem:[%s1546_s16 + $0x1a0] sm:$0xff] %v381_v52  ;;  %384 = vst [vmem:[%s1546_s16 + $0x1a8] sm:$0xff] %v383_v53  ;;  %v387_v55 = vld [vmem:[%s1541_s15 + $0x698] sm:$0xff]  ;;  %v389_v56 = vld [vmem:[%s1541_s15 + $0x700] sm:$0xff] }
  0x2d   : > { %386 = vst [vmem:[%s1546_s16 + $0x1b0] sm:$0xff] %v385_v54  ;;  %388 = vst [vmem:[%s1546_s16 + $0x1b8] sm:$0xff] %v387_v55  ;;  %v391_v57 = vld [vmem:[%s1541_s15 + $0x708] sm:$0xff]  ;;  %v393_v58 = vld [vmem:[%s1541_s15 + $0x710] sm:$0xff] }
  0x2e   : > { %390 = vst [vmem:[%s1546_s16 + $0x1c0] sm:$0xff] %v389_v56  ;;  %v395_v59 = vld [vmem:[%s1541_s15 + $0x718] sm:$0xff]  ;;  %392 = vst [vmem:[%s1546_s16 + $0x1c8] sm:$0xff] %v391_v57  ;;  %v397_v60 = vld [vmem:[%s1541_s15 + $0x780] sm:$0xff] }
  0x2f   : > { %394 = vst [vmem:[%s1546_s16 + $0x1d0] sm:$0xff] %v393_v58  ;;  %396 = vst [vmem:[%s1546_s16 + $0x1d8] sm:$0xff] %v395_v59  ;;  %v399_v61 = vld [vmem:[%s1541_s15 + $0x788] sm:$0xff]  ;;  %v401_v62 = vld [vmem:[%s1541_s15 + $0x790] sm:$0xff] }
  0x30   : > { %398 = vst [vmem:[%s1546_s16 + $0x1e0] sm:$0xff] %v397_v60  ;;  %400 = vst [vmem:[%s1546_s16 + $0x1e8] sm:$0xff] %v399_v61  ;;  %v403_v63 = vld [vmem:[%s1541_s15 + $0x798] sm:$0xff] }
  0x31   : > { %402 = vst [vmem:[%s1546_s16 + $0x1f0] sm:$0xff] %v401_v62  ;;  %404 = vst [vmem:[%s1546_s16 + $0x1f8] sm:$0xff] %v403_v63 }
  0x32 PF: > { %p1151_p6 = scmp.ge.s32.totalorder %s1454_s28, 1  ;;  %p426_p7 = scmp.lt.s32.totalorder %s1454_s28, 5 }
  0x34   : > { %p427_p8 = pnand %p1151_p6, %p426_p7 }
  0x35   : > { %s433_s17 = sand.u32 (!%p427_p8), 1, %s1438_s24   ;;  %s1153_s18 = sshll.u32 (!%p427_p8), %s1446_s26, 2 }
  0x36   : > { %430 = sbr.rel (%p427_p8) target bundleno = 872 (0x368), region = 67  ;;  %s1152_s19 = sshll.u32 (!%p427_p8), %s433_s17, 9 }
  0x37   : > { %p486_p9 = scmp.lt.s32.totalorder (!%p427_p8), %s1153_s18, 15  ;;  %s1154_s20 = sshll.u32 (!%p427_p8), %s1446_s26, 6 }
  0x38   : > { %p491_p10 = scmp.lt.s32.totalorder (!%p427_p8), %s1154_s20, 255  ;;  %s1689_s24 = scalar_lea.vmem (!%p427_p8), [#allocation3], %s1152_s19 }
  0x39   : > { %p1156_p11 = scmp.ne.s32.totalorder (!%p427_p8), %s1446_s26, 0 }
  0x3d   : > { %s1887_s18 = smov (!%p486_p9, %s1153_s18), 15  ;;  %s1889_s20 = smov (!%p491_p10, %s1154_s20), 255 }
  0x3e   : > { %s488_s23 = scalar_lea.vmem %s1874_s2, %s1887_s18  ;;  %s1155_s30 = sshll.u32 %s1889_s20, 3  ;;  %v1456_v0 = vmov (!%p1156_p11), 0.0  }
  0x3f   : > { %s1687_s11 = scalar_lea.vmem %s1875_s3, %s1155_s30  ;;  %505 = sbr.rel (%p1156_p11) target bundleno = 70 (0x46), region = 75  ;;  %506 = vst [vmem:[#allocation2] sm:$0xff] (!%p1156_p11), %v1456_v0  ;;  %507 = vst [vmem:[#allocation2 + $0x8] sm:$0xff] (!%p1156_p11), %v1456_v0 }
  0x46 PF: > { %v511_v1 = vld [vmem:[%s1689_s24 + $0x8] sm:$0xff]  ;;  %v513_v3 = vld [vmem:[%s1689_s24 + $0x18] sm:$0xff]  ;;  %v510_v6 = vld [vmem:[%s1689_s24] sm:$0xff]  ;;  %v1457_v8 = vmov 0.0   ;;  %p1157_p12 = scmp.ne.s32.totalorder %s1446_s26, 3 }
  0x47   : > { %v515_v2 = vld [vmem:[%s1689_s24 + $0x28] sm:$0xff]  ;;  %v517_v5 = vld [vmem:[%s1689_s24 + $0x38] sm:$0xff]  ;;  %v514_v7 = vld [vmem:[%s1689_s24 + $0x20] sm:$0xff]  ;;  %660 = vmatprep.mubr.f32.mxu0 %v1457_v8  ;;  %737 = vmatprep.mubr.f32.mxu1 %v1457_v8 }
  0x48   : > { %v1242_v4 = vpack.c.bf16 %v515_v2, %v511_v1  ;;  %v1274_v9 = vpack.c.bf16 %v517_v5, %v513_v3  ;;  %v1244_v10 = vpack.c.bf16 %v514_v7, %v510_v6  ;;  %v512_v11 = vld [vmem:[%s1689_s24 + $0x10] sm:$0xff]  ;;  %v519_v13 = vld [vmem:[%s1689_s24 + $0x48] sm:$0xff]  ;;  %v521_v16 = vld [vmem:[%s1689_s24 + $0x58] sm:$0xff] }
  0x49   : > { %v516_v12 = vld [vmem:[%s1689_s24 + $0x30] sm:$0xff]  ;;  %v523_v15 = vld [vmem:[%s1689_s24 + $0x68] sm:$0xff]  ;;  %v525_v17 = vld [vmem:[%s1689_s24 + $0x78] sm:$0xff] }
  0x4a   : > { %1243 = vmatprep.subr.bf16.mxu0 %v1242_v4  ;;  %v1276_v14 = vpack.c.bf16 %v516_v12, %v512_v11  ;;  %1275 = vmatprep.subr.bf16.mxu1 %v1274_v9  ;;  %v1246_v18 = vpack.c.bf16 %v523_v15, %v519_v13  ;;  %v1278_v19 = vpack.c.bf16 %v525_v17, %v521_v16  ;;  %v518_v20 = vld [vmem:[%s1689_s24 + $0x40] sm:$0xff]  ;;  %v520_v22 = vld [vmem:[%s1689_s24 + $0x50] sm:$0xff]  ;;  %v527_v25 = vld [vmem:[%s1689_s24 + $0x88] sm:$0xff] }
  0x4b   : > { %1245 = vmatpush1.bf16.msra.mxu0 %v1244_v10  ;;  %v522_v21 = vld [vmem:[%s1689_s24 + $0x60] sm:$0xff]  ;;  %v524_v24 = vld [vmem:[%s1689_s24 + $0x70] sm:$0xff]  ;;  %v531_v26 = vld [vmem:[%s1689_s24 + $0xa8] sm:$0xff] }
  0x4c   : > { %1277 = vmatpush1.bf16.msra.mxu1 %v1276_v14  ;;  %v1248_v23 = vpack.c.bf16 %v522_v21, %v518_v20  ;;  %1247 = vmatprep.subr.bf16.mxu0 %v1246_v18  ;;  %v1280_v27 = vpack.c.bf16 %v524_v24, %v520_v22  ;;  %v1250_v28 = vpack.c.bf16 %v531_v26, %v527_v25  ;;  %v529_v29 = vld [vmem:[%s1689_s24 + $0x98] sm:$0xff]  ;;  %v526_v31 = vld [vmem:[%s1689_s24 + $0x80] sm:$0xff]  ;;  %v528_v34 = vld [vmem:[%s1689_s24 + $0x90] sm:$0xff] }
  0x4d   : > { %1279 = vmatprep.subr.bf16.mxu1 %v1278_v19  ;;  %v533_v30 = vld [vmem:[%s1689_s24 + $0xb8] sm:$0xff]  ;;  %v530_v33 = vld [vmem:[%s1689_s24 + $0xa0] sm:$0xff]  ;;  %v532_v35 = vld [vmem:[%s1689_s24 + $0xb0] sm:$0xff] }
  0x4e   : > { %v1282_v32 = vpack.c.bf16 %v533_v30, %v529_v29  ;;  %v1252_v36 = vpack.c.bf16 %v530_v33, %v526_v31  ;;  %v535_v37 = vld [vmem:[%s1689_s24 + $0xc8] sm:$0xff]  ;;  %v537_v39 = vld [vmem:[%s1689_s24 + $0xd8] sm:$0xff]  ;;  %v1284_v40 = vpack.c.bf16 %v532_v35, %v528_v34  ;;  %v534_v43 = vld [vmem:[%s1689_s24 + $0xc0] sm:$0xff] }
  0x4f   : > { %1249 = vmatpush1.bf16.msra.mxu0 %v1248_v23  ;;  %v539_v38 = vld [vmem:[%s1689_s24 + $0xe8] sm:$0xff]  ;;  %v541_v42 = vld [vmem:[%s1689_s24 + $0xf8] sm:$0xff]  ;;  %v538_v44 = vld [vmem:[%s1689_s24 + $0xe0] sm:$0xff] }
  0x50   : > { %1281 = vmatpush1.bf16.msra.mxu1 %v1280_v27  ;;  %1251 = vmatprep.subr.bf16.mxu0 %v1250_v28  ;;  %v1254_v41 = vpack.c.bf16 %v539_v38, %v535_v37  ;;  %v1286_v45 = vpack.c.bf16 %v541_v42, %v537_v39  ;;  %v536_v46 = vld [vmem:[%s1689_s24 + $0xd0] sm:$0xff]  ;;  %v543_v48 = vld [vmem:[%s1689_s24 + $0x108] sm:$0xff]  ;;  %v545_v50 = vld [vmem:[%s1689_s24 + $0x118] sm:$0xff]  ;;  %v1256_v52 = vpack.c.bf16 %v538_v44, %v534_v43 }
  0x51   : > { %1283 = vmatprep.subr.bf16.mxu1 %v1282_v32  ;;  %v540_v47 = vld [vmem:[%s1689_s24 + $0xf0] sm:$0xff]  ;;  %v547_v49 = vld [vmem:[%s1689_s24 + $0x128] sm:$0xff]  ;;  %v549_v51 = vld [vmem:[%s1689_s24 + $0x138] sm:$0xff] }
  0x52   : > { %v1288_v53 = vpack.c.bf16 %v540_v47, %v536_v46  ;;  %v1258_v54 = vpack.c.bf16 %v547_v49, %v543_v48  ;;  %v542_v55 = vld [vmem:[%s1689_s24 + $0x100] sm:$0xff]  ;;  %v544_v57 = vld [vmem:[%s1689_s24 + $0x110] sm:$0xff]  ;;  %v1290_v58 = vpack.c.bf16 %v549_v51, %v545_v50  ;;  %v551_v60 = vld [vmem:[%s1689_s24 + $0x148] sm:$0xff] }
  0x53   : > { %1253 = vmatpush1.bf16.msra.mxu0 %v1252_v36  ;;  %v546_v56 = vld [vmem:[%s1689_s24 + $0x120] sm:$0xff]  ;;  %v548_v59 = vld [vmem:[%s1689_s24 + $0x130] sm:$0xff]  ;;  %v555_v61 = vld [vmem:[%s1689_s24 + $0x168] sm:$0xff] }
  0x54   : > { %1285 = vmatpush1.bf16.msra.mxu1 %v1284_v40  ;;  %1255 = vmatprep.subr.bf16.mxu0 %v1254_v41  ;;  %v553_v62 = vld [vmem:[%s1689_s24 + $0x158] sm:$0xff]  ;;  %v1260_v0 = vpack.c.bf16 %v546_v56, %v542_v55  ;;  %v1292_v1 = vpack.c.bf16 %v548_v59, %v544_v57  ;;  %v1262_v2 = vpack.c.bf16 %v555_v61, %v551_v60  ;;  %v550_v3 = vld [vmem:[%s1689_s24 + $0x140] sm:$0xff]  ;;  %v552_v5 = vld [vmem:[%s1689_s24 + $0x150] sm:$0xff] }
  0x55   : > { %1287 = vmatprep.subr.bf16.mxu1 %v1286_v45  ;;  %v557_v63 = vld [vmem:[%s1689_s24 + $0x178] sm:$0xff]  ;;  %v554_v4 = vld [vmem:[%s1689_s24 + $0x160] sm:$0xff]  ;;  %v556_v7 = vld [vmem:[%s1689_s24 + $0x170] sm:$0xff] }
  0x56   : > { %v1294_v6 = vpack.c.bf16 %v557_v63, %v553_v62  ;;  %v559_v9 = vld [vmem:[%s1689_s24 + $0x188] sm:$0xff]  ;;  %v561_v11 = vld [vmem:[%s1689_s24 + $0x198] sm:$0xff]  ;;  %v1264_v13 = vpack.c.bf16 %v554_v4, %v550_v3  ;;  %v1296_v14 = vpack.c.bf16 %v556_v7, %v552_v5  ;;  %v558_v16 = vld [vmem:[%s1689_s24 + $0x180] sm:$0xff] }
  0x57   : > { %1257 = vmatpush1.bf16.msra.mxu0 %v1256_v52  ;;  %v563_v10 = vld [vmem:[%s1689_s24 + $0x1a8] sm:$0xff]  ;;  %v565_v12 = vld [vmem:[%s1689_s24 + $0x1b8] sm:$0xff]  ;;  %v562_v17 = vld [vmem:[%s1689_s24 + $0x1a0] sm:$0xff] }
  0x58   : > { %1289 = vmatpush1.bf16.msra.mxu1 %v1288_v53  ;;  %1259 = vmatprep.subr.bf16.mxu0 %v1258_v54  ;;  %v1266_v15 = vpack.c.bf16 %v563_v10, %v559_v9  ;;  %v560_v18 = vld [vmem:[%s1689_s24 + $0x190] sm:$0xff]  ;;  %v1298_v19 = vpack.c.bf16 %v565_v12, %v561_v11  ;;  %v567_v21 = vld [vmem:[%s1689_s24 + $0x1c8] sm:$0xff]  ;;  %v569_v23 = vld [vmem:[%s1689_s24 + $0x1d8] sm:$0xff]  ;;  %v1268_v25 = vpack.c.bf16 %v562_v17, %v558_v16 }
  0x59   : > { %1291 = vmatprep.subr.bf16.mxu1 %v1290_v58  ;;  %v564_v20 = vld [vmem:[%s1689_s24 + $0x1b0] sm:$0xff]  ;;  %v571_v22 = vld [vmem:[%s1689_s24 + $0x1e8] sm:$0xff]  ;;  %v573_v24 = vld [vmem:[%s1689_s24 + $0x1f8] sm:$0xff] }
  0x5a   : > { %v1300_v26 = vpack.c.bf16 %v564_v20, %v560_v18  ;;  %v1270_v27 = vpack.c.bf16 %v571_v22, %v567_v21  ;;  %v566_v28 = vld [vmem:[%s1689_s24 + $0x1c0] sm:$0xff]  ;;  %v568_v30 = vld [vmem:[%s1689_s24 + $0x1d0] sm:$0xff]  ;;  %v1302_v31 = vpack.c.bf16 %v573_v24, %v569_v23  ;;  %v777_v34 = vld [vmem:[%s1687_s11 + $0x88] sm:$0xff] }
  0x5b   : > { %1261 = vmatpush1.bf16.msra.mxu0 %v1260_v0  ;;  %v570_v29 = vld [vmem:[%s1689_s24 + $0x1e0] sm:$0xff]  ;;  %v572_v32 = vld [vmem:[%s1689_s24 + $0x1f0] sm:$0xff]  ;;  %v809_v36 = vld [vmem:[%s1687_s11 + $0x188] sm:$0xff] }
  0x5c   : > { %1293 = vmatpush1.bf16.msra.mxu1 %v1292_v1  ;;  %1263 = vmatprep.subr.bf16.mxu0 %v1262_v2  ;;  %v776_v33 = vld [vmem:[%s1687_s11 + $0x80] sm:$0xff]  ;;  %v1272_v37 = vpack.c.bf16 %v570_v29, %v566_v28  ;;  %v1304_v38 = vpack.c.bf16 %v572_v32, %v568_v30  ;;  %v761_v42 = vld [vmem:[%s1687_s11 + $0x8] sm:$0xff]  ;;  %v778_v45 = vld [vmem:[%s1687_s11 + $0x90] sm:$0xff] }
  0x5d   : > { %1295 = vmatprep.subr.bf16.mxu1 %v1294_v6  ;;  %v808_v35 = vld [vmem:[%s1687_s11 + $0x180] sm:$0xff]  ;;  %v1306_v39 = vpack.c.bf16 %v777_v34, %v776_v33  ;;  %v793_v44 = vld [vmem:[%s1687_s11 + $0x108] sm:$0xff]  ;;  %v779_v46 = vld [vmem:[%s1687_s11 + $0x98] sm:$0xff] }
  0x5e   : > { %v1338_v40 = vpack.c.bf16 %v809_v36, %v808_v35  ;;  %v760_v41 = vld [vmem:[%s1687_s11] sm:$0xff]  ;;  %v810_v48 = vld [vmem:[%s1687_s11 + $0x190] sm:$0xff]  ;;  %v811_v49 = vld [vmem:[%s1687_s11 + $0x198] sm:$0xff]  ;;  %v1310_v52 = vpack.c.bf16 %v779_v46, %v778_v45 }
  0x5f   : > { %1265 = vmatpush1.bf16.msra.mxu0 %v1264_v13  ;;  %v792_v43 = vld [vmem:[%s1687_s11 + $0x100] sm:$0xff]  ;;  %v1308_v50 = vpack.c.bf16 %v761_v42, %v760_v41  ;;  %v762_v53 = vld [vmem:[%s1687_s11 + $0x10] sm:$0xff]  ;;  %v763_v54 = vld [vmem:[%s1687_s11 + $0x18] sm:$0xff]  ;;  %v1342_v56 = vpack.c.bf16 %v811_v49, %v810_v48 }
  0x60   : > { %1297 = vmatpush1.bf16.msra.mxu1 %v1296_v14  ;;  %1267 = vmatprep.subr.bf16.mxu0 %v1266_v15  ;;  %v508_v47 = vld [vmem:[%s1872_s0] sm:$0xff]  ;;  %v1340_v51 = vpack.c.bf16 %v793_v44, %v792_v43  ;;  %v794_v55 = vld [vmem:[%s1687_s11 + $0x110] sm:$0xff]  ;;  %v795_v57 = vld [vmem:[%s1687_s11 + $0x118] sm:$0xff]  ;;  %v1312_v63 = vpack.c.bf16 %v763_v54, %v762_v53 }
  0x61   : > { %1299 = vmatprep.subr.bf16.mxu1 %v1298_v19  ;;  %v780_v58 = vld [vmem:[%s1687_s11 + $0xa0] sm:$0xff]  ;;  %v781_v59 = vld [vmem:[%s1687_s11 + $0xa8] sm:$0xff]  ;;  %v1344_v0 = vpack.c.bf16 %v795_v57, %v794_v55  ;;  %v782_v7 = vld [vmem:[%s1687_s11 + $0xb0] sm:$0xff] }
  0x62   : > { %v509_v60 = vld [vmem:[%s1872_s0 + $0x8] sm:$0xff]  ;;  %v812_v61 = vld [vmem:[%s1687_s11 + $0x1a0] sm:$0xff]  ;;  %v1314_v1 = vpack.c.bf16 %v781_v59, %v780_v58  ;;  %v814_v9 = vld [vmem:[%s1687_s11 + $0x1b0] sm:$0xff] }
  0x63   : > { %1269 = vmatpush1.bf16.msra.mxu0 %v1268_v25  ;;  %v813_v62 = vld [vmem:[%s1687_s11 + $0x1a8] sm:$0xff]  ;;  %v764_v2 = vld [vmem:[%s1687_s11 + $0x20] sm:$0xff]  ;;  %v815_v10 = vld [vmem:[%s1687_s11 + $0x1b8] sm:$0xff] }
  0x64   : > { %1301 = vmatpush1.bf16.msra.mxu1 %v1300_v26  ;;  %1271 = vmatprep.subr.bf16.mxu0 %v1270_v27  ;;  %v765_v3 = vld [vmem:[%s1687_s11 + $0x28] sm:$0xff]  ;;  %v796_v4 = vld [vmem:[%s1687_s11 + $0x120] sm:$0xff]  ;;  %v1346_v5 = vpack.c.bf16 %v813_v62, %v812_v61  ;;  %v766_v14 = vld [vmem:[%s1687_s11 + $0x30] sm:$0xff]  ;;  %v1350_v17 = vpack.c.bf16 %v815_v10, %v814_v9 }
  0x65   : > { %1303 = vmatprep.subr.bf16.mxu1 %v1302_v31  ;;  %v797_v6 = vld [vmem:[%s1687_s11 + $0x128] sm:$0xff]  ;;  %v1316_v11 = vpack.c.bf16 %v765_v3, %v764_v2  ;;  %v767_v15 = vld [vmem:[%s1687_s11 + $0x38] sm:$0xff]  ;;  %v798_v16 = vld [vmem:[%s1687_s11 + $0x130] sm:$0xff] }
  0x66   : > { %v1348_v12 = vpack.c.bf16 %v797_v6, %v796_v4  ;;  %v799_v18 = vld [vmem:[%s1687_s11 + $0x138] sm:$0xff]  ;;  %v784_v19 = vld [vmem:[%s1687_s11 + $0xc0] sm:$0xff]  ;;  %v785_v20 = vld [vmem:[%s1687_s11 + $0xc8] sm:$0xff]  ;;  %v1320_v23 = vpack.c.bf16 %v767_v15, %v766_v14 }
  0x67   : > { %1273 = vmatpush1.bf16.msra.mxu0 %v1272_v37  ;;  %v816_v21 = vld [vmem:[%s1687_s11 + $0x1c0] sm:$0xff]  ;;  %v817_v22 = vld [vmem:[%s1687_s11 + $0x1c8] sm:$0xff]  ;;  %v1352_v24 = vpack.c.bf16 %v799_v18, %v798_v16  ;;  %v1322_v25 = vpack.c.bf16 %v785_v20, %v784_v19  ;;  %v786_v31 = vld [vmem:[%s1687_s11 + $0xd0] sm:$0xff] }
  0x68   : > { %1305 = vmatpush1.bf16.msra.mxu1 %v1304_v38  ;;  %1307 = vmatprep.subr.bf16.mxu0 %v1306_v39  ;;  %v768_v26 = vld [vmem:[%s1687_s11 + $0x40] sm:$0xff]  ;;  %v769_v27 = vld [vmem:[%s1687_s11 + $0x48] sm:$0xff]  ;;  %v1354_v29 = vpack.c.bf16 %v817_v22, %v816_v21  ;;  %v787_v32 = vld [vmem:[%s1687_s11 + $0xd8] sm:$0xff] }
  0x69   : > { %1339 = vmatprep.subr.bf16.mxu1 %v1338_v40  ;;  %v800_v28 = vld [vmem:[%s1687_s11 + $0x140] sm:$0xff]  ;;  %v801_v30 = vld [vmem:[%s1687_s11 + $0x148] sm:$0xff]  ;;  %v818_v33 = vld [vmem:[%s1687_s11 + $0x1d0] sm:$0xff]  ;;  %v1324_v35 = vpack.c.bf16 %v769_v27, %v768_v26  ;;  %v1326_v37 = vpack.c.bf16 %v787_v32, %v786_v31 }
  0x6a   : > { %661 = vmatmul.mubr.f32.vlgmr.msra.gmra.mrb[0].mxu0 %v508_v47  ;;  %v819_v34 = vld [vmem:[%s1687_s11 + $0x1d8] sm:$0xff]  ;;  %v1356_v36 = vpack.c.bf16 %v801_v30, %v800_v28  ;;  %v770_v38 = vld [vmem:[%s1687_s11 + $0x50] sm:$0xff]  ;;  %v788_v43 = vld [vmem:[%s1687_s11 + $0xe0] sm:$0xff] }
  0x6b   : > { %738 = vmatmul.mubr.f32.vlgmr.msra.gmra.mrb[0].mxu1 %v508_v47  ;;  %666 = vmatprep.mubr.f32.mxu0 %v1457_v8  ;;  %v771_v39 = vld [vmem:[%s1687_s11 + $0x58] sm:$0xff]  ;;  %v802_v40 = vld [vmem:[%s1687_s11 + $0x150] sm:$0xff]  ;;  %v1358_v41 = vpack.c.bf16 %v819_v34, %v818_v33  ;;  %v789_v44 = vld [vmem:[%s1687_s11 + $0xe8] sm:$0xff] }
  0x6c   : > { %743 = vmatprep.mubr.f32.mxu1 %v1457_v8  ;;  %1309 = vmatpush3.bf16.msra.mxu0 %v1308_v50  ;;  %v783_v8 = vld [vmem:[%s1687_s11 + $0xb8] sm:$0xff]  ;;  %v820_v45 = vld [vmem:[%s1687_s11 + $0x1e0] sm:$0xff]  ;;  %v821_v46 = vld [vmem:[%s1687_s11 + $0x1e8] sm:$0xff]  ;;  %v1328_v47 = vpack.c.bf16 %v771_v39, %v770_v38  ;;  %v1330_v49 = vpack.c.bf16 %v789_v44, %v788_v43 }
  0x6d   : > { %1341 = vmatpush3.bf16.msra.mxu1 %v1340_v51  ;;  %1311 = vmatprep.subr.bf16.mxu0 %v1310_v52  ;;  %v1318_v13 = vpack.c.bf16 %v783_v8, %v782_v7  ;;  %v803_v42 = vld [vmem:[%s1687_s11 + $0x158] sm:$0xff]  ;;  %v1362_v50 = vpack.c.bf16 %v821_v46, %v820_v45  ;;  %v772_v51 = vld [vmem:[%s1687_s11 + $0x60] sm:$0xff]  ;;  %v773_v52 = vld [vmem:[%s1687_s11 + $0x68] sm:$0xff] }
  0x6e   : > { %667 = vmatmul.mubr.f32.gmra.mrb[2].mxu0 %v509_v60  ;;  %1343 = vmatprep.subr.bf16.mxu1 %v1342_v56  ;;  %v1360_v48 = vpack.c.bf16 %v803_v42, %v802_v40  ;;  %v804_v53 = vld [vmem:[%s1687_s11 + $0x160] sm:$0xff]  ;;  %v1332_v54 = vpack.c.bf16 %v773_v52, %v772_v51  ;;  %v805_v55 = vld [vmem:[%s1687_s11 + $0x168] sm:$0xff]  ;;  %v790_v57 = vld [vmem:[%s1687_s11 + $0xf0] sm:$0xff] }
  0x6f   : > { %744 = vmatmul.mubr.f32.gmra.mrb[2].mxu1 %v509_v60  ;;  %v1364_v56 = vpack.c.bf16 %v805_v55, %v804_v53  ;;  %v791_v58 = vld [vmem:[%s1687_s11 + $0xf8] sm:$0xff]  ;;  %v822_v59 = vld [vmem:[%s1687_s11 + $0x1f0] sm:$0xff]  ;;  %v574_v8 = vld [vmem:[%s488_s23] sm:$0xf] }
  0x70   : > { %1313 = vmatpush3.bf16.msra.mxu0 %v1312_v63  ;;  %v1334_v60 = vpack.c.bf16 %v791_v58, %v790_v57  ;;  %v823_v61 = vld [vmem:[%s1687_s11 + $0x1f8] sm:$0xff]  ;;  %v774_v62 = vld [vmem:[%s1687_s11 + $0x70] sm:$0xff]  ;;  %v758_v46 = vld [vmem:[#allocation2] sm:$0xff] }
  0x71   : > { %1345 = vmatpush3.bf16.msra.mxu1 %v1344_v0  ;;  %1315 = vmatprep.subr.bf16.mxu0 %v1314_v1  ;;  %v775_v63 = vld [vmem:[%s1687_s11 + $0x78] sm:$0xff]  ;;  %v1366_v0 = vpack.c.bf16 %v823_v61, %v822_v59  ;;  %v806_v2 = vld [vmem:[%s1687_s11 + $0x170] sm:$0xff]  ;;  %v759_v55 = vld [vmem:[#allocation2 + $0x8] sm:$0xff] }
  0x72   : > { %1347 = vmatprep.subr.bf16.mxu1 %v1346_v5  ;;  %v1336_v1 = vpack.c.bf16 %v775_v63, %v774_v62  ;;  %v807_v3 = vld [vmem:[%s1687_s11 + $0x178] sm:$0xff]  ;;  %v576_v5 = vlaneseq  ;;  %v1158_v59 = vld [vmem:[%s1876_s4] ss:$0 sm:$0xff] (!%p1157_p12) }
  0x73   : > { %v1368_v4 = vpack.c.bf16 %v807_v3, %v806_v2 }
  0x74   : > { %1317 = vmatpush3.bf16.msra.mxu0 %v1316_v11  ;;  %v577_v6 = vshrl.u32 %v576_v5, 7 }
  0x75   : > { %1349 = vmatpush3.bf16.msra.mxu1 %v1348_v12  ;;  %1319 = vmatprep.subr.bf16.mxu0 %v1318_v13 }
  0x76   : > { %1351 = vmatprep.subr.bf16.mxu1 %v1350_v17  ;;  %v578_v7 = vsub.s32 0, %v577_v6  ;;  %v586_v9 = vsub.s32 2, %v577_v6  ;;  %v582_v10 = vsub.s32 1, %v577_v6  ;;  %v590_v11 = vsub.s32 3, %v577_v6 }
  0x78   : > { %1321 = vmatpush3.bf16.msra.mxu0 %v1320_v23  ;;  %v579_v12 = vrot.slane %v574_v8, %v578_v7  ;;  %v587_v13 = vrot.slane %v574_v8, %v586_v9  ;;  %v583_v14 = vrot.slane %v574_v8, %v582_v10  ;;  %v591_v15 = vrot.slane %v574_v8, %v590_v11 }
  0x79   : > { %1353 = vmatpush3.bf16.msra.mxu1 %v1352_v24  ;;  %1323 = vmatprep.subr.bf16.mxu0 %v1322_v25 }
  0x7a   : > { %1355 = vmatprep.subr.bf16.mxu1 %v1354_v29 }
  0x7c   : > { %1325 = vmatpush3.bf16.msra.mxu0 %v1324_v35 }
  0x7d   : > { %1357 = vmatpush3.bf16.msra.mxu1 %v1356_v36  ;;  %1327 = vmatprep.subr.bf16.mxu0 %v1326_v37 }
  0x7e   : > { %1359 = vmatprep.subr.bf16.mxu1 %v1358_v41 }
  0x80   : > { %1329 = vmatpush3.bf16.msra.mxu0 %v1328_v47 }
  0x81   : > { %1361 = vmatpush3.bf16.msra.mxu1 %v1360_v48  ;;  %1331 = vmatprep.subr.bf16.mxu0 %v1330_v49 }
  0x82   : > { %1363 = vmatprep.subr.bf16.mxu1 %v1362_v50 }
  0x84   : > { %1333 = vmatpush3.bf16.msra.mxu0 %v1332_v54 }
  0x85   : > { %1365 = vmatpush3.bf16.msra.mxu1 %v1364_v56  ;;  %1335 = vmatprep.subr.bf16.mxu0 %v1334_v60  ;;  %v993_v60 = vld [vmem:[%s1872_s0] sm:$0xff] (!%p1157_p12) }
  0x86   : > { %1367 = vmatprep.subr.bf16.mxu1 %v1366_v0  ;;  %v994_v0 = vld [vmem:[%s1872_s0 + $0x8] sm:$0xff] (!%p1157_p12) }
  0x88   : > { %1337 = vmatpush3.bf16.msra.mxu0 %v1336_v1 }
  0x89   : > { %1369 = vmatpush3.bf16.msra.mxu1 %v1368_v4 }
 0x13d   : > { %v662_v16 = vpop.f32.mrb[0].mxu0 }
 0x13e   : > { %v663_v17 = vadd.f32 %v662_v16, %v579_v12  ;;  %v739_v18 = vpop.f32.mrb[0].mxu1  ;;  %v664_v19 = vpop.f32.mrb[1].mxu0 }
 0x13f   : > { %v740_v20 = vadd.f32 %v739_v18, %v587_v13  ;;  %v665_v21 = vadd.f32 %v664_v19, %v583_v14  ;;  %v741_v22 = vpop.f32.mrb[1].mxu1  ;;  %v1159_v18 = vld [vmem:[%s1877_s5] ss:$0 sm:$0xff] (!%p1157_p12) }
 0x140   : > { %v742_v23 = vadd.f32 %v741_v22, %v591_v15  ;;  %v750_v26 = vmax.f32 %v663_v17, 0.0 }
 0x141   : > { %v751_v24 = vmax.f32 %v665_v21, 0.0  ;;  %v668_v25 = vpop.f32.mrb[2].mxu0  ;;  %v752_v31 = vmax.f32 %v740_v20, 0.0  ;;  %v1160_v20 = vld [vmem:[%s1878_s6] ss:$0 sm:$0xff] (!%p1157_p12) }
 0x142   : > { %v753_v27 = vmax.f32 %v742_v23, 0.0  ;;  %v669_v28 = vadd.f32 %v668_v25, %v579_v12  ;;  %v745_v29 = vpop.f32.mrb[2].mxu1  ;;  %v670_v30 = vpop.f32.mrb[3].mxu0 }
 0x143   : > { %v746_v32 = vadd.f32 %v745_v29, %v587_v13  ;;  %v671_v33 = vadd.f32 %v670_v30, %v583_v14  ;;  %v747_v34 = vpop.f32.mrb[3].mxu1  ;;  %888 = vmatprep.mubr.f32.mxu0 %v751_v24 }
 0x144   : > { %v748_v35 = vadd.f32 %v747_v34, %v591_v15  ;;  %963 = vmatprep.mubr.f32.mxu1 %v753_v27  ;;  %889 = vmatmul.mubr.f32.vlgmr.msra.gmra.mrb[4].mxu0 %v750_v26  ;;  %v754_v37 = vmax.f32 %v669_v28, 0.0 }
 0x145   : > { %v755_v36 = vmax.f32 %v671_v33, 0.0  ;;  %964 = vmatmul.mubr.f32.vlgmr.msra.gmra.mrb[4].mxu1 %v752_v31  ;;  %v756_v39 = vmax.f32 %v746_v32, 0.0 }
 0x146   : > { %v757_v38 = vmax.f32 %v748_v35, 0.0 }
 0x147   : > { %893 = vmatprep.mubr.f32.mxu0 %v755_v36 }
 0x148   : > { %968 = vmatprep.mubr.f32.mxu1 %v757_v38  ;;  %894 = vmatmul.mubr.f32.gmra.mrb[6].mxu0 %v754_v37 }
 0x149   : > { %969 = vmatmul.mubr.f32.gmra.mrb[6].mxu1 %v756_v39 }
 0x217   : > { %v1198_v40 = vpop.f32.mrb[4].mxu0 }
 0x218   : > { %v1236_v41 = vpop.f32.mrb[4].mxu1  ;;  %v1199_v42 = vpop.f32.mrb[5].mxu0 }
 0x219   : > { %v1200_v43 = vadd.f32 %v1199_v42, %v1198_v40  ;;  %v1237_v44 = vpop.f32.mrb[5].mxu1 }
 0x21a   : > { %v1238_v45 = vadd.f32 %v1237_v44, %v1236_v41 }
 0x21b   : > { %v1201_v47 = vpop.f32.mrb[6].mxu0 }
 0x21c   : > { %v966_v48 = vadd.f32 %v1238_v45, %v1200_v43  ;;  %v1239_v49 = vpop.f32.mrb[6].mxu1  ;;  %v1202_v50 = vpop.f32.mrb[7].mxu0 }
 0x21d   : > { %v1203_v51 = vadd.f32 %v1202_v50, %v1201_v47  ;;  %v1240_v52 = vpop.f32.mrb[7].mxu1 }
 0x21e   : > { %v974_v53 = vadd.f32 %v966_v48, %v758_v46  ;;  %v1241_v54 = vadd.f32 %v1240_v52, %v1239_v49  ;;  %981 = sbr.rel (%p1157_p12) target bundleno = 872 (0x368), region = 79 }
 0x220   : > { %976 = vst [vmem:[#allocation2] sm:$0xff] %v974_v53  ;;  %v971_v56 = vadd.f32 %v1241_v54, %v1203_v51 }
 0x222   : > { %v975_v57 = vadd.f32 %v971_v56, %v759_v55 }
 0x224   : > { %977 = vst [vmem:[#allocation2 + $0x8] sm:$0xff] %v975_v57 }
 0x227   : > { %v982_v58 = vld [vmem:[#allocation2] sm:$0xff] }
 0x228   : > { %v991_v61 = vadd.f32 %v1158_v59, %v982_v58 }
 0x22a   : > { %v995_v1 = vadd.f32 %v993_v60, %v991_v61 }
 0x22b   : > { %v983_v62 = vld [vmem:[#allocation2 + $0x8] sm:$0xff] }
 0x22c   : > { %v992_v63 = vadd.f32 %v1158_v59, %v983_v62  ;;  %997 = vadd.xlane.f32.xlu0 %v995_v1 }
 0x22e   : > { %v996_v2 = vadd.f32 %v994_v0, %v992_v63 }
 0x230   : > { %999 = vadd.xlane.f32.xlu0 %v996_v2 }
 0x2b9   : > { %v998_v3 = vpop.xlane.xlu0 %997 }
 0x2ba   : > { %v1002_v4 = vmul.f32 0.0078125, %v998_v3 }
 0x2bc   : > { %v1004_v5 = vsub.f32 %v995_v1, %v1002_v4 }
 0x2bd   : > { %v1000_v6 = vpop.xlane.xlu0 %999 }
 0x2be   : > { %v1003_v7 = vmul.f32 0.0078125, %v1000_v6  ;;  %v1006_v8 = vmul.f32 %v1004_v5, %v1004_v5 }
 0x2c0   : > { %v1005_v9 = vsub.f32 %v996_v2, %v1003_v7  ;;  %1008 = vadd.xlane.f32.xlu1 %v1006_v8 }
 0x2c2   : > { %v1007_v10 = vmul.f32 %v1005_v9, %v1005_v9 }
 0x2c4   : > { %1010 = vadd.xlane.f32.xlu1 %v1007_v10 }
 0x34d   : > { %v1009_v11 = vpop.xlane.xlu1 %1008 }
 0x34e   : > { %v1012_v12 = vmul.f32 0.0078125, %v1009_v11 }
 0x350   : > { %v1014_v13 = vadd.f32 1e-05, %v1012_v12 }
 0x351   : > { %v1011_v14 = vpop.xlane.xlu1 %1010 }
 0x352   : > { %1412 = vrsqrt.f32 %v1014_v13  ;;  %v1013_v15 = vmul.f32 0.0078125, %v1011_v14 }
 0x354   : > { %v1015_v16 = vadd.f32 1e-05, %v1013_v15 }
 0x356   : > { %1414 = vrsqrt.f32 %v1015_v16 }
 0x35c   : > { %v1413_v17 = vpop.eup %1412 }
 0x35d   : > { %v1018_v19 = vmul.f32 %v1413_v17, %v1004_v5 }
 0x35f   : > { %v1027_v21 = vmul.f32 %v1159_v18, %v1018_v19 }
 0x360   : > { %v1415_v22 = vpop.eup %1414 }
 0x361   : > { %v1036_v23 = vadd.f32 %v1160_v20, %v1027_v21  ;;  %v1019_v24 = vmul.f32 %v1415_v22, %v1005_v9 }
 0x363   : > { %1038 = vst [vmem:[%s1879_s7] sm:$0xff] %v1036_v23  ;;  %v1028_v25 = vmul.f32 %v1159_v18, %v1019_v24 }
 0x365   : > { %v1037_v26 = vadd.f32 %v1160_v20, %v1028_v25 }
 0x367   : > { %1039 = vst [vmem:[%s1879_s7 + $0x8] sm:$0xff] %v1037_v26 }
 0x368 PF: > { %s17_s28 = sadd.s32 1, %s1454_s28   ;;  %s1880_s24 = smov %s1442_s25 }
 0x369   : > { %p14_p13 = scmp.ge.s32.totalorder %s17_s28, 6   ;;  %s1881_s25 = smov %s1533_s9 }
 0x36a   : > { %s1882_s26 = smov %s1450_s27  ;;  %s1883_s27 = smov %s1885_s29 }
 0x36b   :  { %16 = sbr.rel (!%p14_p13) target bundleno = 3 (0x3), region = 123 }

// kernel: transformer_forward.39
= control target key start
LH: loop header
LB: loop body
LE: loop exit
PB: predicated region body
PF: predicated region fallthrough
CT: control target
= control target key end

     0   :  { %v225_v3 = vmov 0.0   ;;  %v154_v51 = vlaneseq  ;;  %s363_s1 = inlined_call_operand.vmem [shape: f32[128,256], index: 1, kind: input, shape index: {}]   ;;  %s364_s0 = inlined_call_operand.vmem [shape: f32[16,128], index: 0, kind: input, shape index: {}]   ;;  %s365_s2 = inlined_call_operand.vmem [shape: f32[1,256], index: 2, kind: input, shape index: {}]   ;;  %s366_s3 = inlined_call_operand.vmem [shape: f32[16,256], index: 3, kind: output, shape index: {}]  }
   0x1   :  { %v29_v0 = vld [vmem:[%s363_s1 + $0x8] sm:$0xff]  ;;  %v31_v1 = vld [vmem:[%s363_s1 + $0x18] sm:$0xff]  ;;  %v28_v2 = vld [vmem:[%s363_s1] sm:$0xff]  ;;  %124 = vmatprep.mubr.f32.mxu0 %v225_v3  ;;  %130 = vmatprep.mubr.f32.mxu1 %v225_v3 }
   0x2   :  { %v176_v4 = vpack.c.bf16 %v31_v1, %v29_v0  ;;  %v30_v5 = vld [vmem:[%s363_s1 + $0x10] sm:$0xff]  ;;  %v33_v6 = vld [vmem:[%s363_s1 + $0x28] sm:$0xff]  ;;  %v35_v7 = vld [vmem:[%s363_s1 + $0x38] sm:$0xff]  ;;  %v155_v52 = vshrl.u32 %v154_v51, 7 }
   0x3   :  { %v178_v8 = vpack.c.bf16 %v30_v5, %v28_v2  ;;  %v180_v9 = vpack.c.bf16 %v35_v7, %v33_v6  ;;  %v32_v10 = vld [vmem:[%s363_s1 + $0x20] sm:$0xff]  ;;  %v34_v11 = vld [vmem:[%s363_s1 + $0x30] sm:$0xff]  ;;  %v37_v12 = vld [vmem:[%s363_s1 + $0x48] sm:$0xff] }
   0x4   :  { %177 = vmatprep.subr.bf16.mxu0 %v176_v4  ;;  %208 = vmatprep.subr.bf16.mxu1 %v176_v4  ;;  %v39_v13 = vld [vmem:[%s363_s1 + $0x58] sm:$0xff]  ;;  %v182_v14 = vpack.c.bf16 %v34_v11, %v32_v10  ;;  %v36_v16 = vld [vmem:[%s363_s1 + $0x40] sm:$0xff]  ;;  %v38_v17 = vld [vmem:[%s363_s1 + $0x50] sm:$0xff]  ;;  %v156_v53 = vsub.s32 0, %v155_v52  ;;  %v160_v55 = vsub.s32 1, %v155_v52 }
   0x5   :  { %179 = vmatpush1.bf16.msra.mxu0 %v178_v8  ;;  %216 = vmatpush1.bf16.msra.mxu1 %v178_v8  ;;  %v184_v15 = vpack.c.bf16 %v39_v13, %v37_v12  ;;  %v41_v18 = vld [vmem:[%s363_s1 + $0x68] sm:$0xff]  ;;  %v43_v19 = vld [vmem:[%s363_s1 + $0x78] sm:$0xff]  ;;  %v186_v20 = vpack.c.bf16 %v38_v17, %v36_v16  ;;  %v40_v22 = vld [vmem:[%s363_s1 + $0x60] sm:$0xff] }
   0x6   :  { %181 = vmatprep.subr.bf16.mxu0 %v180_v9  ;;  %209 = vmatprep.subr.bf16.mxu1 %v180_v9  ;;  %v188_v21 = vpack.c.bf16 %v43_v19, %v41_v18  ;;  %v42_v23 = vld [vmem:[%s363_s1 + $0x70] sm:$0xff]  ;;  %v45_v24 = vld [vmem:[%s363_s1 + $0x88] sm:$0xff]  ;;  %v47_v25 = vld [vmem:[%s363_s1 + $0x98] sm:$0xff] }
   0x7   :  { %v190_v26 = vpack.c.bf16 %v42_v23, %v40_v22  ;;  %v192_v27 = vpack.c.bf16 %v47_v25, %v45_v24  ;;  %v44_v28 = vld [vmem:[%s363_s1 + $0x80] sm:$0xff]  ;;  %v46_v29 = vld [vmem:[%s363_s1 + $0x90] sm:$0xff]  ;;  %v49_v30 = vld [vmem:[%s363_s1 + $0xa8] sm:$0xff] }
   0x8   :  { %v51_v31 = vld [vmem:[%s363_s1 + $0xb8] sm:$0xff]  ;;  %v194_v32 = vpack.c.bf16 %v46_v29, %v44_v28  ;;  %v48_v34 = vld [vmem:[%s363_s1 + $0xa0] sm:$0xff]  ;;  %v50_v35 = vld [vmem:[%s363_s1 + $0xb0] sm:$0xff] }
   0x9   :  { %183 = vmatpush1.bf16.msra.mxu0 %v182_v14  ;;  %217 = vmatpush1.bf16.msra.mxu1 %v182_v14  ;;  %v196_v33 = vpack.c.bf16 %v51_v31, %v49_v30  ;;  %v53_v36 = vld [vmem:[%s363_s1 + $0xc8] sm:$0xff]  ;;  %v55_v37 = vld [vmem:[%s363_s1 + $0xd8] sm:$0xff]  ;;  %v198_v38 = vpack.c.bf16 %v50_v35, %v48_v34  ;;  %v52_v40 = vld [vmem:[%s363_s1 + $0xc0] sm:$0xff] }
   0xa   :  { %185 = vmatprep.subr.bf16.mxu0 %v184_v15  ;;  %210 = vmatprep.subr.bf16.mxu1 %v184_v15  ;;  %v200_v39 = vpack.c.bf16 %v55_v37, %v53_v36  ;;  %v54_v41 = vld [vmem:[%s363_s1 + $0xd0] sm:$0xff]  ;;  %v57_v42 = vld [vmem:[%s363_s1 + $0xe8] sm:$0xff]  ;;  %v59_v43 = vld [vmem:[%s363_s1 + $0xf8] sm:$0xff] }
   0xb   :  { %v202_v44 = vpack.c.bf16 %v54_v41, %v52_v40  ;;  %v204_v45 = vpack.c.bf16 %v59_v43, %v57_v42  ;;  %v56_v46 = vld [vmem:[%s363_s1 + $0xe0] sm:$0xff]  ;;  %v58_v47 = vld [vmem:[%s363_s1 + $0xf0] sm:$0xff]  ;;  %v27_v50 = vld [vmem:[%s364_s0 + $0x8] sm:$0xff] }
   0xc   :  { %v206_v48 = vpack.c.bf16 %v58_v47, %v56_v46  ;;  %v26_v49 = vld [vmem:[%s364_s0] sm:$0xff] }
   0xd   :  { %187 = vmatpush1.bf16.msra.mxu0 %v186_v20  ;;  %218 = vmatpush1.bf16.msra.mxu1 %v186_v20  ;;  %v152_v54 = vld [vmem:[%s365_s2] sm:$0x3] }
   0xe   :  { %189 = vmatprep.subr.bf16.mxu0 %v188_v21  ;;  %211 = vmatprep.subr.bf16.mxu1 %v188_v21  ;;  %v157_v56 = vrot.slane %v152_v54, %v156_v53  ;;  %v161_v57 = vrot.slane %v152_v54, %v160_v55 }
  0x11   :  { %191 = vmatpush1.bf16.msra.mxu0 %v190_v26  ;;  %219 = vmatpush1.bf16.msra.mxu1 %v190_v26 }
  0x12   :  { %193 = vmatprep.subr.bf16.mxu0 %v192_v27  ;;  %212 = vmatprep.subr.bf16.mxu1 %v192_v27 }
  0x15   :  { %195 = vmatpush1.bf16.msra.mxu0 %v194_v32  ;;  %220 = vmatpush1.bf16.msra.mxu1 %v194_v32 }
  0x16   :  { %197 = vmatprep.subr.bf16.mxu0 %v196_v33  ;;  %213 = vmatprep.subr.bf16.mxu1 %v196_v33 }
  0x19   :  { %199 = vmatpush1.bf16.msra.mxu0 %v198_v38  ;;  %221 = vmatpush1.bf16.msra.mxu1 %v198_v38 }
  0x1a   :  { %201 = vmatprep.subr.bf16.mxu0 %v200_v39  ;;  %214 = vmatprep.subr.bf16.mxu1 %v200_v39 }
  0x1d   :  { %203 = vmatpush1.bf16.msra.mxu0 %v202_v44  ;;  %222 = vmatpush1.bf16.msra.mxu1 %v202_v44 }
  0x1e   :  { %205 = vmatprep.subr.bf16.mxu0 %v204_v45  ;;  %215 = vmatprep.subr.bf16.mxu1 %v204_v45 }
  0x21   :  { %207 = vmatpush1.bf16.msra.mxu0 %v206_v48  ;;  %223 = vmatpush1.bf16.msra.mxu1 %v206_v48 }
  0x24   :  { %125 = vmatmul.mubr.f32.vlgmr.msra.gmra.mrb[0].mxu0 %v26_v49  ;;  %131 = vmatmul.mubr.f32.vlgmr.msra.gmra.mrb[0].mxu1 %v27_v50 }
  0xf7   :  { %v126_v58 = vpop.f32.mrb[0].mxu0  ;;  %v132_v59 = vpop.f32.mrb[0].mxu1 }
  0xf8   :  { %v164_v60 = vadd.f32 %v157_v56, %v126_v58  ;;  %v166_v61 = vadd.f32 %v157_v56, %v132_v59  ;;  %v128_v62 = vpop.f32.mrb[1].mxu0  ;;  %v134_v63 = vpop.f32.mrb[1].mxu1 }
  0xf9   :  { %v165_v0 = vadd.f32 %v161_v57, %v128_v62  ;;  %v167_v1 = vadd.f32 %v161_v57, %v134_v63 }
  0xfa   :  { %168 = vst [vmem:[%s366_s3] sm:$0xff] %v164_v60  ;;  %170 = vst [vmem:[%s366_s3 + $0x10] sm:$0xff] %v166_v61 }
  0xfb   :  { %169 = vst [vmem:[%s366_s3 + $0x8] sm:$0xff] %v165_v0  ;;  %171 = vst [vmem:[%s366_s3 + $0x18] sm:$0xff] %v167_v1 }

// kernel: transformer_forward.46
= control target key start
LH: loop header
LB: loop body
LE: loop exit
PB: predicated region body
PF: predicated region fallthrough
CT: control target
= control target key end

     0   :  { %s308_s1 = inlined_call_operand.vmem [shape: f32[128,128], index: 1, kind: input, shape index: {}]   ;;  %s309_s0 = inlined_call_operand.vmem [shape: f32[16,128], index: 0, kind: input, shape index: {}]   ;;  %s310_s2 = inlined_call_operand.vmem [shape: f32[1,128], index: 2, kind: input, shape index: {}]   ;;  %s311_s3 = inlined_call_operand.vmem [shape: f32[16,128], index: 3, kind: output, shape index: {}]  }
   0x1   :  { %v24_v0 = vld [vmem:[%s308_s1] sm:$0xff]  ;;  %v25_v1 = vld [vmem:[%s308_s1 + $0x8] sm:$0xff]  ;;  %v26_v2 = vld [vmem:[%s308_s1 + $0x10] sm:$0xff] }
   0x2   :  { %v193_v3 = vpack.c.bf16 %v25_v1, %v24_v0  ;;  %v27_v4 = vld [vmem:[%s308_s1 + $0x18] sm:$0xff]  ;;  %v28_v6 = vld [vmem:[%s308_s1 + $0x20] sm:$0xff]  ;;  %v29_v7 = vld [vmem:[%s308_s1 + $0x28] sm:$0xff] }
   0x3   :  { %v197_v5 = vpack.c.bf16 %v27_v4, %v26_v2  ;;  %v201_v8 = vpack.c.bf16 %v29_v7, %v28_v6  ;;  %v22_v9 = vld [vmem:[%s309_s0] sm:$0xff]  ;;  %v30_v10 = vld [vmem:[%s308_s1 + $0x30] sm:$0xff]  ;;  %v31_v11 = vld [vmem:[%s308_s1 + $0x38] sm:$0xff] }
   0x4   :  { %194 = vmatprep.subr.bf16.mxu0 %v193_v3  ;;  %190 = vmatprep.mubr.f32.mxu0 %v22_v9  ;;  %v205_v12 = vpack.c.bf16 %v31_v11, %v30_v10  ;;  %v32_v13 = vld [vmem:[%s308_s1 + $0x40] sm:$0xff]  ;;  %v33_v14 = vld [vmem:[%s308_s1 + $0x48] sm:$0xff]  ;;  %v34_v16 = vld [vmem:[%s308_s1 + $0x50] sm:$0xff] }
   0x5   :  { %196 = vmatpush3.bf16.msra.mxu0 %v193_v3  ;;  %v209_v15 = vpack.c.bf16 %v33_v14, %v32_v13  ;;  %v35_v17 = vld [vmem:[%s308_s1 + $0x58] sm:$0xff]  ;;  %v36_v19 = vld [vmem:[%s308_s1 + $0x60] sm:$0xff]  ;;  %v37_v20 = vld [vmem:[%s308_s1 + $0x68] sm:$0xff] }
   0x6   :  { %198 = vmatprep.subr.bf16.mxu0 %v197_v5  ;;  %v213_v18 = vpack.c.bf16 %v35_v17, %v34_v16  ;;  %v217_v21 = vpack.c.bf16 %v37_v20, %v36_v19  ;;  %v38_v22 = vld [vmem:[%s308_s1 + $0x70] sm:$0xff]  ;;  %v39_v23 = vld [vmem:[%s308_s1 + $0x78] sm:$0xff]  ;;  %v23_v25 = vld [vmem:[%s309_s0 + $0x8] sm:$0xff] }
   0x7   :  { %v221_v24 = vpack.c.bf16 %v39_v23, %v38_v22  ;;  %v139_v26 = vld [vmem:[%s310_s2] ss:$0 sm:$0xff] }
   0x9   :  { %200 = vmatpush3.bf16.msra.mxu0 %v197_v5 }
   0xa   :  { %202 = vmatprep.subr.bf16.mxu0 %v201_v8 }
   0xd   :  { %204 = vmatpush3.bf16.msra.mxu0 %v201_v8 }
   0xe   :  { %206 = vmatprep.subr.bf16.mxu0 %v205_v12 }
  0x11   :  { %208 = vmatpush3.bf16.msra.mxu0 %v205_v12 }
  0x12   :  { %210 = vmatprep.subr.bf16.mxu0 %v209_v15 }
  0x15   :  { %212 = vmatpush3.bf16.msra.mxu0 %v209_v15 }
  0x16   :  { %214 = vmatprep.subr.bf16.mxu0 %v213_v18 }
  0x19   :  { %216 = vmatpush3.bf16.msra.mxu0 %v213_v18 }
  0x1a   :  { %218 = vmatprep.subr.bf16.mxu0 %v217_v21 }
  0x1d   :  { %220 = vmatpush3.bf16.msra.mxu0 %v217_v21 }
  0x1e   :  { %222 = vmatprep.subr.bf16.mxu0 %v221_v24 }
  0x21   :  { %224 = vmatpush3.bf16.msra.mxu0 %v221_v24 }
  0x24   :  { %191 = vmatmul.mubr.f32.vlgmr.msra.gmra.mrb[0].mxu0 %v23_v25 }
  0xf7   :  { %v192_v27 = vpop.f32.mrb[0].mxu0 }
  0xf8   :  { %v132_v28 = vadd.f32 %v192_v27, %v139_v26  ;;  %v106_v29 = vpop.f32.mrb[1].mxu0 }
  0xf9   :  { %v131_v30 = vadd.f32 %v139_v26, %v106_v29 }
  0xfa   :  { %134 = vst [vmem:[%s311_s3 + $0x8] sm:$0xff] %v132_v28 }
  0xfb   :  { %133 = vst [vmem:[%s311_s3] sm:$0xff] %v131_v30 }

// kernel: transformer_forward.40
= control target key start
LH: loop header
LB: loop body
LE: loop exit
PB: predicated region body
PF: predicated region fallthrough
CT: control target
= control target key end

     0   :  { %s731_s12 = smov 0   ;;  %s781_s0 = inlined_call_operand.vmem [shape: f32[2,8,128], index: 0, kind: input, shape index: {}]   ;;  %s782_s1 = inlined_call_operand.vmem [shape: f32[2,8,256], index: 1, kind: input, shape index: {}, may-alias: {1,2}]   ;;  %s783_s2 = inlined_call_operand.vmem [shape: f32[2,8,256], index: 2, kind: input, shape index: {}, may-alias: {1,2}]   ;;  %s784_s3 = inlined_call_operand.vmem [shape: f32[2,8,128], index: 3, kind: output, shape index: {}]  }
   0x1 LB: > { %s631_s13 = sadd.s32 4294967295, %s706_s12   ;;  %p635_p0 = scmp.ge.s32.totalorder %s706_s12, 1  ;;  %s706_s12 = sphi %s731_s12, %s13_s12  }
   0x2   : > { %p157_p1 = scmp.lt.s32.totalorder %s706_s12, 3 }
   0x4   : > { %p158_p2 = pnand %p635_p0, %p157_p1 }
   0x5   : > { %p190_p3 = scmp.lt.s32.totalorder (!%p158_p2), %s631_s13, 1  ;;  %v708_v0 = vmov (!%p158_p2), 0.0   ;;  %vm709_vm0 = vmmov (!%p158_p2), 0   ;;  %vm212_vm1 = vcmask (!%p158_p2), 523264   ;;  %vm290_vm2 = vcmask (!%p158_p2), 64512   ;;  %s710_s22 = smov (!%p158_p2), 64  }
   0x6   : > { %161 = sbr.rel (%p158_p2) target bundleno = 1409 (0x581), region = 32  ;;  %661 = vmatprep.subr.mxu0 (!%p158_p2), %v708_v0  ;;  %663 = vmatprep.mubr.msk.f32.mxu0 (!%p158_p2), %vm709_vm0, %v708_v0 }
   0x7   : > { %666 = vmatprep.subr.mxu1 (!%p158_p2), %v708_v0  ;;  %668 = vmatprep.mubr.msk.f32.mxu1 (!%p158_p2), %vm709_vm0, %v708_v0 }
   0xd   : > { %s786_s13 = smov (!%p190_p3, %s631_s13), 1 }
   0xe   : > { %s651_s14 = sshll.u32 %s786_s13, 4  ;;  %s636_s15 = sshll.u32 %s786_s13, 3 }
   0xf   : > { %s198_s18 = scalar_lea.vmem %s782_s1, %s651_s14  ;;  %s193_s21 = scalar_lea.vmem %s781_s0, %s636_s15 }
  0x10   : > { %v210_v1 = vld [vmem:[%s198_s18] sm:$0xff]  ;;  %s591_s25 = scalar_lea.vmem %s783_s2, %s651_s14  ;;  %s208_s28 = scalar_lea.vmem %s784_s3, %s636_s15 }
  0x11   : > { %662 = vmatpush3.xpose.msk.msra.mxu0 %vm212_vm1, %v210_v1  ;;  %v209_v2 = vld [vmem:[%s193_s21] sm:$0xff]  ;;  %377 = vrot.lane.b32.xlu1 %v210_v1, %s710_s22  ;;  %v642_v12 = vld [vmem:[%s591_s25 + $0x8] sm:$0xff] }
  0x12   : > { %676 = vmatprep.subr.mxu0 %v708_v0  ;;  %667 = vmatpush3.msra.mxu1 %v642_v12 }
  0x13   : > { %671 = vmatprep.subr.mxu1 %v708_v0 }
  0x14   : > { %664 = vmatmul.mubr.msk.f32.vlgmr.msra.gmra.mrb[0].mxu0 %vm212_vm1, %v209_v2 }
  0x15   : > { %678 = vmatprep.mubr.msk.f32.mxu0 %vm709_vm0, %v708_v0  ;;  %375 = vrot.lane.b32.xlu1 %v209_v2, %s710_s22 }
  0x83   : > { %v378_v14 = vpop.permute.xlu1 %377 }
  0x87   : > { %v376_v17 = vpop.permute.xlu1 %375 }
  0xe7   : > { %v285_v3 = vpop.f32.mrb[0].mxu0 }
  0xe8   : > { %v289_v4 = vmul.f32 0.125, %v285_v3  ;;  %v665_v5 = vpop.f32.mrb[1].mxu0 }
  0xea   : > { %v291_v6 = vsel %vm290_vm2, %v289_v4, -inf }
  0xeb   : > { %292 = vmax.xlane.f32.xlu0 %v291_v6 }
 0x178   : > { %v293_v7 = vpop.xlane.xlu0 %292 }
 0x179   : > { %v294_v8 = vsub.f32 %v289_v4, %v293_v7 }
 0x17b   : > { %v295_v9 = vmul.f32 1.442695, %v294_v8 }
 0x17d   : > { %692 = vpow2.f32 %v295_v9 }
 0x187   : > { %v693_v10 = vpop.eup %692 }
 0x188   : > { %v297_v11 = vsel %vm290_vm2, %v693_v10, 0.0 }
 0x189   : > { %298 = vadd.xlane.f32.xlu0 %v297_v11 }
 0x216   : > { %v299_v13 = vpop.xlane.xlu0 %298 }
 0x217   : > { %694 = vrcp.f32 %v299_v13 }
 0x221   : > { %v695_v15 = vpop.eup %694 }
 0x222   : > { %v301_v16 = vmul.f32 %v695_v15, %v693_v10 }
 0x224   : > { %669 = vmatmul.mubr.msk.f32.vlgmr.msra.gmra.mrb[0].mxu1 %vm290_vm2, %v301_v16 }
 0x225   : > { %672 = vmatpush3.xpose.msk.msra.mxu1 %vm212_vm1, %v378_v14  ;;  %673 = vmatprep.mubr.msk.f32.mxu1 %vm709_vm0, %v708_v0 }
 0x228   : > { %674 = vmatmul.mubr.msk.f32.vlgmr.msra.gmra.mrb[2].mxu1 %vm212_vm1, %v376_v17 }
 0x2f7   : > { %v371_v18 = vpop.f32.mrb[0].mxu1 }
 0x2f8   : > { %v670_v19 = vpop.f32.mrb[1].mxu1 }
 0x2fb   : > { %v449_v20 = vpop.f32.mrb[2].mxu1 }
 0x2fc   : > { %v453_v21 = vmul.f32 0.125, %v449_v20  ;;  %v675_v22 = vpop.f32.mrb[3].mxu1 }
 0x2fe   : > { %v454_v23 = vsel %vm290_vm2, %v453_v21, -inf }
 0x2ff   : > { %455 = vmax.xlane.f32.xlu0 %v454_v23 }
 0x315   : > { %466 = vrot.lane.b32.xlu0 %v642_v12, %s710_s22 }
 0x38c   : > { %v456_v24 = vpop.xlane.xlu0 %455 }
 0x38d   : > { %v457_v25 = vsub.f32 %v453_v21, %v456_v24 }
 0x38f   : > { %v458_v26 = vmul.f32 1.442695, %v457_v25 }
 0x390   : > { %v467_v29 = vpop.permute.xlu0 %466 }
 0x391   : > { %696 = vpow2.f32 %v458_v26  ;;  %677 = vmatpush3.msra.mxu0 %v467_v29 }
 0x39b   : > { %v697_v27 = vpop.eup %696 }
 0x39c   : > { %v460_v28 = vsel %vm290_vm2, %v697_v27, 0.0 }
 0x39d   : > { %461 = vadd.xlane.f32.xlu1 %v460_v28 }
 0x42a   : > { %v462_v30 = vpop.xlane.xlu1 %461 }
 0x42b   : > { %698 = vrcp.f32 %v462_v30 }
 0x435   : > { %v699_v31 = vpop.eup %698 }
 0x436   : > { %v464_v32 = vmul.f32 %v699_v31, %v697_v27 }
 0x438   : > { %679 = vmatmul.mubr.msk.f32.vlgmr.msra.gmra.mrb[2].mxu0 %vm290_vm2, %v464_v32 }
 0x50b   : > { %v538_v33 = vpop.f32.mrb[2].mxu0 }
 0x50c   : > { %543 = vrot.lane.b32.xlu0 %v538_v33, %s710_s22  ;;  %v680_v34 = vpop.f32.mrb[3].mxu0 }
 0x57e   : > { %v544_v35 = vpop.permute.xlu0 %543 }
 0x57f   : > { %v546_v36 = vsel %vm212_vm1, %v371_v18, %v544_v35 }
 0x580   : > { %547 = vst [vmem:[%s208_s28] sm:$0xff] %v546_v36 }
 0x581 PF: > { %s13_s12 = sadd.s32 1, %s706_s12  }
 0x582   : > { %p10_p4 = scmp.ge.s32.totalorder %s13_s12, 4  }
 0x584   :  { %12 = sbr.rel (!%p10_p4) target bundleno = 1 (0x1), region = 68 }

</bundles_post_ra>
